<compile_context>
chip_gen: v6e
topology: v6e:2x2x1
jax: 0.10.0
libtpu: 0.0.40
codegen_flags: <defaults>
</compile_context>

<pallas_src>
import math

import jax
import jax.numpy as jnp
import numpy as np
from jax import lax
from jax.experimental import pallas as pl
from jax.experimental.pallas import tpu as pltpu

WORD_EMB_DIM = 100
TAG_EMB_DIM = 25
INPUT_DIM = WORD_EMB_DIM + TAG_EMB_DIM   # 125
HIDDEN_DIM = 100
EPS = 1e-20                              # reference softmax epsilon

HP = 128      # padded hidden (lane width)
IPW = 128     # padded word-emb feature dim
IPT = 128     # padded tag-emb feature dim
LP = 128      # padded label dim
NEG = -1e30   # "minus infinity" for padded label-bias lanes


def _sigmoid(x):
    # sigmoid(x) == 0.5*tanh(0.5*x) + 0.5  -> one EUP push instead of exp+recip
    return 0.5 * jnp.tanh(0.5 * x) + 0.5


# ------------------------------ fused kernel ------------------------------
def _make_kernel(n, n_sub, score_pad):
    """n: true sentence length; n_sub: n rounded up to 8; score_pad: >=128."""
    Hp = HP

    def run_layer(gbuf, whh_bf, out_buf):
        # gbuf holds the hoisted input projections (n_sub, 4*Hp); whh_bf is the
        # bf16 recurrent weight value (loaded once, closed over -> hoisted).
        def step(t, carry):
            h, c = carry
            g = gbuf[pl.ds(t, 1), :] + jnp.dot(
                h.astype(jnp.bfloat16), whh_bf, preferred_element_type=jnp.float32)
            i = _sigmoid(g[:, 0 * Hp:1 * Hp])
            f = _sigmoid(g[:, 1 * Hp:2 * Hp])
            gg = jnp.tanh(g[:, 2 * Hp:3 * Hp])
            o = _sigmoid(g[:, 3 * Hp:4 * Hp])
            c = f * c + i * gg
            h = o * jnp.tanh(c)
            out_buf[pl.ds(t, 1), :] = h          # per-step store -> no concat
            return h, c

        h0 = jnp.zeros((1, Hp), jnp.float32)
        c0 = jnp.zeros((1, Hp), jnp.float32)
        lax.fori_loop(0, n, step, (h0, c0), unroll=True)

    def kernel(xw_ref, xt_ref,
               wih0w_ref, wih0t_ref, whh0_ref, b0_ref,
               wih1_ref, whh1_ref, b1_ref,
               whead_ref, bhead_ref, wb_ref,
               scores_ref, labels_ref,
               gbuf, hbuf0, h1buf):
        # scratch persists across grid steps -> zero the rows we rely on being 0.
        hbuf0[...] = jnp.zeros_like(hbuf0)
        h1buf[...] = jnp.zeros_like(h1buf)

        # ---- layer-0 input projection hoisted out of the recurrence ----
        gbuf[...] = (jnp.dot(xw_ref[...], wih0w_ref[...],
                             preferred_element_type=jnp.float32)
                     + jnp.dot(xt_ref[...], wih0t_ref[...],
                               preferred_element_type=jnp.float32)
                     + b0_ref[...])
        run_layer(gbuf, whh0_ref[...], hbuf0)

        # ---- layer-1 input projection + recurrence ----
        gbuf[...] = jnp.dot(hbuf0[...].astype(jnp.bfloat16), wih1_ref[...],
                            preferred_element_type=jnp.float32) + b1_ref[...]
        run_layer(gbuf, whh1_ref[...], h1buf)

        # ---- fused head: one (n_sub,128)x(128,256) pass -> label logits + u ----
        h1_bf = h1buf[...].astype(jnp.bfloat16)                      # (score_pad, HP)
        head = jnp.dot(h1_bf[0:n_sub, :], whead_ref[...],
                       preferred_element_type=jnp.float32) + bhead_ref[...]
        logits = head[:, 0:LP]                                       # (n_sub, LP)
        u_col = head[:, LP:LP + 1]                                   # (n_sub, 1)

        # v_row[j] = h_j . wb  -- lane-dense: padded rows of h1buf are zero.
        v_row = lax.dot_general(wb_ref[...], h1_bf,
                                dimension_numbers=(((1,), (1,)), ((), ())),
                                preferred_element_type=jnp.float32)  # (1, score_pad)

        # scores: s[i, j] = u_i + v_j, per-column softmax over valid rows only.
        raw_s = u_col + v_row                                        # (n_sub, score_pad)
        e = jnp.exp(raw_s)   # no max-subtraction: matches the reference softmax
        valid = lax.broadcasted_iota(jnp.int32, (n_sub, score_pad), 0) < n
        e = jnp.where(valid, e, 0.0)
        scores_ref[...] = e / (jnp.sum(e, axis=0, keepdims=True) + EPS)

        # labels: per-row softmax; padded label lanes carry -1e30 bias -> exp==0.
        el = jnp.exp(logits)
        labels_ref[...] = el / (jnp.sum(el, axis=1, keepdims=True) + EPS)

    return kernel


def lstm_rnn_forward(kp, word_ids, tag_ids, label_dim):
    """word_ids, tag_ids: (B, n) int32.  Returns (scores (B,n,n), labels (B,n-1,L))."""
    B, n = word_ids.shape
    n_sub = ((n + 7) // 8) * 8                # sublane-aligned token rows
    score_pad = ((n + 127) // 128) * 128      # lane-dense score columns
    pad = n_sub - n
    wid = jnp.pad(word_ids.astype(jnp.int32), ((0, 0), (0, pad)))
    tid = jnp.pad(tag_ids.astype(jnp.int32), ((0, 0), (0, pad)))

    # Embedding gather stays outside the kernel: only n rows/sentence move,
    # full tables never enter VMEM.
    xw = jnp.take(kp["word_emb"], wid, axis=0)   # (B, n_sub, IPW) bf16
    xt = jnp.take(kp["tag_emb"], tid, axis=0)    # (B, n_sub, IPT) bf16

    def const_spec(shape):        # weight: DMA'd once, VMEM-resident across grid
        return pl.BlockSpec(shape, lambda b, _s=shape: (0,) * len(_s))

    def per_sentence(shape):      # per-sentence block, double-buffered
        return pl.BlockSpec((None,) + shape, lambda b: (b, 0, 0))

    grid_spec = pltpu.PrefetchScalarGridSpec(
        num_scalar_prefetch=0,
        grid=(B,),
        in_specs=[
            per_sentence((n_sub, IPW)),          # xw
            per_sentence((n_sub, IPT)),          # xt
            const_spec((IPW, 4 * HP)),           # wih0w
            const_spec((IPT, 4 * HP)),           # wih0t
            const_spec((HP, 4 * HP)),            # whh0
            const_spec((1, 4 * HP)),             # b0
            const_spec((HP, 4 * HP)),            # wih1
            const_spec((HP, 4 * HP)),            # whh1
            const_spec((1, 4 * HP)),             # b1
            const_spec((HP, 2 * LP)),            # whead = [wl | wa | 0]
            const_spec((1, 2 * LP)),             # bhead = [bl/-inf | c | 0]
            const_spec((1, HP)),                 # wb
        ],
        out_specs=(per_sentence((n_sub, score_pad)),
                   per_sentence((n_sub, LP))),
        scratch_shapes=[
            pltpu.VMEM((n_sub, 4 * HP), jnp.float32),   # gate pre-activations
            pltpu.VMEM((n_sub, HP), jnp.float32),       # layer-0 hidden sequence
            pltpu.VMEM((score_pad, HP), jnp.float32),   # layer-1 hidden sequence (padded)
        ],
    )

    scores_full, labels_full = pl.pallas_call(
        _make_kernel(n, n_sub, score_pad),
        out_shape=(jax.ShapeDtypeStruct((B, n_sub, score_pad), jnp.float32),
                   jax.ShapeDtypeStruct((B, n_sub, LP), jnp.float32)),
        grid_spec=grid_spec,
        compiler_params=pltpu.CompilerParams(
            dimension_semantics=("parallel",)),          # v7x: shard sentences across TCs
    )(xw, xt,
      kp["wih0w"], kp["wih0t"], kp["whh0"], kp["b0"],
      kp["wih1"], kp["whh1"], kp["b1"],
      kp["whead"], kp["bhead"], kp["wb"])

    return scores_full[:, :n, :n], labels_full[:, 1:n, :label_dim]


# --------------------- parameter init / kernel weight prep ---------------------
def init_raw_params(key, vocab_size, tag_size, label_dim):
    """Parameters in PyTorch layout (for the pure-JAX reference)."""
    ks = iter(jax.random.split(key, 20))

    def unif(shape, bound):
        return jax.random.uniform(next(ks), shape, jnp.float32, -bound, bound)

    kb = 1.0 / math.sqrt(HIDDEN_DIM)
    raw = {}
    raw["word_emb"] = jax.random.normal(next(ks), (vocab_size, WORD_EMB_DIM), jnp.float32)
    raw["tag_emb"] = jax.random.normal(next(ks), (tag_size, TAG_EMB_DIM), jnp.float32)

    raw["w_ih0"] = unif((4 * HIDDEN_DIM, INPUT_DIM), kb)
    raw["w_hh0"] = unif((4 * HIDDEN_DIM, HIDDEN_DIM), kb)
    raw["b_ih0"] = unif((4 * HIDDEN_DIM,), kb)
    raw["b_hh0"] = unif((4 * HIDDEN_DIM,), kb)
    raw["w_ih1"] = unif((4 * HIDDEN_DIM, HIDDEN_DIM), kb)
    raw["w_hh1"] = unif((4 * HIDDEN_DIM, HIDDEN_DIM), kb)
    raw["b_ih1"] = unif((4 * HIDDEN_DIM,), kb)
    raw["b_hh1"] = unif((4 * HIDDEN_DIM,), kb)

    bnd = 1.0 / math.sqrt(2 * HIDDEN_DIM)
    raw["w_hh2"] = unif((HIDDEN_DIM, 2 * HIDDEN_DIM), bnd)   # hidden2hidden
    raw["b_hh2"] = unif((HIDDEN_DIM,), bnd)
    bnd = 1.0 / math.sqrt(HIDDEN_DIM)
    raw["w2"] = unif((1, HIDDEN_DIM), bnd)                   # hidden2score
    raw["b2"] = unif((1,), bnd)
    raw["wl"] = unif((label_dim, HIDDEN_DIM), bnd)           # hidden2label
    raw["bl"] = unif((label_dim,), bnd)
    return raw


def _stack_gates(w, in_pad):
    """(4H, in) PyTorch weight -> (in_pad, 4*HP) gate-major lane blocks, zero-padded."""
    in_dim = w.shape[1]
    w4 = w.reshape(4, HIDDEN_DIM, in_dim)          # (4, H, in), gate order i,f,g,o
    w4 = jnp.transpose(w4, (2, 0, 1))              # (in, 4, H)
    w4 = jnp.pad(w4, ((0, in_pad - in_dim), (0, 0), (0, HP - HIDDEN_DIM)))
    return w4.reshape(in_pad, 4 * HP)


def _stack_bias(b_ih, b_hh):
    b = (b_ih + b_hh).reshape(4, HIDDEN_DIM)
    b = jnp.pad(b, ((0, 0), (0, HP - HIDDEN_DIM)))
    return b.reshape(1, 4 * HP)


def prep_kernel_params(raw):
    label_dim = raw["wl"].shape[0]
    p = {}
    # bf16 embedding tables (gathered outside the kernel).
    p["word_emb"] = jnp.pad(raw["word_emb"],
                            ((0, 0), (0, IPW - WORD_EMB_DIM))).astype(jnp.bfloat16)
    p["tag_emb"] = jnp.pad(raw["tag_emb"],
                           ((0, 0), (0, IPT - TAG_EMB_DIM))).astype(jnp.bfloat16)

    # layer 0: split W_ih into word / tag parts so the concat disappears.
    p["wih0w"] = _stack_gates(raw["w_ih0"][:, :WORD_EMB_DIM], IPW).astype(jnp.bfloat16)
    p["wih0t"] = _stack_gates(raw["w_ih0"][:, WORD_EMB_DIM:], IPT).astype(jnp.bfloat16)
    p["whh0"] = _stack_gates(raw["w_hh0"], HP).astype(jnp.bfloat16)
    p["b0"] = _stack_bias(raw["b_ih0"], raw["b_hh0"])                  # f32

    p["wih1"] = _stack_gates(raw["w_ih1"], HP).astype(jnp.bfloat16)
    p["whh1"] = _stack_gates(raw["w_hh1"], HP).astype(jnp.bfloat16)
    p["b1"] = _stack_bias(raw["b_ih1"], raw["b_hh1"])                  # f32

    # score head composed on host: s[i,j] = h_i.wa + h_j.wb + c
    W1a = raw["w_hh2"][:, :HIDDEN_DIM]
    W1b = raw["w_hh2"][:, HIDDEN_DIM:]
    w2v = raw["w2"][0]
    wa = W1a.T @ w2v
    wb = W1b.T @ w2v
    c = jnp.dot(w2v, raw["b_hh2"]) + raw["b2"][0]

    # fused head RHS: lanes [0:128] = label weights, lane 128 = wa, rest 0.
    wl_t = jnp.pad(raw["wl"].T, ((0, HP - HIDDEN_DIM), (0, LP - label_dim)))   # (HP, LP)
    wa_col = jnp.pad(wa, (0, HP - HIDDEN_DIM)).reshape(HP, 1)
    whead = jnp.zeros((HP, 2 * LP), jnp.float32)
    whead = whead.at[:, :LP].set(wl_t).at[:, LP:LP + 1].set(wa_col)
    p["whead"] = whead.astype(jnp.bfloat16)

    bhead = jnp.zeros((1, 2 * LP), jnp.float32)
    bl_pad = jnp.pad(raw["bl"], (0, LP - label_dim), constant_values=NEG)
    bhead = bhead.at[0, :LP].set(bl_pad).at[0, LP].set(c)
    p["bhead"] = bhead                                                 # f32 (NEG trick)

    p["wb"] = jnp.pad(wb, (0, HP - HIDDEN_DIM)).reshape(1, HP).astype(jnp.bfloat16)
    return p


# --------------------------- pure-JAX reference ---------------------------
def reference_forward(raw, word_ids, tag_ids):
    emb = jnp.concatenate(
        [raw["word_emb"][word_ids], raw["tag_emb"][tag_ids]], axis=1)        # (n, 125)

    def lstm_layer(x_seq, w_ih, w_hh, b_ih, b_hh):
        Hd = HIDDEN_DIM
        h = jnp.zeros((Hd,), jnp.float32)
        c = jnp.zeros((Hd,), jnp.float32)
        outs = []
        for t in range(x_seq.shape[0]):
            g = w_ih @ x_seq[t] + w_hh @ h + b_ih + b_hh
            i = jax.nn.sigmoid(g[0:Hd])
            f = jax.nn.sigmoid(g[Hd:2 * Hd])
            gg = jnp.tanh(g[2 * Hd:3 * Hd])
            o = jax.nn.sigmoid(g[3 * Hd:4 * Hd])
            c = f * c + i * gg
            h = o * jnp.tanh(c)
            outs.append(h)
        return jnp.stack(outs)

    h0 = lstm_layer(emb, raw["w_ih0"], raw["w_hh0"], raw["b_ih0"], raw["b_hh0"])
    h1 = lstm_layer(h0, raw["w_ih1"], raw["w_hh1"], raw["b_ih1"], raw["b_hh1"])

    W1a = raw["w_hh2"][:, :HIDDEN_DIM]
    W1b = raw["w_hh2"][:, HIDDEN_DIM:]
    A = h1 @ W1a.T
    B = h1 @ W1b.T
    pre = A[:, None, :] + B[None, :, :] + raw["b_hh2"]                       # (n, n, H)
    raw_s = jnp.einsum("ijh,h->ij", pre, raw["w2"][0]) + raw["b2"][0]
    e = jnp.exp(raw_s)
    scores = e / (jnp.sum(e, axis=0, keepdims=True) + EPS)

    logits = h1[1:] @ raw["wl"].T + raw["bl"]
    el = jnp.exp(logits)
    labels = el / (jnp.sum(el, axis=1, keepdims=True) + EPS)
    return scores, labels


# ---------------------------------- main ----------------------------------
if __name__ == "__main__":
    key = jax.random.PRNGKey(0)
    vocab_size, tag_size, label_dim = 50, 12, 10
    B, n = 4, 8   # 4 sentences of length 8 (one grid step each)

    k_params, k_words, k_tags = jax.random.split(key, 3)
    raw = init_raw_params(k_params, vocab_size, tag_size, label_dim)
    kp = prep_kernel_params(raw)
    word_ids = jax.random.randint(k_words, (B, n), 0, vocab_size)
    tag_ids = jax.random.randint(k_tags, (B, n), 0, tag_size)

    scores, labels = lstm_rnn_forward(kp, word_ids, tag_ids, label_dim)
    jax.block_until_ready((scores, labels))

    assert scores.shape == (B, n, n)
    assert labels.shape == (B, n - 1, label_dim)

    # f32 reference; kernel uses bf16 matmul operands with f32 accumulation.
    with jax.default_matmul_precision("highest"):
        for b in range(B):
            ref_s, ref_l = reference_forward(raw, word_ids[b], tag_ids[b])
            np.testing.assert_allclose(np.asarray(scores[b]), np.asarray(ref_s),
                                       rtol=2e-2, atol=2e-3)
            np.testing.assert_allclose(np.asarray(labels[b]), np.asarray(ref_l),
                                       rtol=2e-2, atol=2e-3)
    print("KERNEL_OK")
</pallas_src>

<mosaic_0001>
module attributes {stable_mosaic.version = 11 : i64} {
  func.func @kernel(%arg0: i32, %arg1: memref<1x8x128xbf16, #tpu.memory_space<vmem>>, %arg2: memref<1x8x128xbf16, #tpu.memory_space<vmem>>, %arg3: memref<128x512xbf16, #tpu.memory_space<vmem>>, %arg4: memref<128x512xbf16, #tpu.memory_space<vmem>>, %arg5: memref<128x512xbf16, #tpu.memory_space<vmem>>, %arg6: memref<1x512xf32, #tpu.memory_space<vmem>>, %arg7: memref<128x512xbf16, #tpu.memory_space<vmem>>, %arg8: memref<128x512xbf16, #tpu.memory_space<vmem>>, %arg9: memref<1x512xf32, #tpu.memory_space<vmem>>, %arg10: memref<128x256xbf16, #tpu.memory_space<vmem>>, %arg11: memref<1x256xf32, #tpu.memory_space<vmem>>, %arg12: memref<1x128xbf16, #tpu.memory_space<vmem>>, %arg13: memref<1x8x128xf32, #tpu.memory_space<vmem>>, %arg14: memref<1x8x128xf32, #tpu.memory_space<vmem>>, %arg15: memref<8x512xf32, #tpu.memory_space<vmem>>, %arg16: memref<8x128xf32, #tpu.memory_space<vmem>>, %arg17: memref<128x128xf32, #tpu.memory_space<vmem>>) attributes {dimension_semantics = [#tpu.dimension_semantics<parallel>], iteration_bounds = array<i64: 4>, scalar_prefetch = 0 : i64, scratch_operands = 3 : i64, tpu.core_type = #tpu.core_type<tc>, window_params = [{transform_indices = @transform_0, window_bounds = array<i64: 1, 8, 128>}, {transform_indices = @transform_1, window_bounds = array<i64: 1, 8, 128>}, {pipeline_mode = #tpu.pipeline_mode<synchronous>, transform_indices = @transform_2, window_bounds = array<i64: 128, 512>}, {pipeline_mode = #tpu.pipeline_mode<synchronous>, transform_indices = @transform_3, window_bounds = array<i64: 128, 512>}, {pipeline_mode = #tpu.pipeline_mode<synchronous>, transform_indices = @transform_4, window_bounds = array<i64: 128, 512>}, {pipeline_mode = #tpu.pipeline_mode<synchronous>, transform_indices = @transform_5, window_bounds = array<i64: 1, 512>}, {pipeline_mode = #tpu.pipeline_mode<synchronous>, transform_indices = @transform_6, window_bounds = array<i64: 128, 512>}, {pipeline_mode = #tpu.pipeline_mode<synchronous>, transform_indices = @transform_7, window_bounds = array<i64: 128, 512>}, {pipeline_mode = #tpu.pipeline_mode<synchronous>, transform_indices = @transform_8, window_bounds = array<i64: 1, 512>}, {pipeline_mode = #tpu.pipeline_mode<synchronous>, transform_indices = @transform_9, window_bounds = array<i64: 128, 256>}, {pipeline_mode = #tpu.pipeline_mode<synchronous>, transform_indices = @transform_10, window_bounds = array<i64: 1, 256>}, {pipeline_mode = #tpu.pipeline_mode<synchronous>, transform_indices = @transform_11, window_bounds = array<i64: 1, 128>}, {transform_indices = @transform_12, window_bounds = array<i64: 1, 8, 128>}, {transform_indices = @transform_13, window_bounds = array<i64: 1, 8, 128>}]} {
    %cst = arith.constant 0.000000e+00 : f32
    %0 = vector.broadcast %cst : f32 to vector<8x128xf32>
    %c0 = arith.constant 0 : index
    %c0_0 = arith.constant 0 : index
    %1 = vector.load %arg16[%c0, %c0_0] : memref<8x128xf32, #tpu.memory_space<vmem>>, vector<8x128xf32>
    tpu.vector_store %arg16[%c0, %c0_0], %0 {strides = array<i32>} : memref<8x128xf32, #tpu.memory_space<vmem>>, vector<8x128xf32>,
    %cst_1 = arith.constant 0.000000e+00 : f32
    %2 = vector.broadcast %cst_1 : f32 to vector<128x128xf32>
    %c0_2 = arith.constant 0 : index
    %c0_3 = arith.constant 0 : index
    %3 = vector.load %arg17[%c0_2, %c0_3] : memref<128x128xf32, #tpu.memory_space<vmem>>, vector<128x128xf32>
    tpu.vector_store %arg17[%c0_2, %c0_3], %2 {strides = array<i32>} : memref<128x128xf32, #tpu.memory_space<vmem>>, vector<128x128xf32>,
    %c0_4 = arith.constant 0 : index
    %c0_5 = arith.constant 0 : index
    %c0_6 = arith.constant 0 : index
    %4 = vector.load %arg1[%c0_4, %c0_5, %c0_6] : memref<1x8x128xbf16, #tpu.memory_space<vmem>>, vector<1x8x128xbf16>
    %5 = vector.shape_cast %4 : vector<1x8x128xbf16> to vector<8x128xbf16>
    %c0_7 = arith.constant 0 : index
    %c0_8 = arith.constant 0 : index
    %6 = vector.load %arg3[%c0_7, %c0_8] : memref<128x512xbf16, #tpu.memory_space<vmem>>, vector<128x512xbf16>
    %cst_9 = arith.constant dense<0.000000e+00> : vector<8x512xf32>
    %7 = tpu.matmul %5, %6, %cst_9 {dimension_numbers = #tpu.dot_dimension_numbers<[1], [0], [0], [1], [0, 0, 1, 1], [], []>} : vector<8x128xbf16>, vector<128x512xbf16>, vector<8x512xf32> -> vector<8x512xf32>
    %c0_10 = arith.constant 0 : index
    %c0_11 = arith.constant 0 : index
    %c0_12 = arith.constant 0 : index
    %8 = vector.load %arg2[%c0_10, %c0_11, %c0_12] : memref<1x8x128xbf16, #tpu.memory_space<vmem>>, vector<1x8x128xbf16>
    %9 = vector.shape_cast %8 : vector<1x8x128xbf16> to vector<8x128xbf16>
    %c0_13 = arith.constant 0 : index
    %c0_14 = arith.constant 0 : index
    %10 = vector.load %arg4[%c0_13, %c0_14] : memref<128x512xbf16, #tpu.memory_space<vmem>>, vector<128x512xbf16>
    %cst_15 = arith.constant dense<0.000000e+00> : vector<8x512xf32>
    %11 = tpu.matmul %9, %10, %cst_15 {dimension_numbers = #tpu.dot_dimension_numbers<[1], [0], [0], [1], [0, 0, 1, 1], [], []>} : vector<8x128xbf16>, vector<128x512xbf16>, vector<8x512xf32> -> vector<8x512xf32>
    %12 = arith.addf %7, %11 : vector<8x512xf32>
    %c0_16 = arith.constant 0 : index
    %c0_17 = arith.constant 0 : index
    %13 = vector.load %arg6[%c0_16, %c0_17] : memref<1x512xf32, #tpu.memory_space<vmem>>, vector<1x512xf32>
    %14 = vector.broadcast %13 : vector<1x512xf32> to vector<8x512xf32>
    %15 = arith.addf %12, %14 : vector<8x512xf32>
    %c0_18 = arith.constant 0 : index
    %c0_19 = arith.constant 0 : index
    %16 = vector.load %arg15[%c0_18, %c0_19] : memref<8x512xf32, #tpu.memory_space<vmem>>, vector<8x512xf32>
    tpu.vector_store %arg15[%c0_18, %c0_19], %15 {strides = array<i32>} : memref<8x512xf32, #tpu.memory_space<vmem>>, vector<8x512xf32>,
    %c0_20 = arith.constant 0 : index
    %c0_21 = arith.constant 0 : index
    %17 = vector.load %arg5[%c0_20, %c0_21] : memref<128x512xbf16, #tpu.memory_space<vmem>>, vector<128x512xbf16>
    %cst_22 = arith.constant 0.000000e+00 : f32
    %18 = vector.broadcast %cst_22 : f32 to vector<1x128xf32>
    %cst_23 = arith.constant 0.000000e+00 : f32
    %19 = vector.broadcast %cst_23 : f32 to vector<1x128xf32>
    %c0_i32 = arith.constant 0 : i32
    %20 = arith.index_cast %c0_i32 : i32 to index
    %c0_24 = arith.constant 0 : index
    %21 = vector.load %arg15[%20, %c0_24] : memref<8x512xf32, #tpu.memory_space<vmem>>, vector<1x512xf32>
    %22 = arith.truncf %18 : vector<1x128xf32> to vector<1x128xbf16>
    %cst_25 = arith.constant dense<0.000000e+00> : vector<1x512xf32>
    %23 = tpu.matmul %22, %17, %cst_25 {dimension_numbers = #tpu.dot_dimension_numbers<[1], [0], [0], [1], [0, 0, 1, 1], [], []>} : vector<1x128xbf16>, vector<128x512xbf16>, vector<1x512xf32> -> vector<1x512xf32>
    %24 = arith.addf %21, %23 : vector<1x512xf32>
    %25 = vector.extract_strided_slice %24 {offsets = [0, 0], sizes = [1, 128], strides = [1, 1]} : vector<1x512xf32> to vector<1x128xf32>
    %cst_26 = arith.constant 5.000000e-01 : f32
    %26 = vector.broadcast %cst_26 : f32 to vector<1x128xf32>
    %27 = arith.mulf %26, %25 : vector<1x128xf32>
    %28 = math.tanh %27 : vector<1x128xf32>
    %cst_27 = arith.constant 5.000000e-01 : f32
    %29 = vector.broadcast %cst_27 : f32 to vector<1x128xf32>
    %30 = arith.mulf %29, %28 : vector<1x128xf32>
    %cst_28 = arith.constant 5.000000e-01 : f32
    %31 = vector.broadcast %cst_28 : f32 to vector<1x128xf32>
    %32 = arith.addf %30, %31 : vector<1x128xf32>
    %33 = vector.extract_strided_slice %24 {offsets = [0, 128], sizes = [1, 128], strides = [1, 1]} : vector<1x512xf32> to vector<1x128xf32>
    %cst_29 = arith.constant 5.000000e-01 : f32
    %34 = vector.broadcast %cst_29 : f32 to vector<1x128xf32>
    %35 = arith.mulf %34, %33 : vector<1x128xf32>
    %36 = math.tanh %35 : vector<1x128xf32>
    %cst_30 = arith.constant 5.000000e-01 : f32
    %37 = vector.broadcast %cst_30 : f32 to vector<1x128xf32>
    %38 = arith.mulf %37, %36 : vector<1x128xf32>
    %cst_31 = arith.constant 5.000000e-01 : f32
    %39 = vector.broadcast %cst_31 : f32 to vector<1x128xf32>
    %40 = arith.addf %38, %39 : vector<1x128xf32>
    %41 = vector.extract_strided_slice %24 {offsets = [0, 256], sizes = [1, 128], strides = [1, 1]} : vector<1x512xf32> to vector<1x128xf32>
    %42 = math.tanh %41 : vector<1x128xf32>
    %43 = vector.extract_strided_slice %24 {offsets = [0, 384], sizes = [1, 128], strides = [1, 1]} : vector<1x512xf32> to vector<1x128xf32>
    %cst_32 = arith.constant 5.000000e-01 : f32
    %44 = vector.broadcast %cst_32 : f32 to vector<1x128xf32>
    %45 = arith.mulf %44, %43 : vector<1x128xf32>
    %46 = math.tanh %45 : vector<1x128xf32>
    %cst_33 = arith.constant 5.000000e-01 : f32
    %47 = vector.broadcast %cst_33 : f32 to vector<1x128xf32>
    %48 = arith.mulf %47, %46 : vector<1x128xf32>
    %cst_34 = arith.constant 5.000000e-01 : f32
    %49 = vector.broadcast %cst_34 : f32 to vector<1x128xf32>
    %50 = arith.addf %48, %49 : vector<1x128xf32>
    %51 = arith.mulf %40, %19 : vector<1x128xf32>
    %52 = arith.mulf %32, %42 : vector<1x128xf32>
    %53 = arith.addf %51, %52 : vector<1x128xf32>
    %54 = math.tanh %53 : vector<1x128xf32>
    %55 = arith.mulf %50, %54 : vector<1x128xf32>
    %56 = arith.index_cast %c0_i32 : i32 to index
    %c0_35 = arith.constant 0 : index
    %57 = vector.load %arg16[%56, %c0_35] : memref<8x128xf32, #tpu.memory_space<vmem>>, vector<1x128xf32>
    tpu.vector_store %arg16[%56, %c0_35], %55 {strides = array<i32>} : memref<8x128xf32, #tpu.memory_space<vmem>>, vector<1x128xf32>,
    %c1_i32 = arith.constant 1 : i32
    %58 = arith.index_cast %c1_i32 : i32 to index
    %c0_36 = arith.constant 0 : index
    %59 = vector.load %arg15[%58, %c0_36] : memref<8x512xf32, #tpu.memory_space<vmem>>, vector<1x512xf32>
    %60 = arith.truncf %55 : vector<1x128xf32> to vector<1x128xbf16>
    %cst_37 = arith.constant dense<0.000000e+00> : vector<1x512xf32>
    %61 = tpu.matmul %60, %17, %cst_37 {dimension_numbers = #tpu.dot_dimension_numbers<[1], [0], [0], [1], [0, 0, 1, 1], [], []>} : vector<1x128xbf16>, vector<128x512xbf16>, vector<1x512xf32> -> vector<1x512xf32>
    %62 = arith.addf %59, %61 : vector<1x512xf32>
    %63 = vector.extract_strided_slice %62 {offsets = [0, 0], sizes = [1, 128], strides = [1, 1]} : vector<1x512xf32> to vector<1x128xf32>
    %cst_38 = arith.constant 5.000000e-01 : f32
    %64 = vector.broadcast %cst_38 : f32 to vector<1x128xf32>
    %65 = arith.mulf %64, %63 : vector<1x128xf32>
    %66 = math.tanh %65 : vector<1x128xf32>
    %cst_39 = arith.constant 5.000000e-01 : f32
    %67 = vector.broadcast %cst_39 : f32 to vector<1x128xf32>
    %68 = arith.mulf %67, %66 : vector<1x128xf32>
    %cst_40 = arith.constant 5.000000e-01 : f32
    %69 = vector.broadcast %cst_40 : f32 to vector<1x128xf32>
    %70 = arith.addf %68, %69 : vector<1x128xf32>
    %71 = vector.extract_strided_slice %62 {offsets = [0, 128], sizes = [1, 128], strides = [1, 1]} : vector<1x512xf32> to vector<1x128xf32>
    %cst_41 = arith.constant 5.000000e-01 : f32
    %72 = vector.broadcast %cst_41 : f32 to vector<1x128xf32>
    %73 = arith.mulf %72, %71 : vector<1x128xf32>
    %74 = math.tanh %73 : vector<1x128xf32>
    %cst_42 = arith.constant 5.000000e-01 : f32
    %75 = vector.broadcast %cst_42 : f32 to vector<1x128xf32>
    %76 = arith.mulf %75, %74 : vector<1x128xf32>
    %cst_43 = arith.constant 5.000000e-01 : f32
    %77 = vector.broadcast %cst_43 : f32 to vector<1x128xf32>
    %78 = arith.addf %76, %77 : vector<1x128xf32>
    %79 = vector.extract_strided_slice %62 {offsets = [0, 256], sizes = [1, 128], strides = [1, 1]} : vector<1x512xf32> to vector<1x128xf32>
    %80 = math.tanh %79 : vector<1x128xf32>
    %81 = vector.extract_strided_slice %62 {offsets = [0, 384], sizes = [1, 128], strides = [1, 1]} : vector<1x512xf32> to vector<1x128xf32>
    %cst_44 = arith.constant 5.000000e-01 : f32
    %82 = vector.broadcast %cst_44 : f32 to vector<1x128xf32>
    %83 = arith.mulf %82, %81 : vector<1x128xf32>
    %84 = math.tanh %83 : vector<1x128xf32>
    %cst_45 = arith.constant 5.000000e-01 : f32
    %85 = vector.broadcast %cst_45 : f32 to vector<1x128xf32>
    %86 = arith.mulf %85, %84 : vector<1x128xf32>
    %cst_46 = arith.constant 5.000000e-01 : f32
    %87 = vector.broadcast %cst_46 : f32 to vector<1x128xf32>
    %88 = arith.addf %86, %87 : vector<1x128xf32>
    %89 = arith.mulf %78, %53 : vector<1x128xf32>
    %90 = arith.mulf %70, %80 : vector<1x128xf32>
    %91 = arith.addf %89, %90 : vector<1x128xf32>
    %92 = math.tanh %91 : vector<1x128xf32>
    %93 = arith.mulf %88, %92 : vector<1x128xf32>
    %94 = arith.index_cast %c1_i32 : i32 to index
    %c0_47 = arith.constant 0 : index
    %95 = vector.load %arg16[%94, %c0_47] : memref<8x128xf32, #tpu.memory_space<vmem>>, vector<1x128xf32>
    tpu.vector_store %arg16[%94, %c0_47], %93 {strides = array<i32>} : memref<8x128xf32, #tpu.memory_space<vmem>>, vector<1x128xf32>,
    %c2_i32 = arith.constant 2 : i32
    %96 = arith.index_cast %c2_i32 : i32 to index
    %c0_48 = arith.constant 0 : index
    %97 = vector.load %arg15[%96, %c0_48] : memref<8x512xf32, #tpu.memory_space<vmem>>, vector<1x512xf32>
    %98 = arith.truncf %93 : vector<1x128xf32> to vector<1x128xbf16>
    %cst_49 = arith.constant dense<0.000000e+00> : vector<1x512xf32>
    %99 = tpu.matmul %98, %17, %cst_49 {dimension_numbers = #tpu.dot_dimension_numbers<[1], [0], [0], [1], [0, 0, 1, 1], [], []>} : vector<1x128xbf16>, vector<128x512xbf16>, vector<1x512xf32> -> vector<1x512xf32>
    %100 = arith.addf %97, %99 : vector<1x512xf32>
    %101 = vector.extract_strided_slice %100 {offsets = [0, 0], sizes = [1, 128], strides = [1, 1]} : vector<1x512xf32> to vector<1x128xf32>
    %cst_50 = arith.constant 5.000000e-01 : f32
    %102 = vector.broadcast %cst_50 : f32 to vector<1x128xf32>
    %103 = arith.mulf %102, %101 : vector<1x128xf32>
    %104 = math.tanh %103 : vector<1x128xf32>
    %cst_51 = arith.constant 5.000000e-01 : f32
    %105 = vector.broadcast %cst_51 : f32 to vector<1x128xf32>
    %106 = arith.mulf %105, %104 : vector<1x128xf32>
    %cst_52 = arith.constant 5.000000e-01 : f32
    %107 = vector.broadcast %cst_52 : f32 to vector<1x128xf32>
    %108 = arith.addf %106, %107 : vector<1x128xf32>
    %109 = vector.extract_strided_slice %100 {offsets = [0, 128], sizes = [1, 128], strides = [1, 1]} : vector<1x512xf32> to vector<1x128xf32>
    %cst_53 = arith.constant 5.000000e-01 : f32
    %110 = vector.broadcast %cst_53 : f32 to vector<1x128xf32>
    %111 = arith.mulf %110, %109 : vector<1x128xf32>
    %112 = math.tanh %111 : vector<1x128xf32>
    %cst_54 = arith.constant 5.000000e-01 : f32
    %113 = vector.broadcast %cst_54 : f32 to vector<1x128xf32>
    %114 = arith.mulf %113, %112 : vector<1x128xf32>
    %cst_55 = arith.constant 5.000000e-01 : f32
    %115 = vector.broadcast %cst_55 : f32 to vector<1x128xf32>
    %116 = arith.addf %114, %115 : vector<1x128xf32>
    %117 = vector.extract_strided_slice %100 {offsets = [0, 256], sizes = [1, 128], strides = [1, 1]} : vector<1x512xf32> to vector<1x128xf32>
    %118 = math.tanh %117 : vector<1x128xf32>
    %119 = vector.extract_strided_slice %100 {offsets = [0, 384], sizes = [1, 128], strides = [1, 1]} : vector<1x512xf32> to vector<1x128xf32>
    %cst_56 = arith.constant 5.000000e-01 : f32
    %120 = vector.broadcast %cst_56 : f32 to vector<1x128xf32>
    %121 = arith.mulf %120, %119 : vector<1x128xf32>
    %122 = math.tanh %121 : vector<1x128xf32>
    %cst_57 = arith.constant 5.000000e-01 : f32
    %123 = vector.broadcast %cst_57 : f32 to vector<1x128xf32>
    %124 = arith.mulf %123, %122 : vector<1x128xf32>
    %cst_58 = arith.constant 5.000000e-01 : f32
    %125 = vector.broadcast %cst_58 : f32 to vector<1x128xf32>
    %126 = arith.addf %124, %125 : vector<1x128xf32>
    %127 = arith.mulf %116, %91 : vector<1x128xf32>
    %128 = arith.mulf %108, %118 : vector<1x128xf32>
    %129 = arith.addf %127, %128 : vector<1x128xf32>
    %130 = math.tanh %129 : vector<1x128xf32>
    %131 = arith.mulf %126, %130 : vector<1x128xf32>
    %132 = arith.index_cast %c2_i32 : i32 to index
    %c0_59 = arith.constant 0 : index
    %133 = vector.load %arg16[%132, %c0_59] : memref<8x128xf32, #tpu.memory_space<vmem>>, vector<1x128xf32>
    tpu.vector_store %arg16[%132, %c0_59], %131 {strides = array<i32>} : memref<8x128xf32, #tpu.memory_space<vmem>>, vector<1x128xf32>,
    %c3_i32 = arith.constant 3 : i32
    %134 = arith.index_cast %c3_i32 : i32 to index
    %c0_60 = arith.constant 0 : index
    %135 = vector.load %arg15[%134, %c0_60] : memref<8x512xf32, #tpu.memory_space<vmem>>, vector<1x512xf32>
    %136 = arith.truncf %131 : vector<1x128xf32> to vector<1x128xbf16>
    %cst_61 = arith.constant dense<0.000000e+00> : vector<1x512xf32>
    %137 = tpu.matmul %136, %17, %cst_61 {dimension_numbers = #tpu.dot_dimension_numbers<[1], [0], [0], [1], [0, 0, 1, 1], [], []>} : vector<1x128xbf16>, vector<128x512xbf16>, vector<1x512xf32> -> vector<1x512xf32>
    %138 = arith.addf %135, %137 : vector<1x512xf32>
    %139 = vector.extract_strided_slice %138 {offsets = [0, 0], sizes = [1, 128], strides = [1, 1]} : vector<1x512xf32> to vector<1x128xf32>
    %cst_62 = arith.constant 5.000000e-01 : f32
    %140 = vector.broadcast %cst_62 : f32 to vector<1x128xf32>
    %141 = arith.mulf %140, %139 : vector<1x128xf32>
    %142 = math.tanh %141 : vector<1x128xf32>
    %cst_63 = arith.constant 5.000000e-01 : f32
    %143 = vector.broadcast %cst_63 : f32 to vector<1x128xf32>
    %144 = arith.mulf %143, %142 : vector<1x128xf32>
    %cst_64 = arith.constant 5.000000e-01 : f32
    %145 = vector.broadcast %cst_64 : f32 to vector<1x128xf32>
    %146 = arith.addf %144, %145 : vector<1x128xf32>
    %147 = vector.extract_strided_slice %138 {offsets = [0, 128], sizes = [1, 128], strides = [1, 1]} : vector<1x512xf32> to vector<1x128xf32>
    %cst_65 = arith.constant 5.000000e-01 : f32
    %148 = vector.broadcast %cst_65 : f32 to vector<1x128xf32>
    %149 = arith.mulf %148, %147 : vector<1x128xf32>
    %150 = math.tanh %149 : vector<1x128xf32>
    %cst_66 = arith.constant 5.000000e-01 : f32
    %151 = vector.broadcast %cst_66 : f32 to vector<1x128xf32>
    %152 = arith.mulf %151, %150 : vector<1x128xf32>
    %cst_67 = arith.constant 5.000000e-01 : f32
    %153 = vector.broadcast %cst_67 : f32 to vector<1x128xf32>
    %154 = arith.addf %152, %153 : vector<1x128xf32>
    %155 = vector.extract_strided_slice %138 {offsets = [0, 256], sizes = [1, 128], strides = [1, 1]} : vector<1x512xf32> to vector<1x128xf32>
    %156 = math.tanh %155 : vector<1x128xf32>
    %157 = vector.extract_strided_slice %138 {offsets = [0, 384], sizes = [1, 128], strides = [1, 1]} : vector<1x512xf32> to vector<1x128xf32>
    %cst_68 = arith.constant 5.000000e-01 : f32
    %158 = vector.broadcast %cst_68 : f32 to vector<1x128xf32>
    %159 = arith.mulf %158, %157 : vector<1x128xf32>
    %160 = math.tanh %159 : vector<1x128xf32>
    %cst_69 = arith.constant 5.000000e-01 : f32
    %161 = vector.broadcast %cst_69 : f32 to vector<1x128xf32>
    %162 = arith.mulf %161, %160 : vector<1x128xf32>
    %cst_70 = arith.constant 5.000000e-01 : f32
    %163 = vector.broadcast %cst_70 : f32 to vector<1x128xf32>
    %164 = arith.addf %162, %163 : vector<1x128xf32>
    %165 = arith.mulf %154, %129 : vector<1x128xf32>
    %166 = arith.mulf %146, %156 : vector<1x128xf32>
    %167 = arith.addf %165, %166 : vector<1x128xf32>
    %168 = math.tanh %167 : vector<1x128xf32>
    %169 = arith.mulf %164, %168 : vector<1x128xf32>
    %170 = arith.index_cast %c3_i32 : i32 to index
    %c0_71 = arith.constant 0 : index
    %171 = vector.load %arg16[%170, %c0_71] : memref<8x128xf32, #tpu.memory_space<vmem>>, vector<1x128xf32>
    tpu.vector_store %arg16[%170, %c0_71], %169 {strides = array<i32>} : memref<8x128xf32, #tpu.memory_space<vmem>>, vector<1x128xf32>,
    %c4_i32 = arith.constant 4 : i32
    %172 = arith.index_cast %c4_i32 : i32 to index
    %c0_72 = arith.constant 0 : index
    %173 = vector.load %arg15[%172, %c0_72] : memref<8x512xf32, #tpu.memory_space<vmem>>, vector<1x512xf32>
    %174 = arith.truncf %169 : vector<1x128xf32> to vector<1x128xbf16>
    %cst_73 = arith.constant dense<0.000000e+00> : vector<1x512xf32>
    %175 = tpu.matmul %174, %17, %cst_73 {dimension_numbers = #tpu.dot_dimension_numbers<[1], [0], [0], [1], [0, 0, 1, 1], [], []>} : vector<1x128xbf16>, vector<128x512xbf16>, vector<1x512xf32> -> vector<1x512xf32>
    %176 = arith.addf %173, %175 : vector<1x512xf32>
    %177 = vector.extract_strided_slice %176 {offsets = [0, 0], sizes = [1, 128], strides = [1, 1]} : vector<1x512xf32> to vector<1x128xf32>
    %cst_74 = arith.constant 5.000000e-01 : f32
    %178 = vector.broadcast %cst_74 : f32 to vector<1x128xf32>
    %179 = arith.mulf %178, %177 : vector<1x128xf32>
    %180 = math.tanh %179 : vector<1x128xf32>
    %cst_75 = arith.constant 5.000000e-01 : f32
    %181 = vector.broadcast %cst_75 : f32 to vector<1x128xf32>
    %182 = arith.mulf %181, %180 : vector<1x128xf32>
    %cst_76 = arith.constant 5.000000e-01 : f32
    %183 = vector.broadcast %cst_76 : f32 to vector<1x128xf32>
    %184 = arith.addf %182, %183 : vector<1x128xf32>
    %185 = vector.extract_strided_slice %176 {offsets = [0, 128], sizes = [1, 128], strides = [1, 1]} : vector<1x512xf32> to vector<1x128xf32>
    %cst_77 = arith.constant 5.000000e-01 : f32
    %186 = vector.broadcast %cst_77 : f32 to vector<1x128xf32>
    %187 = arith.mulf %186, %185 : vector<1x128xf32>
    %188 = math.tanh %187 : vector<1x128xf32>
    %cst_78 = arith.constant 5.000000e-01 : f32
    %189 = vector.broadcast %cst_78 : f32 to vector<1x128xf32>
    %190 = arith.mulf %189, %188 : vector<1x128xf32>
    %cst_79 = arith.constant 5.000000e-01 : f32
    %191 = vector.broadcast %cst_79 : f32 to vector<1x128xf32>
    %192 = arith.addf %190, %191 : vector<1x128xf32>
    %193 = vector.extract_strided_slice %176 {offsets = [0, 256], sizes = [1, 128], strides = [1, 1]} : vector<1x512xf32> to vector<1x128xf32>
    %194 = math.tanh %193 : vector<1x128xf32>
    %195 = vector.extract_strided_slice %176 {offsets = [0, 384], sizes = [1, 128], strides = [1, 1]} : vector<1x512xf32> to vector<1x128xf32>
    %cst_80 = arith.constant 5.000000e-01 : f32
    %196 = vector.broadcast %cst_80 : f32 to vector<1x128xf32>
    %197 = arith.mulf %196, %195 : vector<1x128xf32>
    %198 = math.tanh %197 : vector<1x128xf32>
    %cst_81 = arith.constant 5.000000e-01 : f32
    %199 = vector.broadcast %cst_81 : f32 to vector<1x128xf32>
    %200 = arith.mulf %199, %198 : vector<1x128xf32>
    %cst_82 = arith.constant 5.000000e-01 : f32
    %201 = vector.broadcast %cst_82 : f32 to vector<1x128xf32>
    %202 = arith.addf %200, %201 : vector<1x128xf32>
    %203 = arith.mulf %192, %167 : vector<1x128xf32>
    %204 = arith.mulf %184, %194 : vector<1x128xf32>
    %205 = arith.addf %203, %204 : vector<1x128xf32>
    %206 = math.tanh %205 : vector<1x128xf32>
    %207 = arith.mulf %202, %206 : vector<1x128xf32>
    %208 = arith.index_cast %c4_i32 : i32 to index
    %c0_83 = arith.constant 0 : index
    %209 = vector.load %arg16[%208, %c0_83] : memref<8x128xf32, #tpu.memory_space<vmem>>, vector<1x128xf32>
    tpu.vector_store %arg16[%208, %c0_83], %207 {strides = array<i32>} : memref<8x128xf32, #tpu.memory_space<vmem>>, vector<1x128xf32>,
    %c5_i32 = arith.constant 5 : i32
    %210 = arith.index_cast %c5_i32 : i32 to index
    %c0_84 = arith.constant 0 : index
    %211 = vector.load %arg15[%210, %c0_84] : memref<8x512xf32, #tpu.memory_space<vmem>>, vector<1x512xf32>
    %212 = arith.truncf %207 : vector<1x128xf32> to vector<1x128xbf16>
    %cst_85 = arith.constant dense<0.000000e+00> : vector<1x512xf32>
    %213 = tpu.matmul %212, %17, %cst_85 {dimension_numbers = #tpu.dot_dimension_numbers<[1], [0], [0], [1], [0, 0, 1, 1], [], []>} : vector<1x128xbf16>, vector<128x512xbf16>, vector<1x512xf32> -> vector<1x512xf32>
    %214 = arith.addf %211, %213 : vector<1x512xf32>
    %215 = vector.extract_strided_slice %214 {offsets = [0, 0], sizes = [1, 128], strides = [1, 1]} : vector<1x512xf32> to vector<1x128xf32>
    %cst_86 = arith.constant 5.000000e-01 : f32
    %216 = vector.broadcast %cst_86 : f32 to vector<1x128xf32>
    %217 = arith.mulf %216, %215 : vector<1x128xf32>
    %218 = math.tanh %217 : vector<1x128xf32>
    %cst_87 = arith.constant 5.000000e-01 : f32
    %219 = vector.broadcast %cst_87 : f32 to vector<1x128xf32>
    %220 = arith.mulf %219, %218 : vector<1x128xf32>
    %cst_88 = arith.constant 5.000000e-01 : f32
    %221 = vector.broadcast %cst_88 : f32 to vector<1x128xf32>
    %222 = arith.addf %220, %221 : vector<1x128xf32>
    %223 = vector.extract_strided_slice %214 {offsets = [0, 128], sizes = [1, 128], strides = [1, 1]} : vector<1x512xf32> to vector<1x128xf32>
    %cst_89 = arith.constant 5.000000e-01 : f32
    %224 = vector.broadcast %cst_89 : f32 to vector<1x128xf32>
    %225 = arith.mulf %224, %223 : vector<1x128xf32>
    %226 = math.tanh %225 : vector<1x128xf32>
    %cst_90 = arith.constant 5.000000e-01 : f32
    %227 = vector.broadcast %cst_90 : f32 to vector<1x128xf32>
    %228 = arith.mulf %227, %226 : vector<1x128xf32>
    %cst_91 = arith.constant 5.000000e-01 : f32
    %229 = vector.broadcast %cst_91 : f32 to vector<1x128xf32>
    %230 = arith.addf %228, %229 : vector<1x128xf32>
    %231 = vector.extract_strided_slice %214 {offsets = [0, 256], sizes = [1, 128], strides = [1, 1]} : vector<1x512xf32> to vector<1x128xf32>
    %232 = math.tanh %231 : vector<1x128xf32>
    %233 = vector.extract_strided_slice %214 {offsets = [0, 384], sizes = [1, 128], strides = [1, 1]} : vector<1x512xf32> to vector<1x128xf32>
    %cst_92 = arith.constant 5.000000e-01 : f32
    %234 = vector.broadcast %cst_92 : f32 to vector<1x128xf32>
    %235 = arith.mulf %234, %233 : vector<1x128xf32>
    %236 = math.tanh %235 : vector<1x128xf32>
    %cst_93 = arith.constant 5.000000e-01 : f32
    %237 = vector.broadcast %cst_93 : f32 to vector<1x128xf32>
    %238 = arith.mulf %237, %236 : vector<1x128xf32>
    %cst_94 = arith.constant 5.000000e-01 : f32
    %239 = vector.broadcast %cst_94 : f32 to vector<1x128xf32>
    %240 = arith.addf %238, %239 : vector<1x128xf32>
    %241 = arith.mulf %230, %205 : vector<1x128xf32>
    %242 = arith.mulf %222, %232 : vector<1x128xf32>
    %243 = arith.addf %241, %242 : vector<1x128xf32>
    %244 = math.tanh %243 : vector<1x128xf32>
    %245 = arith.mulf %240, %244 : vector<1x128xf32>
    %246 = arith.index_cast %c5_i32 : i32 to index
    %c0_95 = arith.constant 0 : index
    %247 = vector.load %arg16[%246, %c0_95] : memref<8x128xf32, #tpu.memory_space<vmem>>, vector<1x128xf32>
    tpu.vector_store %arg16[%246, %c0_95], %245 {strides = array<i32>} : memref<8x128xf32, #tpu.memory_space<vmem>>, vector<1x128xf32>,
    %c6_i32 = arith.constant 6 : i32
    %248 = arith.index_cast %c6_i32 : i32 to index
    %c0_96 = arith.constant 0 : index
    %249 = vector.load %arg15[%248, %c0_96] : memref<8x512xf32, #tpu.memory_space<vmem>>, vector<1x512xf32>
    %250 = arith.truncf %245 : vector<1x128xf32> to vector<1x128xbf16>
    %cst_97 = arith.constant dense<0.000000e+00> : vector<1x512xf32>
    %251 = tpu.matmul %250, %17, %cst_97 {dimension_numbers = #tpu.dot_dimension_numbers<[1], [0], [0], [1], [0, 0, 1, 1], [], []>} : vector<1x128xbf16>, vector<128x512xbf16>, vector<1x512xf32> -> vector<1x512xf32>
    %252 = arith.addf %249, %251 : vector<1x512xf32>
    %253 = vector.extract_strided_slice %252 {offsets = [0, 0], sizes = [1, 128], strides = [1, 1]} : vector<1x512xf32> to vector<1x128xf32>
    %cst_98 = arith.constant 5.000000e-01 : f32
    %254 = vector.broadcast %cst_98 : f32 to vector<1x128xf32>
    %255 = arith.mulf %254, %253 : vector<1x128xf32>
    %256 = math.tanh %255 : vector<1x128xf32>
    %cst_99 = arith.constant 5.000000e-01 : f32
    %257 = vector.broadcast %cst_99 : f32 to vector<1x128xf32>
    %258 = arith.mulf %257, %256 : vector<1x128xf32>
    %cst_100 = arith.constant 5.000000e-01 : f32
    %259 = vector.broadcast %cst_100 : f32 to vector<1x128xf32>
    %260 = arith.addf %258, %259 : vector<1x128xf32>
    %261 = vector.extract_strided_slice %252 {offsets = [0, 128], sizes = [1, 128], strides = [1, 1]} : vector<1x512xf32> to vector<1x128xf32>
    %cst_101 = arith.constant 5.000000e-01 : f32
    %262 = vector.broadcast %cst_101 : f32 to vector<1x128xf32>
    %263 = arith.mulf %262, %261 : vector<1x128xf32>
    %264 = math.tanh %263 : vector<1x128xf32>
    %cst_102 = arith.constant 5.000000e-01 : f32
    %265 = vector.broadcast %cst_102 : f32 to vector<1x128xf32>
    %266 = arith.mulf %265, %264 : vector<1x128xf32>
    %cst_103 = arith.constant 5.000000e-01 : f32
    %267 = vector.broadcast %cst_103 : f32 to vector<1x128xf32>
    %268 = arith.addf %266, %267 : vector<1x128xf32>
    %269 = vector.extract_strided_slice %252 {offsets = [0, 256], sizes = [1, 128], strides = [1, 1]} : vector<1x512xf32> to vector<1x128xf32>
    %270 = math.tanh %269 : vector<1x128xf32>
    %271 = vector.extract_strided_slice %252 {offsets = [0, 384], sizes = [1, 128], strides = [1, 1]} : vector<1x512xf32> to vector<1x128xf32>
    %cst_104 = arith.constant 5.000000e-01 : f32
    %272 = vector.broadcast %cst_104 : f32 to vector<1x128xf32>
    %273 = arith.mulf %272, %271 : vector<1x128xf32>
    %274 = math.tanh %273 : vector<1x128xf32>
    %cst_105 = arith.constant 5.000000e-01 : f32
    %275 = vector.broadcast %cst_105 : f32 to vector<1x128xf32>
    %276 = arith.mulf %275, %274 : vector<1x128xf32>
    %cst_106 = arith.constant 5.000000e-01 : f32
    %277 = vector.broadcast %cst_106 : f32 to vector<1x128xf32>
    %278 = arith.addf %276, %277 : vector<1x128xf32>
    %279 = arith.mulf %268, %243 : vector<1x128xf32>
    %280 = arith.mulf %260, %270 : vector<1x128xf32>
    %281 = arith.addf %279, %280 : vector<1x128xf32>
    %282 = math.tanh %281 : vector<1x128xf32>
    %283 = arith.mulf %278, %282 : vector<1x128xf32>
    %284 = arith.index_cast %c6_i32 : i32 to index
    %c0_107 = arith.constant 0 : index
    %285 = vector.load %arg16[%284, %c0_107] : memref<8x128xf32, #tpu.memory_space<vmem>>, vector<1x128xf32>
    tpu.vector_store %arg16[%284, %c0_107], %283 {strides = array<i32>} : memref<8x128xf32, #tpu.memory_space<vmem>>, vector<1x128xf32>,
    %c7_i32 = arith.constant 7 : i32
    %286 = arith.index_cast %c7_i32 : i32 to index
    %c0_108 = arith.constant 0 : index
    %287 = vector.load %arg15[%286, %c0_108] : memref<8x512xf32, #tpu.memory_space<vmem>>, vector<1x512xf32>
    %288 = arith.truncf %283 : vector<1x128xf32> to vector<1x128xbf16>
    %cst_109 = arith.constant dense<0.000000e+00> : vector<1x512xf32>
    %289 = tpu.matmul %288, %17, %cst_109 {dimension_numbers = #tpu.dot_dimension_numbers<[1], [0], [0], [1], [0, 0, 1, 1], [], []>} : vector<1x128xbf16>, vector<128x512xbf16>, vector<1x512xf32> -> vector<1x512xf32>
    %290 = arith.addf %287, %289 : vector<1x512xf32>
    %291 = vector.extract_strided_slice %290 {offsets = [0, 0], sizes = [1, 128], strides = [1, 1]} : vector<1x512xf32> to vector<1x128xf32>
    %cst_110 = arith.constant 5.000000e-01 : f32
    %292 = vector.broadcast %cst_110 : f32 to vector<1x128xf32>
    %293 = arith.mulf %292, %291 : vector<1x128xf32>
    %294 = math.tanh %293 : vector<1x128xf32>
    %cst_111 = arith.constant 5.000000e-01 : f32
    %295 = vector.broadcast %cst_111 : f32 to vector<1x128xf32>
    %296 = arith.mulf %295, %294 : vector<1x128xf32>
    %cst_112 = arith.constant 5.000000e-01 : f32
    %297 = vector.broadcast %cst_112 : f32 to vector<1x128xf32>
    %298 = arith.addf %296, %297 : vector<1x128xf32>
    %299 = vector.extract_strided_slice %290 {offsets = [0, 128], sizes = [1, 128], strides = [1, 1]} : vector<1x512xf32> to vector<1x128xf32>
    %cst_113 = arith.constant 5.000000e-01 : f32
    %300 = vector.broadcast %cst_113 : f32 to vector<1x128xf32>
    %301 = arith.mulf %300, %299 : vector<1x128xf32>
    %302 = math.tanh %301 : vector<1x128xf32>
    %cst_114 = arith.constant 5.000000e-01 : f32
    %303 = vector.broadcast %cst_114 : f32 to vector<1x128xf32>
    %304 = arith.mulf %303, %302 : vector<1x128xf32>
    %cst_115 = arith.constant 5.000000e-01 : f32
    %305 = vector.broadcast %cst_115 : f32 to vector<1x128xf32>
    %306 = arith.addf %304, %305 : vector<1x128xf32>
    %307 = vector.extract_strided_slice %290 {offsets = [0, 256], sizes = [1, 128], strides = [1, 1]} : vector<1x512xf32> to vector<1x128xf32>
    %308 = math.tanh %307 : vector<1x128xf32>
    %309 = vector.extract_strided_slice %290 {offsets = [0, 384], sizes = [1, 128], strides = [1, 1]} : vector<1x512xf32> to vector<1x128xf32>
    %cst_116 = arith.constant 5.000000e-01 : f32
    %310 = vector.broadcast %cst_116 : f32 to vector<1x128xf32>
    %311 = arith.mulf %310, %309 : vector<1x128xf32>
    %312 = math.tanh %311 : vector<1x128xf32>
    %cst_117 = arith.constant 5.000000e-01 : f32
    %313 = vector.broadcast %cst_117 : f32 to vector<1x128xf32>
    %314 = arith.mulf %313, %312 : vector<1x128xf32>
    %cst_118 = arith.constant 5.000000e-01 : f32
    %315 = vector.broadcast %cst_118 : f32 to vector<1x128xf32>
    %316 = arith.addf %314, %315 : vector<1x128xf32>
    %317 = arith.mulf %306, %281 : vector<1x128xf32>
    %318 = arith.mulf %298, %308 : vector<1x128xf32>
    %319 = arith.addf %317, %318 : vector<1x128xf32>
    %320 = math.tanh %319 : vector<1x128xf32>
    %321 = arith.mulf %316, %320 : vector<1x128xf32>
    %322 = arith.index_cast %c7_i32 : i32 to index
    %c0_119 = arith.constant 0 : index
    %323 = vector.load %arg16[%322, %c0_119] : memref<8x128xf32, #tpu.memory_space<vmem>>, vector<1x128xf32>
    tpu.vector_store %arg16[%322, %c0_119], %321 {strides = array<i32>} : memref<8x128xf32, #tpu.memory_space<vmem>>, vector<1x128xf32>,
    %c8_i32 = arith.constant 8 : i32
    %c0_120 = arith.constant 0 : index
    %c0_121 = arith.constant 0 : index
    %324 = vector.load %arg16[%c0_120, %c0_121] : memref<8x128xf32, #tpu.memory_space<vmem>>, vector<8x128xf32>
    %325 = arith.truncf %324 : vector<8x128xf32> to vector<8x128xbf16>
    %c0_122 = arith.constant 0 : index
    %c0_123 = arith.constant 0 : index
    %326 = vector.load %arg7[%c0_122, %c0_123] : memref<128x512xbf16, #tpu.memory_space<vmem>>, vector<128x512xbf16>
    %cst_124 = arith.constant dense<0.000000e+00> : vector<8x512xf32>
    %327 = tpu.matmul %325, %326, %cst_124 {dimension_numbers = #tpu.dot_dimension_numbers<[1], [0], [0], [1], [0, 0, 1, 1], [], []>} : vector<8x128xbf16>, vector<128x512xbf16>, vector<8x512xf32> -> vector<8x512xf32>
    %c0_125 = arith.constant 0 : index
    %c0_126 = arith.constant 0 : index
    %328 = vector.load %arg9[%c0_125, %c0_126] : memref<1x512xf32, #tpu.memory_space<vmem>>, vector<1x512xf32>
    %329 = vector.broadcast %328 : vector<1x512xf32> to vector<8x512xf32>
    %330 = arith.addf %327, %329 : vector<8x512xf32>
    %c0_127 = arith.constant 0 : index
    %c0_128 = arith.constant 0 : index
    %331 = vector.load %arg15[%c0_127, %c0_128] : memref<8x512xf32, #tpu.memory_space<vmem>>, vector<8x512xf32>
    tpu.vector_store %arg15[%c0_127, %c0_128], %330 {strides = array<i32>} : memref<8x512xf32, #tpu.memory_space<vmem>>, vector<8x512xf32>,
    %c0_129 = arith.constant 0 : index
    %c0_130 = arith.constant 0 : index
    %332 = vector.load %arg8[%c0_129, %c0_130] : memref<128x512xbf16, #tpu.memory_space<vmem>>, vector<128x512xbf16>
    %cst_131 = arith.constant 0.000000e+00 : f32
    %333 = vector.broadcast %cst_131 : f32 to vector<1x128xf32>
    %cst_132 = arith.constant 0.000000e+00 : f32
    %334 = vector.broadcast %cst_132 : f32 to vector<1x128xf32>
    %c0_i32_133 = arith.constant 0 : i32
    %335 = arith.index_cast %c0_i32_133 : i32 to index
    %c0_134 = arith.constant 0 : index
    %336 = vector.load %arg15[%335, %c0_134] : memref<8x512xf32, #tpu.memory_space<vmem>>, vector<1x512xf32>
    %337 = arith.truncf %333 : vector<1x128xf32> to vector<1x128xbf16>
    %cst_135 = arith.constant dense<0.000000e+00> : vector<1x512xf32>
    %338 = tpu.matmul %337, %332, %cst_135 {dimension_numbers = #tpu.dot_dimension_numbers<[1], [0], [0], [1], [0, 0, 1, 1], [], []>} : vector<1x128xbf16>, vector<128x512xbf16>, vector<1x512xf32> -> vector<1x512xf32>
    %339 = arith.addf %336, %338 : vector<1x512xf32>
    %340 = vector.extract_strided_slice %339 {offsets = [0, 0], sizes = [1, 128], strides = [1, 1]} : vector<1x512xf32> to vector<1x128xf32>
    %cst_136 = arith.constant 5.000000e-01 : f32
    %341 = vector.broadcast %cst_136 : f32 to vector<1x128xf32>
    %342 = arith.mulf %341, %340 : vector<1x128xf32>
    %343 = math.tanh %342 : vector<1x128xf32>
    %cst_137 = arith.constant 5.000000e-01 : f32
    %344 = vector.broadcast %cst_137 : f32 to vector<1x128xf32>
    %345 = arith.mulf %344, %343 : vector<1x128xf32>
    %cst_138 = arith.constant 5.000000e-01 : f32
    %346 = vector.broadcast %cst_138 : f32 to vector<1x128xf32>
    %347 = arith.addf %345, %346 : vector<1x128xf32>
    %348 = vector.extract_strided_slice %339 {offsets = [0, 128], sizes = [1, 128], strides = [1, 1]} : vector<1x512xf32> to vector<1x128xf32>
    %cst_139 = arith.constant 5.000000e-01 : f32
    %349 = vector.broadcast %cst_139 : f32 to vector<1x128xf32>
    %350 = arith.mulf %349, %348 : vector<1x128xf32>
    %351 = math.tanh %350 : vector<1x128xf32>
    %cst_140 = arith.constant 5.000000e-01 : f32
    %352 = vector.broadcast %cst_140 : f32 to vector<1x128xf32>
    %353 = arith.mulf %352, %351 : vector<1x128xf32>
    %cst_141 = arith.constant 5.000000e-01 : f32
    %354 = vector.broadcast %cst_141 : f32 to vector<1x128xf32>
    %355 = arith.addf %353, %354 : vector<1x128xf32>
    %356 = vector.extract_strided_slice %339 {offsets = [0, 256], sizes = [1, 128], strides = [1, 1]} : vector<1x512xf32> to vector<1x128xf32>
    %357 = math.tanh %356 : vector<1x128xf32>
    %358 = vector.extract_strided_slice %339 {offsets = [0, 384], sizes = [1, 128], strides = [1, 1]} : vector<1x512xf32> to vector<1x128xf32>
    %cst_142 = arith.constant 5.000000e-01 : f32
    %359 = vector.broadcast %cst_142 : f32 to vector<1x128xf32>
    %360 = arith.mulf %359, %358 : vector<1x128xf32>
    %361 = math.tanh %360 : vector<1x128xf32>
    %cst_143 = arith.constant 5.000000e-01 : f32
    %362 = vector.broadcast %cst_143 : f32 to vector<1x128xf32>
    %363 = arith.mulf %362, %361 : vector<1x128xf32>
    %cst_144 = arith.constant 5.000000e-01 : f32
    %364 = vector.broadcast %cst_144 : f32 to vector<1x128xf32>
    %365 = arith.addf %363, %364 : vector<1x128xf32>
    %366 = arith.mulf %355, %334 : vector<1x128xf32>
    %367 = arith.mulf %347, %357 : vector<1x128xf32>
    %368 = arith.addf %366, %367 : vector<1x128xf32>
    %369 = math.tanh %368 : vector<1x128xf32>
    %370 = arith.mulf %365, %369 : vector<1x128xf32>
    %371 = arith.index_cast %c0_i32_133 : i32 to index
    %c0_145 = arith.constant 0 : index
    %372 = vector.load %arg17[%371, %c0_145] : memref<128x128xf32, #tpu.memory_space<vmem>>, vector<1x128xf32>
    tpu.vector_store %arg17[%371, %c0_145], %370 {strides = array<i32>} : memref<128x128xf32, #tpu.memory_space<vmem>>, vector<1x128xf32>,
    %c1_i32_146 = arith.constant 1 : i32
    %373 = arith.index_cast %c1_i32_146 : i32 to index
    %c0_147 = arith.constant 0 : index
    %374 = vector.load %arg15[%373, %c0_147] : memref<8x512xf32, #tpu.memory_space<vmem>>, vector<1x512xf32>
    %375 = arith.truncf %370 : vector<1x128xf32> to vector<1x128xbf16>
    %cst_148 = arith.constant dense<0.000000e+00> : vector<1x512xf32>
    %376 = tpu.matmul %375, %332, %cst_148 {dimension_numbers = #tpu.dot_dimension_numbers<[1], [0], [0], [1], [0, 0, 1, 1], [], []>} : vector<1x128xbf16>, vector<128x512xbf16>, vector<1x512xf32> -> vector<1x512xf32>
    %377 = arith.addf %374, %376 : vector<1x512xf32>
    %378 = vector.extract_strided_slice %377 {offsets = [0, 0], sizes = [1, 128], strides = [1, 1]} : vector<1x512xf32> to vector<1x128xf32>
    %cst_149 = arith.constant 5.000000e-01 : f32
    %379 = vector.broadcast %cst_149 : f32 to vector<1x128xf32>
    %380 = arith.mulf %379, %378 : vector<1x128xf32>
    %381 = math.tanh %380 : vector<1x128xf32>
    %cst_150 = arith.constant 5.000000e-01 : f32
    %382 = vector.broadcast %cst_150 : f32 to vector<1x128xf32>
    %383 = arith.mulf %382, %381 : vector<1x128xf32>
    %cst_151 = arith.constant 5.000000e-01 : f32
    %384 = vector.broadcast %cst_151 : f32 to vector<1x128xf32>
    %385 = arith.addf %383, %384 : vector<1x128xf32>
    %386 = vector.extract_strided_slice %377 {offsets = [0, 128], sizes = [1, 128], strides = [1, 1]} : vector<1x512xf32> to vector<1x128xf32>
    %cst_152 = arith.constant 5.000000e-01 : f32
    %387 = vector.broadcast %cst_152 : f32 to vector<1x128xf32>
    %388 = arith.mulf %387, %386 : vector<1x128xf32>
    %389 = math.tanh %388 : vector<1x128xf32>
    %cst_153 = arith.constant 5.000000e-01 : f32
    %390 = vector.broadcast %cst_153 : f32 to vector<1x128xf32>
    %391 = arith.mulf %390, %389 : vector<1x128xf32>
    %cst_154 = arith.constant 5.000000e-01 : f32
    %392 = vector.broadcast %cst_154 : f32 to vector<1x128xf32>
    %393 = arith.addf %391, %392 : vector<1x128xf32>
    %394 = vector.extract_strided_slice %377 {offsets = [0, 256], sizes = [1, 128], strides = [1, 1]} : vector<1x512xf32> to vector<1x128xf32>
    %395 = math.tanh %394 : vector<1x128xf32>
    %396 = vector.extract_strided_slice %377 {offsets = [0, 384], sizes = [1, 128], strides = [1, 1]} : vector<1x512xf32> to vector<1x128xf32>
    %cst_155 = arith.constant 5.000000e-01 : f32
    %397 = vector.broadcast %cst_155 : f32 to vector<1x128xf32>
    %398 = arith.mulf %397, %396 : vector<1x128xf32>
    %399 = math.tanh %398 : vector<1x128xf32>
    %cst_156 = arith.constant 5.000000e-01 : f32
    %400 = vector.broadcast %cst_156 : f32 to vector<1x128xf32>
    %401 = arith.mulf %400, %399 : vector<1x128xf32>
    %cst_157 = arith.constant 5.000000e-01 : f32
    %402 = vector.broadcast %cst_157 : f32 to vector<1x128xf32>
    %403 = arith.addf %401, %402 : vector<1x128xf32>
    %404 = arith.mulf %393, %368 : vector<1x128xf32>
    %405 = arith.mulf %385, %395 : vector<1x128xf32>
    %406 = arith.addf %404, %405 : vector<1x128xf32>
    %407 = math.tanh %406 : vector<1x128xf32>
    %408 = arith.mulf %403, %407 : vector<1x128xf32>
    %409 = arith.index_cast %c1_i32_146 : i32 to index
    %c0_158 = arith.constant 0 : index
    %410 = vector.load %arg17[%409, %c0_158] : memref<128x128xf32, #tpu.memory_space<vmem>>, vector<1x128xf32>
    tpu.vector_store %arg17[%409, %c0_158], %408 {strides = array<i32>} : memref<128x128xf32, #tpu.memory_space<vmem>>, vector<1x128xf32>,
    %c2_i32_159 = arith.constant 2 : i32
    %411 = arith.index_cast %c2_i32_159 : i32 to index
    %c0_160 = arith.constant 0 : index
    %412 = vector.load %arg15[%411, %c0_160] : memref<8x512xf32, #tpu.memory_space<vmem>>, vector<1x512xf32>
    %413 = arith.truncf %408 : vector<1x128xf32> to vector<1x128xbf16>
    %cst_161 = arith.constant dense<0.000000e+00> : vector<1x512xf32>
    %414 = tpu.matmul %413, %332, %cst_161 {dimension_numbers = #tpu.dot_dimension_numbers<[1], [0], [0], [1], [0, 0, 1, 1], [], []>} : vector<1x128xbf16>, vector<128x512xbf16>, vector<1x512xf32> -> vector<1x512xf32>
    %415 = arith.addf %412, %414 : vector<1x512xf32>
    %416 = vector.extract_strided_slice %415 {offsets = [0, 0], sizes = [1, 128], strides = [1, 1]} : vector<1x512xf32> to vector<1x128xf32>
    %cst_162 = arith.constant 5.000000e-01 : f32
    %417 = vector.broadcast %cst_162 : f32 to vector<1x128xf32>
    %418 = arith.mulf %417, %416 : vector<1x128xf32>
    %419 = math.tanh %418 : vector<1x128xf32>
    %cst_163 = arith.constant 5.000000e-01 : f32
    %420 = vector.broadcast %cst_163 : f32 to vector<1x128xf32>
    %421 = arith.mulf %420, %419 : vector<1x128xf32>
    %cst_164 = arith.constant 5.000000e-01 : f32
    %422 = vector.broadcast %cst_164 : f32 to vector<1x128xf32>
    %423 = arith.addf %421, %422 : vector<1x128xf32>
    %424 = vector.extract_strided_slice %415 {offsets = [0, 128], sizes = [1, 128], strides = [1, 1]} : vector<1x512xf32> to vector<1x128xf32>
    %cst_165 = arith.constant 5.000000e-01 : f32
    %425 = vector.broadcast %cst_165 : f32 to vector<1x128xf32>
    %426 = arith.mulf %425, %424 : vector<1x128xf32>
    %427 = math.tanh %426 : vector<1x128xf32>
    %cst_166 = arith.constant 5.000000e-01 : f32
    %428 = vector.broadcast %cst_166 : f32 to vector<1x128xf32>
    %429 = arith.mulf %428, %427 : vector<1x128xf32>
    %cst_167 = arith.constant 5.000000e-01 : f32
    %430 = vector.broadcast %cst_167 : f32 to vector<1x128xf32>
    %431 = arith.addf %429, %430 : vector<1x128xf32>
    %432 = vector.extract_strided_slice %415 {offsets = [0, 256], sizes = [1, 128], strides = [1, 1]} : vector<1x512xf32> to vector<1x128xf32>
    %433 = math.tanh %432 : vector<1x128xf32>
    %434 = vector.extract_strided_slice %415 {offsets = [0, 384], sizes = [1, 128], strides = [1, 1]} : vector<1x512xf32> to vector<1x128xf32>
    %cst_168 = arith.constant 5.000000e-01 : f32
    %435 = vector.broadcast %cst_168 : f32 to vector<1x128xf32>
    %436 = arith.mulf %435, %434 : vector<1x128xf32>
    %437 = math.tanh %436 : vector<1x128xf32>
    %cst_169 = arith.constant 5.000000e-01 : f32
    %438 = vector.broadcast %cst_169 : f32 to vector<1x128xf32>
    %439 = arith.mulf %438, %437 : vector<1x128xf32>
    %cst_170 = arith.constant 5.000000e-01 : f32
    %440 = vector.broadcast %cst_170 : f32 to vector<1x128xf32>
    %441 = arith.addf %439, %440 : vector<1x128xf32>
    %442 = arith.mulf %431, %406 : vector<1x128xf32>
    %443 = arith.mulf %423, %433 : vector<1x128xf32>
    %444 = arith.addf %442, %443 : vector<1x128xf32>
    %445 = math.tanh %444 : vector<1x128xf32>
    %446 = arith.mulf %441, %445 : vector<1x128xf32>
    %447 = arith.index_cast %c2_i32_159 : i32 to index
    %c0_171 = arith.constant 0 : index
    %448 = vector.load %arg17[%447, %c0_171] : memref<128x128xf32, #tpu.memory_space<vmem>>, vector<1x128xf32>
    tpu.vector_store %arg17[%447, %c0_171], %446 {strides = array<i32>} : memref<128x128xf32, #tpu.memory_space<vmem>>, vector<1x128xf32>,
    %c3_i32_172 = arith.constant 3 : i32
    %449 = arith.index_cast %c3_i32_172 : i32 to index
    %c0_173 = arith.constant 0 : index
    %450 = vector.load %arg15[%449, %c0_173] : memref<8x512xf32, #tpu.memory_space<vmem>>, vector<1x512xf32>
    %451 = arith.truncf %446 : vector<1x128xf32> to vector<1x128xbf16>
    %cst_174 = arith.constant dense<0.000000e+00> : vector<1x512xf32>
    %452 = tpu.matmul %451, %332, %cst_174 {dimension_numbers = #tpu.dot_dimension_numbers<[1], [0], [0], [1], [0, 0, 1, 1], [], []>} : vector<1x128xbf16>, vector<128x512xbf16>, vector<1x512xf32> -> vector<1x512xf32>
    %453 = arith.addf %450, %452 : vector<1x512xf32>
    %454 = vector.extract_strided_slice %453 {offsets = [0, 0], sizes = [1, 128], strides = [1, 1]} : vector<1x512xf32> to vector<1x128xf32>
    %cst_175 = arith.constant 5.000000e-01 : f32
    %455 = vector.broadcast %cst_175 : f32 to vector<1x128xf32>
    %456 = arith.mulf %455, %454 : vector<1x128xf32>
    %457 = math.tanh %456 : vector<1x128xf32>
    %cst_176 = arith.constant 5.000000e-01 : f32
    %458 = vector.broadcast %cst_176 : f32 to vector<1x128xf32>
    %459 = arith.mulf %458, %457 : vector<1x128xf32>
    %cst_177 = arith.constant 5.000000e-01 : f32
    %460 = vector.broadcast %cst_177 : f32 to vector<1x128xf32>
    %461 = arith.addf %459, %460 : vector<1x128xf32>
    %462 = vector.extract_strided_slice %453 {offsets = [0, 128], sizes = [1, 128], strides = [1, 1]} : vector<1x512xf32> to vector<1x128xf32>
    %cst_178 = arith.constant 5.000000e-01 : f32
    %463 = vector.broadcast %cst_178 : f32 to vector<1x128xf32>
    %464 = arith.mulf %463, %462 : vector<1x128xf32>
    %465 = math.tanh %464 : vector<1x128xf32>
    %cst_179 = arith.constant 5.000000e-01 : f32
    %466 = vector.broadcast %cst_179 : f32 to vector<1x128xf32>
    %467 = arith.mulf %466, %465 : vector<1x128xf32>
    %cst_180 = arith.constant 5.000000e-01 : f32
    %468 = vector.broadcast %cst_180 : f32 to vector<1x128xf32>
    %469 = arith.addf %467, %468 : vector<1x128xf32>
    %470 = vector.extract_strided_slice %453 {offsets = [0, 256], sizes = [1, 128], strides = [1, 1]} : vector<1x512xf32> to vector<1x128xf32>
    %471 = math.tanh %470 : vector<1x128xf32>
    %472 = vector.extract_strided_slice %453 {offsets = [0, 384], sizes = [1, 128], strides = [1, 1]} : vector<1x512xf32> to vector<1x128xf32>
    %cst_181 = arith.constant 5.000000e-01 : f32
    %473 = vector.broadcast %cst_181 : f32 to vector<1x128xf32>
    %474 = arith.mulf %473, %472 : vector<1x128xf32>
    %475 = math.tanh %474 : vector<1x128xf32>
    %cst_182 = arith.constant 5.000000e-01 : f32
    %476 = vector.broadcast %cst_182 : f32 to vector<1x128xf32>
    %477 = arith.mulf %476, %475 : vector<1x128xf32>
    %cst_183 = arith.constant 5.000000e-01 : f32
    %478 = vector.broadcast %cst_183 : f32 to vector<1x128xf32>
    %479 = arith.addf %477, %478 : vector<1x128xf32>
    %480 = arith.mulf %469, %444 : vector<1x128xf32>
    %481 = arith.mulf %461, %471 : vector<1x128xf32>
    %482 = arith.addf %480, %481 : vector<1x128xf32>
    %483 = math.tanh %482 : vector<1x128xf32>
    %484 = arith.mulf %479, %483 : vector<1x128xf32>
    %485 = arith.index_cast %c3_i32_172 : i32 to index
    %c0_184 = arith.constant 0 : index
    %486 = vector.load %arg17[%485, %c0_184] : memref<128x128xf32, #tpu.memory_space<vmem>>, vector<1x128xf32>
    tpu.vector_store %arg17[%485, %c0_184], %484 {strides = array<i32>} : memref<128x128xf32, #tpu.memory_space<vmem>>, vector<1x128xf32>,
    %c4_i32_185 = arith.constant 4 : i32
    %487 = arith.index_cast %c4_i32_185 : i32 to index
    %c0_186 = arith.constant 0 : index
    %488 = vector.load %arg15[%487, %c0_186] : memref<8x512xf32, #tpu.memory_space<vmem>>, vector<1x512xf32>
    %489 = arith.truncf %484 : vector<1x128xf32> to vector<1x128xbf16>
    %cst_187 = arith.constant dense<0.000000e+00> : vector<1x512xf32>
    %490 = tpu.matmul %489, %332, %cst_187 {dimension_numbers = #tpu.dot_dimension_numbers<[1], [0], [0], [1], [0, 0, 1, 1], [], []>} : vector<1x128xbf16>, vector<128x512xbf16>, vector<1x512xf32> -> vector<1x512xf32>
    %491 = arith.addf %488, %490 : vector<1x512xf32>
    %492 = vector.extract_strided_slice %491 {offsets = [0, 0], sizes = [1, 128], strides = [1, 1]} : vector<1x512xf32> to vector<1x128xf32>
    %cst_188 = arith.constant 5.000000e-01 : f32
    %493 = vector.broadcast %cst_188 : f32 to vector<1x128xf32>
    %494 = arith.mulf %493, %492 : vector<1x128xf32>
    %495 = math.tanh %494 : vector<1x128xf32>
    %cst_189 = arith.constant 5.000000e-01 : f32
    %496 = vector.broadcast %cst_189 : f32 to vector<1x128xf32>
    %497 = arith.mulf %496, %495 : vector<1x128xf32>
    %cst_190 = arith.constant 5.000000e-01 : f32
    %498 = vector.broadcast %cst_190 : f32 to vector<1x128xf32>
    %499 = arith.addf %497, %498 : vector<1x128xf32>
    %500 = vector.extract_strided_slice %491 {offsets = [0, 128], sizes = [1, 128], strides = [1, 1]} : vector<1x512xf32> to vector<1x128xf32>
    %cst_191 = arith.constant 5.000000e-01 : f32
    %501 = vector.broadcast %cst_191 : f32 to vector<1x128xf32>
    %502 = arith.mulf %501, %500 : vector<1x128xf32>
    %503 = math.tanh %502 : vector<1x128xf32>
    %cst_192 = arith.constant 5.000000e-01 : f32
    %504 = vector.broadcast %cst_192 : f32 to vector<1x128xf32>
    %505 = arith.mulf %504, %503 : vector<1x128xf32>
    %cst_193 = arith.constant 5.000000e-01 : f32
    %506 = vector.broadcast %cst_193 : f32 to vector<1x128xf32>
    %507 = arith.addf %505, %506 : vector<1x128xf32>
    %508 = vector.extract_strided_slice %491 {offsets = [0, 256], sizes = [1, 128], strides = [1, 1]} : vector<1x512xf32> to vector<1x128xf32>
    %509 = math.tanh %508 : vector<1x128xf32>
    %510 = vector.extract_strided_slice %491 {offsets = [0, 384], sizes = [1, 128], strides = [1, 1]} : vector<1x512xf32> to vector<1x128xf32>
    %cst_194 = arith.constant 5.000000e-01 : f32
    %511 = vector.broadcast %cst_194 : f32 to vector<1x128xf32>
    %512 = arith.mulf %511, %510 : vector<1x128xf32>
    %513 = math.tanh %512 : vector<1x128xf32>
    %cst_195 = arith.constant 5.000000e-01 : f32
    %514 = vector.broadcast %cst_195 : f32 to vector<1x128xf32>
    %515 = arith.mulf %514, %513 : vector<1x128xf32>
    %cst_196 = arith.constant 5.000000e-01 : f32
    %516 = vector.broadcast %cst_196 : f32 to vector<1x128xf32>
    %517 = arith.addf %515, %516 : vector<1x128xf32>
    %518 = arith.mulf %507, %482 : vector<1x128xf32>
    %519 = arith.mulf %499, %509 : vector<1x128xf32>
    %520 = arith.addf %518, %519 : vector<1x128xf32>
    %521 = math.tanh %520 : vector<1x128xf32>
    %522 = arith.mulf %517, %521 : vector<1x128xf32>
    %523 = arith.index_cast %c4_i32_185 : i32 to index
    %c0_197 = arith.constant 0 : index
    %524 = vector.load %arg17[%523, %c0_197] : memref<128x128xf32, #tpu.memory_space<vmem>>, vector<1x128xf32>
    tpu.vector_store %arg17[%523, %c0_197], %522 {strides = array<i32>} : memref<128x128xf32, #tpu.memory_space<vmem>>, vector<1x128xf32>,
    %c5_i32_198 = arith.constant 5 : i32
    %525 = arith.index_cast %c5_i32_198 : i32 to index
    %c0_199 = arith.constant 0 : index
    %526 = vector.load %arg15[%525, %c0_199] : memref<8x512xf32, #tpu.memory_space<vmem>>, vector<1x512xf32>
    %527 = arith.truncf %522 : vector<1x128xf32> to vector<1x128xbf16>
    %cst_200 = arith.constant dense<0.000000e+00> : vector<1x512xf32>
    %528 = tpu.matmul %527, %332, %cst_200 {dimension_numbers = #tpu.dot_dimension_numbers<[1], [0], [0], [1], [0, 0, 1, 1], [], []>} : vector<1x128xbf16>, vector<128x512xbf16>, vector<1x512xf32> -> vector<1x512xf32>
    %529 = arith.addf %526, %528 : vector<1x512xf32>
    %530 = vector.extract_strided_slice %529 {offsets = [0, 0], sizes = [1, 128], strides = [1, 1]} : vector<1x512xf32> to vector<1x128xf32>
    %cst_201 = arith.constant 5.000000e-01 : f32
    %531 = vector.broadcast %cst_201 : f32 to vector<1x128xf32>
    %532 = arith.mulf %531, %530 : vector<1x128xf32>
    %533 = math.tanh %532 : vector<1x128xf32>
    %cst_202 = arith.constant 5.000000e-01 : f32
    %534 = vector.broadcast %cst_202 : f32 to vector<1x128xf32>
    %535 = arith.mulf %534, %533 : vector<1x128xf32>
    %cst_203 = arith.constant 5.000000e-01 : f32
    %536 = vector.broadcast %cst_203 : f32 to vector<1x128xf32>
    %537 = arith.addf %535, %536 : vector<1x128xf32>
    %538 = vector.extract_strided_slice %529 {offsets = [0, 128], sizes = [1, 128], strides = [1, 1]} : vector<1x512xf32> to vector<1x128xf32>
    %cst_204 = arith.constant 5.000000e-01 : f32
    %539 = vector.broadcast %cst_204 : f32 to vector<1x128xf32>
    %540 = arith.mulf %539, %538 : vector<1x128xf32>
    %541 = math.tanh %540 : vector<1x128xf32>
    %cst_205 = arith.constant 5.000000e-01 : f32
    %542 = vector.broadcast %cst_205 : f32 to vector<1x128xf32>
    %543 = arith.mulf %542, %541 : vector<1x128xf32>
    %cst_206 = arith.constant 5.000000e-01 : f32
    %544 = vector.broadcast %cst_206 : f32 to vector<1x128xf32>
    %545 = arith.addf %543, %544 : vector<1x128xf32>
    %546 = vector.extract_strided_slice %529 {offsets = [0, 256], sizes = [1, 128], strides = [1, 1]} : vector<1x512xf32> to vector<1x128xf32>
    %547 = math.tanh %546 : vector<1x128xf32>
    %548 = vector.extract_strided_slice %529 {offsets = [0, 384], sizes = [1, 128], strides = [1, 1]} : vector<1x512xf32> to vector<1x128xf32>
    %cst_207 = arith.constant 5.000000e-01 : f32
    %549 = vector.broadcast %cst_207 : f32 to vector<1x128xf32>
    %550 = arith.mulf %549, %548 : vector<1x128xf32>
    %551 = math.tanh %550 : vector<1x128xf32>
    %cst_208 = arith.constant 5.000000e-01 : f32
    %552 = vector.broadcast %cst_208 : f32 to vector<1x128xf32>
    %553 = arith.mulf %552, %551 : vector<1x128xf32>
    %cst_209 = arith.constant 5.000000e-01 : f32
    %554 = vector.broadcast %cst_209 : f32 to vector<1x128xf32>
    %555 = arith.addf %553, %554 : vector<1x128xf32>
    %556 = arith.mulf %545, %520 : vector<1x128xf32>
    %557 = arith.mulf %537, %547 : vector<1x128xf32>
    %558 = arith.addf %556, %557 : vector<1x128xf32>
    %559 = math.tanh %558 : vector<1x128xf32>
    %560 = arith.mulf %555, %559 : vector<1x128xf32>
    %561 = arith.index_cast %c5_i32_198 : i32 to index
    %c0_210 = arith.constant 0 : index
    %562 = vector.load %arg17[%561, %c0_210] : memref<128x128xf32, #tpu.memory_space<vmem>>, vector<1x128xf32>
    tpu.vector_store %arg17[%561, %c0_210], %560 {strides = array<i32>} : memref<128x128xf32, #tpu.memory_space<vmem>>, vector<1x128xf32>,
    %c6_i32_211 = arith.constant 6 : i32
    %563 = arith.index_cast %c6_i32_211 : i32 to index
    %c0_212 = arith.constant 0 : index
    %564 = vector.load %arg15[%563, %c0_212] : memref<8x512xf32, #tpu.memory_space<vmem>>, vector<1x512xf32>
    %565 = arith.truncf %560 : vector<1x128xf32> to vector<1x128xbf16>
    %cst_213 = arith.constant dense<0.000000e+00> : vector<1x512xf32>
    %566 = tpu.matmul %565, %332, %cst_213 {dimension_numbers = #tpu.dot_dimension_numbers<[1], [0], [0], [1], [0, 0, 1, 1], [], []>} : vector<1x128xbf16>, vector<128x512xbf16>, vector<1x512xf32> -> vector<1x512xf32>
    %567 = arith.addf %564, %566 : vector<1x512xf32>
    %568 = vector.extract_strided_slice %567 {offsets = [0, 0], sizes = [1, 128], strides = [1, 1]} : vector<1x512xf32> to vector<1x128xf32>
    %cst_214 = arith.constant 5.000000e-01 : f32
    %569 = vector.broadcast %cst_214 : f32 to vector<1x128xf32>
    %570 = arith.mulf %569, %568 : vector<1x128xf32>
    %571 = math.tanh %570 : vector<1x128xf32>
    %cst_215 = arith.constant 5.000000e-01 : f32
    %572 = vector.broadcast %cst_215 : f32 to vector<1x128xf32>
    %573 = arith.mulf %572, %571 : vector<1x128xf32>
    %cst_216 = arith.constant 5.000000e-01 : f32
    %574 = vector.broadcast %cst_216 : f32 to vector<1x128xf32>
    %575 = arith.addf %573, %574 : vector<1x128xf32>
    %576 = vector.extract_strided_slice %567 {offsets = [0, 128], sizes = [1, 128], strides = [1, 1]} : vector<1x512xf32> to vector<1x128xf32>
    %cst_217 = arith.constant 5.000000e-01 : f32
    %577 = vector.broadcast %cst_217 : f32 to vector<1x128xf32>
    %578 = arith.mulf %577, %576 : vector<1x128xf32>
    %579 = math.tanh %578 : vector<1x128xf32>
    %cst_218 = arith.constant 5.000000e-01 : f32
    %580 = vector.broadcast %cst_218 : f32 to vector<1x128xf32>
    %581 = arith.mulf %580, %579 : vector<1x128xf32>
    %cst_219 = arith.constant 5.000000e-01 : f32
    %582 = vector.broadcast %cst_219 : f32 to vector<1x128xf32>
    %583 = arith.addf %581, %582 : vector<1x128xf32>
    %584 = vector.extract_strided_slice %567 {offsets = [0, 256], sizes = [1, 128], strides = [1, 1]} : vector<1x512xf32> to vector<1x128xf32>
    %585 = math.tanh %584 : vector<1x128xf32>
    %586 = vector.extract_strided_slice %567 {offsets = [0, 384], sizes = [1, 128], strides = [1, 1]} : vector<1x512xf32> to vector<1x128xf32>
    %cst_220 = arith.constant 5.000000e-01 : f32
    %587 = vector.broadcast %cst_220 : f32 to vector<1x128xf32>
    %588 = arith.mulf %587, %586 : vector<1x128xf32>
    %589 = math.tanh %588 : vector<1x128xf32>
    %cst_221 = arith.constant 5.000000e-01 : f32
    %590 = vector.broadcast %cst_221 : f32 to vector<1x128xf32>
    %591 = arith.mulf %590, %589 : vector<1x128xf32>
    %cst_222 = arith.constant 5.000000e-01 : f32
    %592 = vector.broadcast %cst_222 : f32 to vector<1x128xf32>
    %593 = arith.addf %591, %592 : vector<1x128xf32>
    %594 = arith.mulf %583, %558 : vector<1x128xf32>
    %595 = arith.mulf %575, %585 : vector<1x128xf32>
    %596 = arith.addf %594, %595 : vector<1x128xf32>
    %597 = math.tanh %596 : vector<1x128xf32>
    %598 = arith.mulf %593, %597 : vector<1x128xf32>
    %599 = arith.index_cast %c6_i32_211 : i32 to index
    %c0_223 = arith.constant 0 : index
    %600 = vector.load %arg17[%599, %c0_223] : memref<128x128xf32, #tpu.memory_space<vmem>>, vector<1x128xf32>
    tpu.vector_store %arg17[%599, %c0_223], %598 {strides = array<i32>} : memref<128x128xf32, #tpu.memory_space<vmem>>, vector<1x128xf32>,
    %c7_i32_224 = arith.constant 7 : i32
    %601 = arith.index_cast %c7_i32_224 : i32 to index
    %c0_225 = arith.constant 0 : index
    %602 = vector.load %arg15[%601, %c0_225] : memref<8x512xf32, #tpu.memory_space<vmem>>, vector<1x512xf32>
    %603 = arith.truncf %598 : vector<1x128xf32> to vector<1x128xbf16>
    %cst_226 = arith.constant dense<0.000000e+00> : vector<1x512xf32>
    %604 = tpu.matmul %603, %332, %cst_226 {dimension_numbers = #tpu.dot_dimension_numbers<[1], [0], [0], [1], [0, 0, 1, 1], [], []>} : vector<1x128xbf16>, vector<128x512xbf16>, vector<1x512xf32> -> vector<1x512xf32>
    %605 = arith.addf %602, %604 : vector<1x512xf32>
    %606 = vector.extract_strided_slice %605 {offsets = [0, 0], sizes = [1, 128], strides = [1, 1]} : vector<1x512xf32> to vector<1x128xf32>
    %cst_227 = arith.constant 5.000000e-01 : f32
    %607 = vector.broadcast %cst_227 : f32 to vector<1x128xf32>
    %608 = arith.mulf %607, %606 : vector<1x128xf32>
    %609 = math.tanh %608 : vector<1x128xf32>
    %cst_228 = arith.constant 5.000000e-01 : f32
    %610 = vector.broadcast %cst_228 : f32 to vector<1x128xf32>
    %611 = arith.mulf %610, %609 : vector<1x128xf32>
    %cst_229 = arith.constant 5.000000e-01 : f32
    %612 = vector.broadcast %cst_229 : f32 to vector<1x128xf32>
    %613 = arith.addf %611, %612 : vector<1x128xf32>
    %614 = vector.extract_strided_slice %605 {offsets = [0, 128], sizes = [1, 128], strides = [1, 1]} : vector<1x512xf32> to vector<1x128xf32>
    %cst_230 = arith.constant 5.000000e-01 : f32
    %615 = vector.broadcast %cst_230 : f32 to vector<1x128xf32>
    %616 = arith.mulf %615, %614 : vector<1x128xf32>
    %617 = math.tanh %616 : vector<1x128xf32>
    %cst_231 = arith.constant 5.000000e-01 : f32
    %618 = vector.broadcast %cst_231 : f32 to vector<1x128xf32>
    %619 = arith.mulf %618, %617 : vector<1x128xf32>
    %cst_232 = arith.constant 5.000000e-01 : f32
    %620 = vector.broadcast %cst_232 : f32 to vector<1x128xf32>
    %621 = arith.addf %619, %620 : vector<1x128xf32>
    %622 = vector.extract_strided_slice %605 {offsets = [0, 256], sizes = [1, 128], strides = [1, 1]} : vector<1x512xf32> to vector<1x128xf32>
    %623 = math.tanh %622 : vector<1x128xf32>
    %624 = vector.extract_strided_slice %605 {offsets = [0, 384], sizes = [1, 128], strides = [1, 1]} : vector<1x512xf32> to vector<1x128xf32>
    %cst_233 = arith.constant 5.000000e-01 : f32
    %625 = vector.broadcast %cst_233 : f32 to vector<1x128xf32>
    %626 = arith.mulf %625, %624 : vector<1x128xf32>
    %627 = math.tanh %626 : vector<1x128xf32>
    %cst_234 = arith.constant 5.000000e-01 : f32
    %628 = vector.broadcast %cst_234 : f32 to vector<1x128xf32>
    %629 = arith.mulf %628, %627 : vector<1x128xf32>
    %cst_235 = arith.constant 5.000000e-01 : f32
    %630 = vector.broadcast %cst_235 : f32 to vector<1x128xf32>
    %631 = arith.addf %629, %630 : vector<1x128xf32>
    %632 = arith.mulf %621, %596 : vector<1x128xf32>
    %633 = arith.mulf %613, %623 : vector<1x128xf32>
    %634 = arith.addf %632, %633 : vector<1x128xf32>
    %635 = math.tanh %634 : vector<1x128xf32>
    %636 = arith.mulf %631, %635 : vector<1x128xf32>
    %637 = arith.index_cast %c7_i32_224 : i32 to index
    %c0_236 = arith.constant 0 : index
    %638 = vector.load %arg17[%637, %c0_236] : memref<128x128xf32, #tpu.memory_space<vmem>>, vector<1x128xf32>
    tpu.vector_store %arg17[%637, %c0_236], %636 {strides = array<i32>} : memref<128x128xf32, #tpu.memory_space<vmem>>, vector<1x128xf32>,
    %c8_i32_237 = arith.constant 8 : i32
    %c0_238 = arith.constant 0 : index
    %c0_239 = arith.constant 0 : index
    %639 = vector.load %arg17[%c0_238, %c0_239] : memref<128x128xf32, #tpu.memory_space<vmem>>, vector<128x128xf32>
    %640 = arith.truncf %639 : vector<128x128xf32> to vector<128x128xbf16>
    %641 = vector.extract_strided_slice %640 {offsets = [0, 0], sizes = [8, 128], strides = [1, 1]} : vector<128x128xbf16> to vector<8x128xbf16>
    %c0_240 = arith.constant 0 : index
    %c0_241 = arith.constant 0 : index
    %642 = vector.load %arg10[%c0_240, %c0_241] : memref<128x256xbf16, #tpu.memory_space<vmem>>, vector<128x256xbf16>
    %cst_242 = arith.constant dense<0.000000e+00> : vector<8x256xf32>
    %643 = tpu.matmul %641, %642, %cst_242 {dimension_numbers = #tpu.dot_dimension_numbers<[1], [0], [0], [1], [0, 0, 1, 1], [], []>} : vector<8x128xbf16>, vector<128x256xbf16>, vector<8x256xf32> -> vector<8x256xf32>
    %c0_243 = arith.constant 0 : index
    %c0_244 = arith.constant 0 : index
    %644 = vector.load %arg11[%c0_243, %c0_244] : memref<1x256xf32, #tpu.memory_space<vmem>>, vector<1x256xf32>
    %645 = vector.broadcast %644 : vector<1x256xf32> to vector<8x256xf32>
    %646 = arith.addf %643, %645 : vector<8x256xf32>
    %647 = vector.extract_strided_slice %646 {offsets = [0, 0], sizes = [8, 128], strides = [1, 1]} : vector<8x256xf32> to vector<8x128xf32>
    %648 = vector.extract_strided_slice %646 {offsets = [0, 128], sizes = [8, 1], strides = [1, 1]} : vector<8x256xf32> to vector<8x1xf32>
    %c0_245 = arith.constant 0 : index
    %c0_246 = arith.constant 0 : index
    %649 = vector.load %arg12[%c0_245, %c0_246] : memref<1x128xbf16, #tpu.memory_space<vmem>>, vector<1x128xbf16>
    %cst_247 = arith.constant dense<0.000000e+00> : vector<1x128xf32>
    %650 = tpu.matmul %649, %640, %cst_247 {dimension_numbers = #tpu.dot_dimension_numbers<[1], [1], [0], [0], [0, 0, 1, 0], [], []>} : vector<1x128xbf16>, vector<128x128xbf16>, vector<1x128xf32> -> vector<1x128xf32>
    %651 = vector.broadcast %648 : vector<8x1xf32> to vector<8x128xf32>
    %652 = vector.broadcast %650 : vector<1x128xf32> to vector<8x128xf32>
    %653 = arith.addf %651, %652 : vector<8x128xf32>
    %654 = math.exp %653 : vector<8x128xf32>
    %655 = tpu.iota {dimensions = array<i32: 0>} : vector<8x128xi32>
    %c8_i32_248 = arith.constant 8 : i32
    %656 = vector.broadcast %c8_i32_248 : i32 to vector<8x128xi32>
    %657 = arith.cmpi slt, %655, %656 : vector<8x128xi32>
    %cst_249 = arith.constant 0.000000e+00 : f32
    %658 = vector.broadcast %cst_249 : f32 to vector<8x128xf32>
    %659 = arith.select %657, %654, %658 : vector<8x128xi1>, vector<8x128xf32>
    %cst_250 = arith.constant dense<0.000000e+00> : vector<128xf32>
    %660 = vector.multi_reduction <add>, %659, %cst_250 [0] : vector<8x128xf32> to vector<128xf32>
    %661 = vector.shape_cast %660 : vector<128xf32> to vector<1x128xf32>
    %cst_251 = arith.constant 9.99999968E-21 : f32
    %662 = vector.broadcast %cst_251 : f32 to vector<1x128xf32>
    %663 = arith.addf %661, %662 : vector<1x128xf32>
    %664 = vector.broadcast %663 : vector<1x128xf32> to vector<8x128xf32>
    %665 = arith.divf %659, %664 : vector<8x128xf32>
    %c0_252 = arith.constant 0 : index
    %c0_253 = arith.constant 0 : index
    %c0_254 = arith.constant 0 : index
    %666 = vector.load %arg13[%c0_252, %c0_253, %c0_254] : memref<1x8x128xf32, #tpu.memory_space<vmem>>, vector<1x8x128xf32>
    %667 = vector.shape_cast %666 : vector<1x8x128xf32> to vector<8x128xf32>
    %668 = vector.shape_cast %665 : vector<8x128xf32> to vector<1x8x128xf32>
    tpu.vector_store %arg13[%c0_252, %c0_253, %c0_254], %668 {strides = array<i32>} : memref<1x8x128xf32, #tpu.memory_space<vmem>>, vector<1x8x128xf32>,
    %669 = math.exp %647 : vector<8x128xf32>
    %cst_255 = arith.constant dense<0.000000e+00> : vector<8xf32>
    %670 = vector.multi_reduction <add>, %669, %cst_255 [1] : vector<8x128xf32> to vector<8xf32>
    %671 = vector.shape_cast %670 : vector<8xf32> to vector<8x1xf32>
    %cst_256 = arith.constant 9.99999968E-21 : f32
    %672 = vector.broadcast %cst_256 : f32 to vector<8x1xf32>
    %673 = arith.addf %671, %672 : vector<8x1xf32>
    %674 = vector.broadcast %673 : vector<8x1xf32> to vector<8x128xf32>
    %675 = arith.divf %669, %674 : vector<8x128xf32>
    %c0_257 = arith.constant 0 : index
    %c0_258 = arith.constant 0 : index
    %c0_259 = arith.constant 0 : index
    %676 = vector.load %arg14[%c0_257, %c0_258, %c0_259] : memref<1x8x128xf32, #tpu.memory_space<vmem>>, vector<1x8x128xf32>
    %677 = vector.shape_cast %676 : vector<1x8x128xf32> to vector<8x128xf32>
    %678 = vector.shape_cast %675 : vector<8x128xf32> to vector<1x8x128xf32>
    tpu.vector_store %arg14[%c0_257, %c0_258, %c0_259], %678 {strides = array<i32>} : memref<1x8x128xf32, #tpu.memory_space<vmem>>, vector<1x8x128xf32>,
    return
  }
  func.func @transform_0(%arg0: i32) -> (i32, i32, i32) {
    %c0_i32 = arith.constant 0 : i32
    %c0_i32_0 = arith.constant 0 : i32
    %c0_i32_1 = arith.constant 0 : i32
    return %arg0, %c0_i32, %c0_i32_0 : i32, i32, i32
  }
  func.func @transform_1(%arg0: i32) -> (i32, i32, i32) {
    %c0_i32 = arith.constant 0 : i32
    %c0_i32_0 = arith.constant 0 : i32
    %c0_i32_1 = arith.constant 0 : i32
    return %arg0, %c0_i32, %c0_i32_0 : i32, i32, i32
  }
  func.func @transform_2(%arg0: i32) -> (i32, i32) {
    %c0_i32 = arith.constant 0 : i32
    %c0_i32_0 = arith.constant 0 : i32
    %c0_i32_1 = arith.constant 0 : i32
    return %c0_i32, %c0_i32_0 : i32, i32
  }
  func.func @transform_3(%arg0: i32) -> (i32, i32) {
    %c0_i32 = arith.constant 0 : i32
    %c0_i32_0 = arith.constant 0 : i32
    %c0_i32_1 = arith.constant 0 : i32
    return %c0_i32, %c0_i32_0 : i32, i32
  }
  func.func @transform_4(%arg0: i32) -> (i32, i32) {
    %c0_i32 = arith.constant 0 : i32
    %c0_i32_0 = arith.constant 0 : i32
    %c0_i32_1 = arith.constant 0 : i32
    return %c0_i32, %c0_i32_0 : i32, i32
  }
  func.func @transform_5(%arg0: i32) -> (i32, i32) {
    %c0_i32 = arith.constant 0 : i32
    %c0_i32_0 = arith.constant 0 : i32
    %c0_i32_1 = arith.constant 0 : i32
    return %c0_i32, %c0_i32_0 : i32, i32
  }
  func.func @transform_6(%arg0: i32) -> (i32, i32) {
    %c0_i32 = arith.constant 0 : i32
    %c0_i32_0 = arith.constant 0 : i32
    %c0_i32_1 = arith.constant 0 : i32
    return %c0_i32, %c0_i32_0 : i32, i32
  }
  func.func @transform_7(%arg0: i32) -> (i32, i32) {
    %c0_i32 = arith.constant 0 : i32
    %c0_i32_0 = arith.constant 0 : i32
    %c0_i32_1 = arith.constant 0 : i32
    return %c0_i32, %c0_i32_0 : i32, i32
  }
  func.func @transform_8(%arg0: i32) -> (i32, i32) {
    %c0_i32 = arith.constant 0 : i32
    %c0_i32_0 = arith.constant 0 : i32
    %c0_i32_1 = arith.constant 0 : i32
    return %c0_i32, %c0_i32_0 : i32, i32
  }
  func.func @transform_9(%arg0: i32) -> (i32, i32) {
    %c0_i32 = arith.constant 0 : i32
    %c0_i32_0 = arith.constant 0 : i32
    %c0_i32_1 = arith.constant 0 : i32
    return %c0_i32, %c0_i32_0 : i32, i32
  }
  func.func @transform_10(%arg0: i32) -> (i32, i32) {
    %c0_i32 = arith.constant 0 : i32
    %c0_i32_0 = arith.constant 0 : i32
    %c0_i32_1 = arith.constant 0 : i32
    return %c0_i32, %c0_i32_0 : i32, i32
  }
  func.func @transform_11(%arg0: i32) -> (i32, i32) {
    %c0_i32 = arith.constant 0 : i32
    %c0_i32_0 = arith.constant 0 : i32
    %c0_i32_1 = arith.constant 0 : i32
    return %c0_i32, %c0_i32_0 : i32, i32
  }
  func.func @transform_12(%arg0: i32) -> (i32, i32, i32) {
    %c0_i32 = arith.constant 0 : i32
    %c0_i32_0 = arith.constant 0 : i32
    %c0_i32_1 = arith.constant 0 : i32
    return %arg0, %c0_i32, %c0_i32_0 : i32, i32, i32
  }
  func.func @transform_13(%arg0: i32) -> (i32, i32, i32) {
    %c0_i32 = arith.constant 0 : i32
    %c0_i32_0 = arith.constant 0 : i32
    %c0_i32_1 = arith.constant 0 : i32
    return %arg0, %c0_i32, %c0_i32_0 : i32, i32, i32
  }
}

</mosaic_0001>

<bundles_post_ra>
// kernel: tpu_custom_call.1
= control target key start
LH: loop header
LB: loop body
LE: loop exit
PB: predicated region body
PF: predicated region fallthrough
CT: control target
= control target key end

     0   :  { %s7046_s0 = inlined_call_operand.hbm [shape: bf16[4,8,128], index: 0, kind: input, shape index: {}]   ;;  %s7047_s1 = inlined_call_operand.hbm [shape: bf16[4,8,128], index: 1, kind: input, shape index: {}]   ;;  %s7048_s2 = inlined_call_operand.hbm [shape: bf16[128,512], index: 2, kind: input, shape index: {}]   ;;  %s7049_s3 = inlined_call_operand.hbm [shape: bf16[128,512], index: 3, kind: input, shape index: {}]   ;;  %s7050_s4 = inlined_call_operand.hbm [shape: bf16[128,512], index: 4, kind: input, shape index: {}]   ;;  %s7051_s5 = inlined_call_operand.vmem [shape: f32[1,512], index: 5, kind: input, shape index: {}]   ;;  %s7052_s6 = inlined_call_operand.hbm [shape: bf16[128,512], index: 6, kind: input, shape index: {}]   ;;  %s7053_s7 = inlined_call_operand.hbm [shape: bf16[128,512], index: 7, kind: input, shape index: {}]   ;;  %s7054_s8 = inlined_call_operand.vmem [shape: f32[1,512], index: 8, kind: input, shape index: {}]   ;;  %s7055_s9 = inlined_call_operand.hbm [shape: bf16[128,256], index: 9, kind: input, shape index: {}]   ;;  %s7056_s10 = inlined_call_operand.vmem [shape: f32[1,256], index: 10, kind: input, shape index: {}]   ;;  %s7057_s11 = inlined_call_operand.vmem [shape: bf16[1,128], index: 11, kind: input, shape index: {}]   ;;  %s7058_s12 = inlined_call_operand.hbm [shape: f32[4,8,128], index: 12, kind: output, shape index: {0}]   ;;  %s7059_s13 = inlined_call_operand.hbm [shape: f32[4,8,128], index: 13, kind: output, shape index: {1}]  }
   0x1   :  { %7068 = sst [smem:[#allocation34_spill]] %s7048_s2 }
   0x2   :  { %7069 = sst [smem:[#allocation35_spill]] %s7049_s3 }
   0x3   :  { %7070 = sst [smem:[#allocation36_spill]] %s7050_s4 }
   0x4   :  { %7071 = sst [smem:[#allocation37_spill]] %s7052_s6 }
   0x5   :  { %7072 = sst [smem:[#allocation38_spill]] %s7053_s7 }
   0x6   :  { %7073 = sst [smem:[#allocation39_spill]] %s7055_s9 }
   0x7   :  { %19 = vsyncpa [#allocation6], 0 }
   0x8   :  { %21 = vsyncpa [#allocation6 + $0x1], 0 }
   0x9   :  { %22 = vsyncpa [#allocation9], 0 }
   0xa   :  { %24 = vsyncpa [#allocation9 + $0x1], 0 }
   0xb   :  { %25 = vsyncpa [#allocation12], 0 }
   0xc   :  { %26 = vsyncpa [#allocation15], 0 }
   0xd   :  { %27 = vsyncpa [#allocation18], 0 }
   0xe   :  { %28 = vsyncpa [#allocation7], 0 }
   0xf   :  { %30 = vsyncpa [#allocation7 + $0x1], 0 }
  0x10   :  { %31 = vsyncpa [#allocation21], 0 }
  0x11   :  { %33 = vsyncpa [#allocation21 + $0x1], 0  ;;  %s5856_s25 = smov 0   ;;  %s5858_s26 = smov 0  }
  0x12   :  { %s5860_s27 = smov 0   ;;  %s5862_s28 = smov 0  }
  0x13 LB: > { %7074 = sst [smem:[#allocation30_spill]] %s5762_s27  ;;  %s5768_s29 = smov [#allocation10]   ;;  %s5766_s28 = sphi %s5862_s28, %s7105_s28   ;;  %s5762_s27 = sphi %s5860_s27, %s7107_s27   ;;  %s5758_s26 = sphi %s5858_s26, %s7109_s26   ;;  %s5754_s25 = sphi %s5856_s25, %s7108_s25  }
  0x14   : > { %s370_s30 = sshll.u32 %s5768_s29, 4  ;;  %s5877_s14 = sadd.s32 4294967295, %s5766_s28   ;;  %s371_s30 = int_to_ptr.vmem [resolvable:$true] %s370_s30 }
  0x15   : > { %p4583_p0 = scmp.ge.s32.totalorder %s5766_s28, 1  ;;  %p7064_p1 = scmp.eq.s32.totalorder %s5877_s14, 0 }
  0x16   : > { %p358_p2 = scmp.lt.s32.totalorder %s5766_s28, 5  ;;  %s5769_s16 = smov [#allocation11]  }
  0x17   : > { %s383_s17 = sshll.u32 %s5769_s16, 4  ;;  %s5770_s19 = smov [#allocation14]   ;;  %s5894_s17 = int_to_ptr.vmem [resolvable:$true] %s383_s17 }
  0x18   : > { %p5882_p3 = pnand %p4583_p0, %p358_p2  ;;  %s412_s20 = sshll.u32 %s5770_s19, 4  ;;  %s5896_s20 = int_to_ptr.vmem [resolvable:$true] %s412_s20 }
  0x19   : > { %s5451_s22 = scalar_lea.vmem %s371_s30, 4096  ;;  %p5459_p10 = scmp.lt.s32.totalorder %s371_s30, %s371_s30 }
  0x1a   : > { %s7075_s15 = scalar_select %p5882_p3, 1, 0 }
  0x1b   : > { %p4849_p4 = pneg %p5882_p3  ;;  %p5452_p7 = scmp.ne.s32.totalorder %s371_s30, %s5451_s22 }
  0x1c   : > { %p5460_p11 = scmp.lt.s32.totalorder %s5451_s22, %s5451_s22 }
  0x1d   : > { %p5890_p5 = pnand %p4849_p4, %p7064_p1 }
  0x1e   : > { %p5461_p12 = por %p5460_p11, %p5459_p10 }
  0x1f   : > { %p5900_p6 = pneg %p5890_p5 }
  0x21   : > { %p5454_p8 = pnand %p5452_p7, %p5900_p6 }
  0x23   : > { %p5455_p9 = pneg %p5454_p8 }
  0x25   : > { %p5462_p13 = pnand %p5461_p12, %p5455_p9 }
  0x27   : > { %5465 = shalt.err (!%p5462_p13)
}
  0x28   : > { %s5771_s23 = smov 256   ;;  %s5772_s24 = smov 16  }
  0x29   : > { %s7078_s2 = sld [smem:[#allocation34_spill]]  ;;  %s5477_s19 = scalar_lea.vmem %s5894_s17, 4096 }
  0x2a   : > { %p5478_p0 = scmp.ne.s32.totalorder %s5894_s17, %s5477_s19  ;;  %p5485_p7 = scmp.lt.s32.totalorder %s5894_s17, %s5894_s17 }
  0x2b   : > { %p5486_p8 = scmp.lt.s32.totalorder %s5477_s19, %s5477_s19 }
  0x2c   : > { %p5480_p2 = pnand %p5478_p0, %p5900_p6 }
  0x2d   : > { %p5487_p9 = por %p5486_p8, %p5485_p7 }
  0x2e   : > { %p5481_p4 = pneg %p5480_p2 }
  0x2f   : > { %4852 = dma.hbm_to_vmem [thread:$0]  (!%p5890_p5), %s7078_s2, 4096, %s371_s30, [#allocation9], %s5771_s23, %s5771_s23, %s5772_s24  }
  0x30   : > { %p5488_p10 = pnand %p5487_p9, %p5481_p4 }
  0x32   : > { %5491 = shalt.err (!%p5488_p10)
}
  0x33   : > { %s7079_s3 = sld [smem:[#allocation35_spill]]  ;;  %s5503_s30 = scalar_lea.vmem %s5896_s20, 4096 }
  0x34   : > { %p5504_p11 = scmp.ne.s32.totalorder %s5896_s20, %s5503_s30  ;;  %p5511_p0 = scmp.lt.s32.totalorder %s5896_s20, %s5896_s20 }
  0x35   : > { %p5512_p2 = scmp.lt.s32.totalorder %s5503_s30, %s5503_s30 }
  0x36   : > { %p5506_p12 = pnand %p5504_p11, %p5900_p6 }
  0x37   : > { %p5513_p4 = por %p5512_p2, %p5511_p0 }
  0x38   : > { %p5507_p13 = pneg %p5506_p12 }
  0x39   : > { %4855 = dma.hbm_to_vmem [thread:$0]  (!%p5890_p5), %s7079_s3, 4096, %s5894_s17, [#allocation12], %s5771_s23, %s5771_s23, %s5772_s24  }
  0x3a   : > { %p5514_p7 = pnand %p5513_p4, %p5507_p13 }
  0x3c   : > { %5517 = shalt.err (!%p5514_p7)
}
  0x3d   : > { %s7080_s6 = sld [smem:[#allocation37_spill]]  ;;  %s5773_s17 = smov [#allocation13]  }
  0x3e   : > { %s396_s22 = sshll.u32 %s5773_s17, 4  ;;  %s5774_s29 = smov [#allocation16]   ;;  %s397_s22 = int_to_ptr.vmem [resolvable:$true] %s396_s22 }
  0x3f   : > { %s425_s2 = sshll.u32 %s5774_s29, 4  ;;  %s5529_s30 = scalar_lea.vmem %s397_s22, 4096  ;;  %s426_s2 = int_to_ptr.vmem [resolvable:$true] %s425_s2 }
  0x40   : > { %p5530_p8 = scmp.ne.s32.totalorder %s397_s22, %s5529_s30  ;;  %p5537_p11 = scmp.lt.s32.totalorder %s397_s22, %s397_s22 }
  0x41   : > { %p5538_p12 = scmp.lt.s32.totalorder %s5529_s30, %s5529_s30 }
  0x42   : > { %p5532_p9 = pnand %p5530_p8, %p5900_p6 }
  0x43   : > { %4861 = dma.hbm_to_vmem [thread:$0]  (!%p5890_p5), %s7080_s6, 4096, %s5896_s20, [#allocation15], %s5771_s23, %s5771_s23, %s5772_s24  }
  0x44   : > { %p5533_p10 = pneg %p5532_p9  ;;  %p5539_p13 = por %p5538_p12, %p5537_p11 }
  0x46   : > { %p5540_p0 = pnand %p5539_p13, %p5533_p10 }
  0x48   : > { %5543 = shalt.err (!%p5540_p0)
}
  0x49   : > { %s7081_s4 = sld [smem:[#allocation36_spill]]  ;;  %s5555_s19 = scalar_lea.vmem %s426_s2, 4096 }
  0x4a   : > { %p5556_p2 = scmp.ne.s32.totalorder %s426_s2, %s5555_s19  ;;  %p5563_p8 = scmp.lt.s32.totalorder %s426_s2, %s426_s2 }
  0x4b   : > { %p5564_p9 = scmp.lt.s32.totalorder %s5555_s19, %s5555_s19 }
  0x4c   : > { %p5558_p4 = pnand %p5556_p2, %p5900_p6 }
  0x4d   : > { %p5565_p10 = por %p5564_p9, %p5563_p8 }
  0x4e   : > { %p5559_p7 = pneg %p5558_p4 }
  0x4f   : > { %4858 = dma.hbm_to_vmem [thread:$0]  (!%p5890_p5), %s7081_s4, 4096, %s397_s22, [#allocation12], %s5771_s23, %s5771_s23, %s5772_s24  }
  0x50   : > { %p5566_p11 = pnand %p5565_p10, %p5559_p7 }
  0x52   : > { %5569 = shalt.err (!%p5566_p11)
}
  0x53   : > { %s7082_s7 = sld [smem:[#allocation38_spill]]  ;;  %s5775_s22 = smov [#allocation17]  }
  0x54   : > { %s441_s30 = sshll.u32 %s5775_s22, 4  ;;  %s442_s30 = int_to_ptr.vmem [resolvable:$true] %s441_s30 }
  0x55   : > { %s5581_s20 = scalar_lea.vmem %s442_s30, 2048  ;;  %p5589_p2 = scmp.lt.s32.totalorder %s442_s30, %s442_s30 }
  0x56   : > { %p5582_p12 = scmp.ne.s32.totalorder %s442_s30, %s5581_s20  ;;  %p5590_p4 = scmp.lt.s32.totalorder %s5581_s20, %s5581_s20 }
  0x58   : > { %p5584_p13 = pnand %p5582_p12, %p5900_p6  ;;  %p5591_p7 = por %p5590_p4, %p5589_p2 }
  0x59   : > { %4864 = dma.hbm_to_vmem [thread:$0]  (!%p5890_p5), %s7082_s7, 4096, %s426_s2, [#allocation15], %s5771_s23, %s5771_s23, %s5772_s24  }
  0x5a   : > { %p5585_p0 = pneg %p5584_p13 }
  0x5c   : > { %p5592_p8 = pnand %p5591_p7, %p5585_p0 }
  0x5e   : > { %5595 = shalt.err (!%p5592_p8)
}
  0x5f   : > { %s5776_s16 = smov 128   ;;  %s5777_s2 = smov 8  }
  0x60   : > { %s7083_s9 = sld [smem:[#allocation39_spill]]  ;;  %s4582_s24 = sadd.s32 4294967294, %s5766_s28  }
  0x61   : > { %s5973_s19 = sadd.s32 1, %s5766_s28   ;;  %s46_s29 = sadd.s32 1, %s5762_s27 }
  0x62   : > { %7084 = sst [smem:[#allocation31_spill]] %s5973_s19  ;;  %s43_s17 = ssub.s32 %s5766_s28, %s5973_s19 }
  0x63   : > { %p44_p6 = scmp.eq.s32.totalorder %s43_s17, 0  ;;  %p53_p9 = scmp.ne.s32.totalorder %s5762_s27, %s5758_s26 }
  0x64   : > { %p54_p10 = scmp.eq.s32.totalorder %s5766_s28, 0  ;;  %p59_p11 = scmp.ne.s32.totalorder %s5758_s26, %s5754_s25 }
  0x65   : > { %s5984_s22 = scalar_select %p44_p6, %s5762_s27, %s46_s29  }
  0x66   : > { %4867 = dma.hbm_to_vmem [thread:$0]  (!%p5890_p5), %s7083_s9, 2048, %s442_s30, [#allocation18], %s5776_s16, %s5776_s16, %s5777_s2  }
  0x67   : > { %7085 = sst [smem:[#allocation32_spill]] %s5984_s22  ;;  %p5986_p12 = por %p54_p10, %p53_p9 }
  0x68   : > { %p5992_p5 = por %p7064_p1, %p59_p11  ;;  %p319_p13 = scmp.eq.s32.totalorder %s5877_s14, 3 }
  0x69   : > { %p325_p0 = scmp.eq.s32.totalorder %s4582_s24, 3  ;;  %p4888_p2 = scmp.lt.s32.totalorder %s5766_s28, 4 }
  0x6a   : > { %s7087_s30 = scalar_select %p5992_p5, 1, 0 }
  0x6b   : > { %s461_s20 = sand.u32 1, %s5762_s27   ;;  %p5999_p4 = por %p319_p13, %p53_p9 }
  0x6c   : > { %p6003_p7 = por %p325_p0, %p59_p11  ;;  %s6007_s21 = sshll.u32 %s461_s20, 2 }
  0x6d   : > { %s7088_s16 = scalar_select %p5999_p4, 1, 0 }
  0x6e   : > { %s7089_s2 = scalar_select %p6003_p7, 1, 0 }
  0x6f   : > { %s4592_s23 = sshll.u32 %s5766_s28, 6  ;;  %s465_s24 = scalar_lea.vmem [#allocation5], %s6007_s21 }
  0x70   : > { %7090 = sst [smem:[#allocation33_spill]] %s7089_s2  ;;  %s6013_s3 = scalar_lea.hbm %s7046_s0, %s4592_s23 }
  0x71   : > { %s472_s4 = sshll.u32 %s465_s24, 4  ;;  %p6020_p8 = pnand %p4888_p2, %p5986_p12  ;;  %s6016_s4 = int_to_ptr.vmem [resolvable:$true] %s472_s4 }
  0x72   : > { %s6027_s17 = scalar_lea.hbm %s7047_s1, %s4592_s23  ;;  %s479_s29 = sand.u32 1, %s5766_s28  }
  0x73   : > { %s462_s22 = scalar_lea.sflag [#allocation6], %s461_s20  ;;  %s5596_s27 = scalar_lea.hbm %s6013_s3, 64 }
  0x74   : > { %p5597_p6 = scmp.ne.s32.totalorder %s6013_s3, %s5596_s27  ;;  %p5598_p9 = pneg %p6020_p8 }
  0x75   : > { %s5601_s19 = scalar_lea.hbm %s7046_s0, 256  ;;  %p5602_p12 = scmp.lt.s32.totalorder %s6013_s3, %s7046_s0 }
  0x76   : > { %p5599_p10 = pnand %p5598_p9, %p5597_p6  ;;  %p5603_p13 = scmp.lt.s32.totalorder %s5601_s19, %s5596_s27 }
  0x78   : > { %p5600_p11 = pneg %p5599_p10  ;;  %p5604_p0 = por %p5603_p13, %p5602_p12 }
  0x7a   : > { %p5605_p2 = pnand %p5604_p0, %p5600_p11 }
  0x7c   : > { %5608 = shalt.err (!%p5605_p2)
}
  0x7d   : > { %s5609_s9 = scalar_lea.vmem %s6016_s4, 64  ;;  %s5778_s20 = smov [#allocation5]  }
  0x7e   : > { %p5610_p1 = scmp.ne.s32.totalorder %s6016_s4, %s5609_s9  ;;  %s5614_s23 = sshll.u32 %s5778_s20, 4  ;;  %s5615_s23 = int_to_ptr.vmem [resolvable:$false] %s5614_s23 }
  0x7f   : > { %s5616_s18 = scalar_lea.vmem %s5615_s23, 128  ;;  %p5617_p7 = scmp.lt.s32.totalorder %s6016_s4, %s5615_s23 }
  0x80   : > { %p5612_p6 = pnand %p5610_p1, %p5598_p9  ;;  %p5618_p4 = scmp.lt.s32.totalorder %s5616_s18, %s5609_s9 }
  0x82   : > { %p5613_p10 = pneg %p5612_p6  ;;  %p5619_p5 = por %p5618_p4, %p5617_p7 }
  0x84   : > { %p5620_p12 = pnand %p5619_p5, %p5613_p10 }
  0x86   : > { %5623 = shalt.err (!%p5620_p12)
}
  0x87   : > { %4871 = dma.hbm_to_vmem [thread:$0]  (!%p6020_p8), %s6013_s3, 64, %s6016_s4, %s462_s22  }
  0x88   : > { %s483_s27 = scalar_lea.vmem [#allocation8], %s6007_s21  ;;  %s480_s2 = scalar_lea.sflag [#allocation9], %s479_s29 }
  0x89   : > { %s490_s19 = sshll.u32 %s483_s27, 4  ;;  %s5624_s24 = scalar_lea.hbm %s6027_s17, 64  ;;  %s491_s19 = int_to_ptr.vmem [resolvable:$true] %s490_s19 }
  0x8a   : > { %p5625_p1 = scmp.ne.s32.totalorder %s6027_s17, %s5624_s24  ;;  %s5629_s20 = scalar_lea.hbm %s7047_s1, 256 }
  0x8b   : > { %p5630_p7 = scmp.lt.s32.totalorder %s6027_s17, %s7047_s1  ;;  %p5631_p11 = scmp.lt.s32.totalorder %s5629_s20, %s5624_s24 }
  0x8c   : > { %p5627_p5 = pnand %p5625_p1, %p5598_p9 }
  0x8d   : > { %p5632_p13 = por %p5631_p11, %p5630_p7 }
  0x8e   : > { %p5628_p4 = pneg %p5627_p5 }
  0x90   : > { %p5633_p0 = pnand %p5632_p13, %p5628_p4 }
  0x92   : > { %5636 = shalt.err (!%p5633_p0)
}
  0x93   : > { %s5637_s3 = scalar_lea.vmem %s491_s19, 64  ;;  %s5779_s4 = smov [#allocation8]  }
  0x94   : > { %p5638_p2 = scmp.ne.s32.totalorder %s491_s19, %s5637_s3  ;;  %s5642_s22 = sshll.u32 %s5779_s4, 4  ;;  %s5643_s22 = int_to_ptr.vmem [resolvable:$false] %s5642_s22 }
  0x95   : > { %s5644_s21 = scalar_lea.vmem %s5643_s22, 128  ;;  %p5645_p12 = scmp.lt.s32.totalorder %s491_s19, %s5643_s22 }
  0x96   : > { %p5640_p6 = pnand %p5638_p2, %p5598_p9  ;;  %p5646_p1 = scmp.lt.s32.totalorder %s5644_s21, %s5637_s3 }
  0x98   : > { %p5641_p10 = pneg %p5640_p6  ;;  %p5647_p5 = por %p5646_p1, %p5645_p12 }
  0x9a   : > { %p5648_p3 = pnand %p5647_p5, %p5641_p10 }
  0x9c   : > { %5651 = shalt.err (!%p5648_p3)
}
  0x9d   : > { %4874 = dma.hbm_to_vmem [thread:$0]  (!%p6020_p8), %s6027_s17, 64, %s491_s19, %s480_s2  }
  0x9e   : > { %p7092_p4 = scmp.ne.s32.totalorder %s7075_s15, 0 }
  0x9f   : > { %s6078_s29 = sand.u32 (!%p7092_p4), 1, %s5758_s26   ;;  %p7093_p9 = scmp.ne.s32.totalorder (!%p7092_p4), %s7087_s30, 0 }
  0xa0   : > { %499 = sbr.rel (%p7092_p4) target bundleno = 4718 (0x126e), region = 68  ;;  %s4596_s27 = sshll.u32 (!%p7092_p4), %s6078_s29, 2 }
  0xa1   : > { %s502_s24 = scalar_lea.sflag (!%p7092_p4), [#allocation6], %s6078_s29  ;;  %s6082_s7 = scalar_lea.vmem (!%p7092_p4), [#allocation5], %s4596_s27 }
  0xa5   : > { %5721 = dma.done.wait (%p7093_p9), %s502_s24, 64  }
  0xa6   : > { %5723 = vsyncadd (%p7093_p9), %s502_s24, 4294967232  ;;  %s510_s6 = sand.u32 1, %s5877_s14   ;;  %s6089_s17 = scalar_lea.vmem [#allocation8], %s4596_s27 }
  0xa7   : > { %s511_s15 = scalar_lea.sflag [#allocation9], %s510_s6 }
  0xa8   : > { %5725 = dma.done.wait (%p7093_p9), %s511_s15, 64  }
  0xa9   : > { %5727 = vsyncadd (%p7093_p9), %s511_s15, 4294967232  ;;  %p7094_p3 = scmp.eq.s32.totalorder %s5877_s14, 0 }
  0xab   : > { %5729 = dma.done.wait (%p7094_p3), [#allocation9], 4096   ;;  %p7095_p8 = pmov %p7094_p3 }
  0xac   : > { %p7096_p7 = pmov %p7094_p3 }
  0xad   : > { %5731 = vsyncadd (%p7095_p8), [#allocation9], 4294963200 }
  0xae   : > { %5733 = dma.done.wait (%p7096_p7), [#allocation12], 8192   ;;  %p7097_p11 = pmov %p7094_p3 }
  0xaf   : > { %p7098_p13 = pmov %p7094_p3 }
  0xb0   : > { %5735 = vsyncadd (%p7097_p11), [#allocation12], 4294959104 }
  0xb1   : > { %5737 = dma.done.wait (%p7098_p13), [#allocation15], 8192   ;;  %p7099_p0 = pmov %p7094_p3 }
  0xb3   : > { %5739 = vsyncadd (%p7099_p0), [#allocation15], 4294959104  ;;  %p7100_p2 = pmov %p7099_p0 }
  0xb4   : > { %p7101_p6 = pmov %p7099_p0 }
  0xb5   : > { %5741 = dma.done.wait (%p7100_p2), [#allocation18], 2048  }
  0xb6   : > { %5743 = vsyncadd (%p7101_p6), [#allocation18], 4294965248  ;;  %v5780_v0 = vmov 0   ;;  %v4943_v1 = vld [vmem:[#allocation11 + $0xe4] ss:$16 sps:$4 sm:$0xff]   ;;  %vm5783_vm0 = vmmov 0  }
  0xb7   : > { %867 = vmatprep.mubr.bf16.mxu0 %v5780_v0  ;;  %908 = vmatprep.mubr.bf16.mxu1 %v5780_v0  ;;  %v4945_v2 = vld [vmem:[#allocation11 + $0xec] ss:$16 sps:$4 sm:$0xff]   ;;  %v4947_v3 = vld [vmem:[#allocation11 + $0xe0] ss:$16 sps:$4 sm:$0xff]   ;;  %v4948_v4 = vld [vmem:[#allocation11 + $0xe8] ss:$16 sps:$4 sm:$0xff]  }
  0xb8   : > { %4942 = vset.pattern.permute.xlu0 %v5780_v0  ;;  %835 = vmatprep.subr.bf16.mxu0 %v4943_v1  ;;  %v4949_v5 = vld [vmem:[#allocation11 + $0xc4] ss:$16 sps:$4 sm:$0xff]   ;;  %v4951_v6 = vld [vmem:[#allocation11 + $0xcc] ss:$16 sps:$4 sm:$0xff]   ;;  %v4953_v7 = vld [vmem:[#allocation11 + $0xc0] ss:$16 sps:$4 sm:$0xff]  }
  0xb9   : > { %876 = vmatprep.subr.bf16.mxu1 %v4945_v2  ;;  %836 = vmatpush1.bf16.msra.mxu0 %v4947_v3  ;;  %v4954_v8 = vld [vmem:[#allocation11 + $0xc8] ss:$16 sps:$4 sm:$0xff]   ;;  %v4955_v9 = vld [vmem:[#allocation11 + $0xa4] ss:$16 sps:$4 sm:$0xff]   ;;  %v4957_v10 = vld [vmem:[#allocation11 + $0xac] ss:$16 sps:$4 sm:$0xff]  }
  0xba   : > { %877 = vmatpush1.bf16.msra.mxu1 %v4948_v4  ;;  %837 = vmatprep.subr.bf16.mxu0 %v4949_v5  ;;  %v4959_v11 = vld [vmem:[#allocation11 + $0xa0] ss:$16 sps:$4 sm:$0xff]   ;;  %v4960_v12 = vld [vmem:[#allocation11 + $0xa8] ss:$16 sps:$4 sm:$0xff]   ;;  %v4961_v13 = vld [vmem:[#allocation11 + $0x84] ss:$16 sps:$4 sm:$0xff]  }
  0xbb   : > { %878 = vmatprep.subr.bf16.mxu1 %v4951_v6  ;;  %v4963_v14 = vld [vmem:[#allocation11 + $0x8c] ss:$16 sps:$4 sm:$0xff]   ;;  %v4965_v15 = vld [vmem:[#allocation11 + $0x80] ss:$16 sps:$4 sm:$0xff]   ;;  %v4966_v16 = vld [vmem:[#allocation11 + $0x88] ss:$16 sps:$4 sm:$0xff]  }
  0xbc   : > { %v4967_v17 = vld [vmem:[#allocation11 + $0x64] ss:$16 sps:$4 sm:$0xff]   ;;  %v4969_v18 = vld [vmem:[#allocation11 + $0x6c] ss:$16 sps:$4 sm:$0xff]   ;;  %v4971_v19 = vld [vmem:[#allocation11 + $0x60] ss:$16 sps:$4 sm:$0xff]  }
  0xbd   : > { %838 = vmatpush1.bf16.msra.mxu0 %v4953_v7  ;;  %v4972_v20 = vld [vmem:[#allocation11 + $0x68] ss:$16 sps:$4 sm:$0xff]   ;;  %v4973_v21 = vld [vmem:[#allocation11 + $0x44] ss:$16 sps:$4 sm:$0xff]   ;;  %v4975_v22 = vld [vmem:[#allocation11 + $0x4c] ss:$16 sps:$4 sm:$0xff]  }
  0xbe   : > { %879 = vmatpush1.bf16.msra.mxu1 %v4954_v8  ;;  %839 = vmatprep.subr.bf16.mxu0 %v4955_v9  ;;  %v4977_v23 = vld [vmem:[#allocation11 + $0x40] ss:$16 sps:$4 sm:$0xff]   ;;  %v4978_v24 = vld [vmem:[#allocation11 + $0x48] ss:$16 sps:$4 sm:$0xff]   ;;  %v4979_v25 = vld [vmem:[#allocation11 + $0x24] ss:$16 sps:$4 sm:$0xff]  }
  0xbf   : > { %880 = vmatprep.subr.bf16.mxu1 %v4957_v10  ;;  %v4981_v26 = vld [vmem:[#allocation11 + $0x2c] ss:$16 sps:$4 sm:$0xff]   ;;  %v4983_v27 = vld [vmem:[#allocation11 + $0x20] ss:$16 sps:$4 sm:$0xff]   ;;  %v4984_v28 = vld [vmem:[#allocation11 + $0x28] ss:$16 sps:$4 sm:$0xff]  }
  0xc0   : > { %v4985_v29 = vld [vmem:[#allocation11 + $0x4] ss:$16 sps:$4 sm:$0xff]   ;;  %v4987_v30 = vld [vmem:[#allocation11 + $0xc] ss:$16 sps:$4 sm:$0xff]   ;;  %v4989_v31 = vld [vmem:[#allocation11] ss:$16 sps:$4 sm:$0xff]  }
  0xc1   : > { %840 = vmatpush1.bf16.msra.mxu0 %v4959_v11  ;;  %v4990_v32 = vld [vmem:[#allocation11 + $0x8] ss:$16 sps:$4 sm:$0xff]   ;;  %v4993_v33 = vld [vmem:[#allocation10 + $0xe4] ss:$16 sps:$4 sm:$0xff]   ;;  %v4996_v34 = vld [vmem:[#allocation10 + $0xec] ss:$16 sps:$4 sm:$0xff]  }
  0xc2   : > { %881 = vmatpush1.bf16.msra.mxu1 %v4960_v12  ;;  %841 = vmatprep.subr.bf16.mxu0 %v4961_v13  ;;  %v642_v35 = vld [vmem:[%s6089_s17] sm:$0xf]  ;;  %v4991_v36 = vld [vmem:[#allocation10 + $0xe0] ss:$16 sps:$4 sm:$0xff]   ;;  %v4999_v38 = vld [vmem:[#allocation10 + $0xc4] ss:$16 sps:$4 sm:$0xff]  }
  0xc3   : > { %882 = vmatprep.subr.bf16.mxu1 %v4963_v14  ;;  %v4994_v37 = vld [vmem:[#allocation10 + $0xe8] ss:$16 sps:$4 sm:$0xff]   ;;  %v5002_v39 = vld [vmem:[#allocation10 + $0xcc] ss:$16 sps:$4 sm:$0xff]   ;;  %v4997_v40 = vld [vmem:[#allocation10 + $0xc0] ss:$16 sps:$4 sm:$0xff]  }
  0xc4   : > { %v5000_v41 = vld [vmem:[#allocation10 + $0xc8] ss:$16 sps:$4 sm:$0xff]   ;;  %v5005_v42 = vld [vmem:[#allocation10 + $0xa4] ss:$16 sps:$4 sm:$0xff]   ;;  %v5008_v43 = vld [vmem:[#allocation10 + $0xac] ss:$16 sps:$4 sm:$0xff]  }
  0xc5   : > { %842 = vmatpush1.bf16.msra.mxu0 %v4965_v15  ;;  %v5003_v44 = vld [vmem:[#allocation10 + $0xa0] ss:$16 sps:$4 sm:$0xff]   ;;  %v5006_v45 = vld [vmem:[#allocation10 + $0xa8] ss:$16 sps:$4 sm:$0xff]   ;;  %v5011_v46 = vld [vmem:[#allocation10 + $0x84] ss:$16 sps:$4 sm:$0xff]  }
  0xc6   : > { %883 = vmatpush1.bf16.msra.mxu1 %v4966_v16  ;;  %843 = vmatprep.subr.bf16.mxu0 %v4967_v17  ;;  %v5014_v47 = vld [vmem:[#allocation10 + $0x8c] ss:$16 sps:$4 sm:$0xff]   ;;  %v5009_v48 = vld [vmem:[#allocation10 + $0x80] ss:$16 sps:$4 sm:$0xff]   ;;  %v5012_v49 = vld [vmem:[#allocation10 + $0x88] ss:$16 sps:$4 sm:$0xff]  }
  0xc7   : > { %884 = vmatprep.subr.bf16.mxu1 %v4969_v18  ;;  %v5017_v50 = vld [vmem:[#allocation10 + $0x64] ss:$16 sps:$4 sm:$0xff]   ;;  %v5020_v51 = vld [vmem:[#allocation10 + $0x6c] ss:$16 sps:$4 sm:$0xff]   ;;  %v5015_v52 = vld [vmem:[#allocation10 + $0x60] ss:$16 sps:$4 sm:$0xff]  }
  0xc8   : > { %v5018_v53 = vld [vmem:[#allocation10 + $0x68] ss:$16 sps:$4 sm:$0xff]   ;;  %v5023_v54 = vld [vmem:[#allocation10 + $0x44] ss:$16 sps:$4 sm:$0xff]   ;;  %v5026_v55 = vld [vmem:[#allocation10 + $0x4c] ss:$16 sps:$4 sm:$0xff]  }
  0xc9   : > { %844 = vmatpush1.bf16.msra.mxu0 %v4971_v19  ;;  %v5021_v56 = vld [vmem:[#allocation10 + $0x40] ss:$16 sps:$4 sm:$0xff]   ;;  %v5024_v57 = vld [vmem:[#allocation10 + $0x48] ss:$16 sps:$4 sm:$0xff]   ;;  %v5029_v58 = vld [vmem:[#allocation10 + $0x24] ss:$16 sps:$4 sm:$0xff]  }
  0xca   : > { %885 = vmatpush1.bf16.msra.mxu1 %v4972_v20  ;;  %845 = vmatprep.subr.bf16.mxu0 %v4973_v21  ;;  %v5032_v59 = vld [vmem:[#allocation10 + $0x2c] ss:$16 sps:$4 sm:$0xff]   ;;  %v5027_v60 = vld [vmem:[#allocation10 + $0x20] ss:$16 sps:$4 sm:$0xff]   ;;  %v5030_v61 = vld [vmem:[#allocation10 + $0x28] ss:$16 sps:$4 sm:$0xff]  }
  0xcb   : > { %886 = vmatprep.subr.bf16.mxu1 %v4975_v22  ;;  %v5035_v62 = vld [vmem:[#allocation10 + $0x4] ss:$16 sps:$4 sm:$0xff]   ;;  %v5038_v63 = vld [vmem:[#allocation10 + $0xc] ss:$16 sps:$4 sm:$0xff]   ;;  %v5033_v1 = vld [vmem:[#allocation10] ss:$16 sps:$4 sm:$0xff]  }
  0xcc   : > { %v5036_v2 = vld [vmem:[#allocation10 + $0x8] ss:$16 sps:$4 sm:$0xff]   ;;  %v6117_v3 = vld [vmem:[#allocation13 + $0xe4] ss:$16 sps:$4 sm:$0xff]   ;;  %v6119_v4 = vld [vmem:[#allocation13 + $0xec] ss:$16 sps:$4 sm:$0xff]  }
  0xcd   : > { %846 = vmatpush1.bf16.msra.mxu0 %v4977_v23  ;;  %v609_v5 = vld [vmem:[%s6082_s7] sm:$0xf]  ;;  %v6124_v7 = vld [vmem:[#allocation13 + $0xe8] ss:$16 sps:$4 sm:$0xff]   ;;  %v6128_v9 = vld [vmem:[#allocation13 + $0xcc] ss:$16 sps:$4 sm:$0xff]  }
  0xce   : > { %887 = vmatpush1.bf16.msra.mxu1 %v4978_v24  ;;  %847 = vmatprep.subr.bf16.mxu0 %v4979_v25  ;;  %v6122_v6 = vld [vmem:[#allocation13 + $0xe0] ss:$16 sps:$4 sm:$0xff]   ;;  %v6126_v8 = vld [vmem:[#allocation13 + $0xc4] ss:$16 sps:$4 sm:$0xff]   ;;  %v6134_v11 = vld [vmem:[#allocation13 + $0xc8] ss:$16 sps:$4 sm:$0xff]  }
  0xcf   : > { %888 = vmatprep.subr.bf16.mxu1 %v4981_v26  ;;  %v6132_v10 = vld [vmem:[#allocation13 + $0xc0] ss:$16 sps:$4 sm:$0xff]   ;;  %v6136_v12 = vld [vmem:[#allocation13 + $0xa4] ss:$16 sps:$4 sm:$0xff]   ;;  %v6138_v13 = vld [vmem:[#allocation13 + $0xac] ss:$16 sps:$4 sm:$0xff]  }
  0xd0   : > { %v6144_v14 = vld [vmem:[#allocation13 + $0xa0] ss:$16 sps:$4 sm:$0xff]   ;;  %v6146_v15 = vld [vmem:[#allocation13 + $0xa8] ss:$16 sps:$4 sm:$0xff]   ;;  %v6150_v16 = vld [vmem:[#allocation13 + $0x84] ss:$16 sps:$4 sm:$0xff]  }
  0xd1   : > { %848 = vmatpush1.bf16.msra.mxu0 %v4983_v27  ;;  %v6152_v17 = vld [vmem:[#allocation13 + $0x8c] ss:$16 sps:$4 sm:$0xff]   ;;  %v6158_v18 = vld [vmem:[#allocation13 + $0x80] ss:$16 sps:$4 sm:$0xff]   ;;  %v6160_v19 = vld [vmem:[#allocation13 + $0x88] ss:$16 sps:$4 sm:$0xff]  }
  0xd2   : > { %889 = vmatpush1.bf16.msra.mxu1 %v4984_v28  ;;  %849 = vmatprep.subr.bf16.mxu0 %v4985_v29  ;;  %v6162_v20 = vld [vmem:[#allocation13 + $0x64] ss:$16 sps:$4 sm:$0xff]   ;;  %v6164_v21 = vld [vmem:[#allocation13 + $0x6c] ss:$16 sps:$4 sm:$0xff]   ;;  %v6170_v22 = vld [vmem:[#allocation13 + $0x60] ss:$16 sps:$4 sm:$0xff]  }
  0xd3   : > { %890 = vmatprep.subr.bf16.mxu1 %v4987_v30  ;;  %v6172_v23 = vld [vmem:[#allocation13 + $0x68] ss:$16 sps:$4 sm:$0xff]   ;;  %v6174_v24 = vld [vmem:[#allocation13 + $0x44] ss:$16 sps:$4 sm:$0xff]   ;;  %v6176_v25 = vld [vmem:[#allocation13 + $0x4c] ss:$16 sps:$4 sm:$0xff]  }
  0xd4   : > { %v6182_v26 = vld [vmem:[#allocation13 + $0x40] ss:$16 sps:$4 sm:$0xff]   ;;  %v6184_v27 = vld [vmem:[#allocation13 + $0x48] ss:$16 sps:$4 sm:$0xff]   ;;  %v6186_v28 = vld [vmem:[#allocation13 + $0x24] ss:$16 sps:$4 sm:$0xff]  }
  0xd5   : > { %850 = vmatpush1.bf16.msra.mxu0 %v4989_v31  ;;  %v6188_v29 = vld [vmem:[#allocation13 + $0x2c] ss:$16 sps:$4 sm:$0xff]   ;;  %v6194_v30 = vld [vmem:[#allocation13 + $0x20] ss:$16 sps:$4 sm:$0xff]   ;;  %v6196_v31 = vld [vmem:[#allocation13 + $0x28] ss:$16 sps:$4 sm:$0xff]  }
  0xd6   : > { %891 = vmatpush1.bf16.msra.mxu1 %v4990_v32  ;;  %1077 = vmatprep.subr.bf16.mxu0 %v4993_v33  ;;  %v6198_v32 = vld [vmem:[#allocation13 + $0x4] ss:$16 sps:$4 sm:$0xff]   ;;  %v6200_v33 = vld [vmem:[#allocation13 + $0xc] ss:$16 sps:$4 sm:$0xff]   ;;  %s4604_s4 = sshll.u32 %s6078_s29, 3  ;;  %s4784_s22 = sshll.u32 %s5877_s14, 7 }
  0xd7   : > { %1118 = vmatprep.subr.bf16.mxu1 %v4996_v34  ;;  %v6208_v34 = vld [vmem:[#allocation13] ss:$16 sps:$4 sm:$0xff]   ;;  %s583_s21 = scalar_lea.vmem [#allocation19], %s4604_s4  ;;  %s6990_s6 = scalar_lea.hbm %s7058_s12, %s4784_s22 }
  0xd8   : > { %868 = vmatmul.mubr.bf16.vlgmr.msra.gmra.mxu0 %v642_v35  ;;  %s4387_s27 = sshll.u32 %s583_s21, 4  ;;  %s4369_s15 = scalar_lea.sflag [#allocation7], %s6078_s29  ;;  %s4388_s27 = int_to_ptr.vmem [resolvable:$true] %s4387_s27 }
  0xd9   : > { %909 = vmatmul.mubr.bf16.vlgmr.msra.gmra.mxu1 %v642_v35  ;;  %1078 = vmatpush1.bf16.msra.mxu0 %v4991_v36  ;;  %v6210_v35 = vld [vmem:[#allocation13 + $0x8] ss:$16 sps:$4 sm:$0xff]   ;;  %v5781_v36 = vmov 0.0   ;;  %s5652_s17 = scalar_lea.vmem %s4388_s27, 128  ;;  %p7102_p12 = scmp.ne.s32.totalorder %s7088_s16, 0 }
  0xda   : > { %1119 = vmatpush1.bf16.msra.mxu1 %v4994_v37  ;;  %1079 = vmatprep.subr.bf16.mxu0 %v4999_v38  ;;  %592 = vst [vmem:[#allocation3] sm:$0xff] %v5781_v36  ;;  %593 = vst [vmem:[#allocation4] sm:$0xff] %v5781_v36  ;;  %p5653_p10 = scmp.ne.s32.totalorder %s4388_s27, %s5652_s17  ;;  %s5784_s30 = smov [#allocation19]  }
  0xdb   : > { %1120 = vmatprep.subr.bf16.mxu1 %v5002_v39  ;;  %1109 = vmatprep.mubr.bf16.mxu0 %v5780_v0  ;;  %594 = vst [vmem:[#allocation4 + $0x8] sm:$0xff] %v5781_v36  ;;  %s5656_s19 = sshll.u32 %s5784_s30, 4  ;;  %s5657_s19 = int_to_ptr.vmem [resolvable:$false] %s5656_s19 }
  0xdc   : > { %1150 = vmatprep.mubr.bf16.mxu1 %v5780_v0  ;;  %p5654_p1 = pnand %p5653_p10, %p7102_p12  ;;  %s5658_s2 = scalar_lea.vmem %s5657_s19, 256 }
  0xdd   : > { %1080 = vmatpush1.bf16.msra.mxu0 %v4997_v40  ;;  %p5659_p4 = scmp.lt.s32.totalorder %s4388_s27, %s5657_s19  ;;  %p5660_p9 = scmp.lt.s32.totalorder %s5658_s2, %s5652_s17 }
  0xde   : > { %1121 = vmatpush1.bf16.msra.mxu1 %v5000_v41  ;;  %1081 = vmatprep.subr.bf16.mxu0 %v5005_v42  ;;  %p5655_p5 = pneg %p5654_p1 }
  0xdf   : > { %1122 = vmatprep.subr.bf16.mxu1 %v5008_v43  ;;  %p5661_p3 = por %p5660_p9, %p5659_p4 }
  0xe1   : > { %1082 = vmatpush1.bf16.msra.mxu0 %v5003_v44  ;;  %p5662_p8 = pnand %p5661_p3, %p5655_p5 }
  0xe2   : > { %1123 = vmatpush1.bf16.msra.mxu1 %v5006_v45  ;;  %1083 = vmatprep.subr.bf16.mxu0 %v5011_v46  ;;  %v1161_v45 = vlaneseq }
  0xe3   : > { %1124 = vmatprep.subr.bf16.mxu1 %v5014_v47 }
  0xe4   : > { %v6254_v46 = vshrl.u32 %v1161_v45, 7 }
  0xe5   : > { %1084 = vmatpush1.bf16.msra.mxu0 %v5009_v48 }
  0xe6   : > { %1125 = vmatpush1.bf16.msra.mxu1 %v5012_v49  ;;  %1085 = vmatprep.subr.bf16.mxu0 %v5017_v50  ;;  %v6257_v47 = vsub.s32 0, %v6254_v46  ;;  %v1171_v48 = vsub.s32 2, %v6254_v46  ;;  %v1159_v49 = vld [vmem:[%s7051_s5] sm:$0xf]  ;;  %v6264_v50 = vsub.s32 1, %v6254_v46 }
  0xe7   : > { %1126 = vmatprep.subr.bf16.mxu1 %v5020_v51  ;;  %v1175_v51 = vsub.s32 3, %v6254_v46 }
  0xe9   : > { %1086 = vmatpush1.bf16.msra.mxu0 %v5015_v52  ;;  %v1164_v52 = vrot.slane %v1159_v49, %v6257_v47 }
  0xea   : > { %1127 = vmatpush1.bf16.msra.mxu1 %v5018_v53  ;;  %1087 = vmatprep.subr.bf16.mxu0 %v5023_v54  ;;  %v1172_v53 = vrot.slane %v1159_v49, %v1171_v48 }
  0xeb   : > { %1128 = vmatprep.subr.bf16.mxu1 %v5026_v55 }
  0xed   : > { %1088 = vmatpush1.bf16.msra.mxu0 %v5021_v56 }
  0xee   : > { %1129 = vmatpush1.bf16.msra.mxu1 %v5024_v57  ;;  %1089 = vmatprep.subr.bf16.mxu0 %v5029_v58  ;;  %v1168_v58 = vrot.slane %v1159_v49, %v6264_v50 }
  0xef   : > { %1130 = vmatprep.subr.bf16.mxu1 %v5032_v59  ;;  %v1176_v59 = vrot.slane %v1159_v49, %v1175_v51 }
  0xf1   : > { %1090 = vmatpush1.bf16.msra.mxu0 %v5027_v60 }
  0xf2   : > { %1131 = vmatpush1.bf16.msra.mxu1 %v5030_v61  ;;  %1091 = vmatprep.subr.bf16.mxu0 %v5035_v62 }
  0xf3   : > { %1132 = vmatprep.subr.bf16.mxu1 %v5038_v63 }
  0xf5   : > { %1092 = vmatpush1.bf16.msra.mxu0 %v5033_v1 }
  0xf6   : > { %1133 = vmatpush1.bf16.msra.mxu1 %v5036_v2  ;;  %1382 = vmatprep.subr.bf16.mxu0 %v6117_v3 }
  0xf7   : > { %1423 = vmatprep.subr.bf16.mxu1 %v6119_v4 }
  0xf8   : > { %1110 = vmatmul.mubr.bf16.vlgmr.msra.gmra.mxu0 %v609_v5 }
  0xf9   : > { %1151 = vmatmul.mubr.bf16.vlgmr.msra.gmra.mxu1 %v609_v5  ;;  %1383 = vmatpush1.bf16.msra.mxu0 %v6122_v6 }
  0xfa   : > { %1424 = vmatpush1.bf16.msra.mxu1 %v6124_v7  ;;  %1384 = vmatprep.subr.bf16.mxu0 %v6126_v8 }
  0xfb   : > { %1425 = vmatprep.subr.bf16.mxu1 %v6128_v9  ;;  %1414 = vmatprep.mubr.bf16.mxu0 %v5780_v0 }
  0xfc   : > { %1455 = vmatprep.mubr.bf16.mxu1 %v5780_v0 }
  0xfd   : > { %1385 = vmatpush1.bf16.msra.mxu0 %v6132_v10 }
  0xfe   : > { %1426 = vmatpush1.bf16.msra.mxu1 %v6134_v11  ;;  %1386 = vmatprep.subr.bf16.mxu0 %v6136_v12 }
  0xff   : > { %1427 = vmatprep.subr.bf16.mxu1 %v6138_v13 }
 0x101   : > { %1387 = vmatpush1.bf16.msra.mxu0 %v6144_v14 }
 0x102   : > { %1428 = vmatpush1.bf16.msra.mxu1 %v6146_v15  ;;  %1388 = vmatprep.subr.bf16.mxu0 %v6150_v16 }
 0x103   : > { %1429 = vmatprep.subr.bf16.mxu1 %v6152_v17 }
 0x105   : > { %1389 = vmatpush1.bf16.msra.mxu0 %v6158_v18 }
 0x106   : > { %1430 = vmatpush1.bf16.msra.mxu1 %v6160_v19  ;;  %1390 = vmatprep.subr.bf16.mxu0 %v6162_v20 }
 0x107   : > { %1431 = vmatprep.subr.bf16.mxu1 %v6164_v21 }
 0x109   : > { %1391 = vmatpush1.bf16.msra.mxu0 %v6170_v22 }
 0x10a   : > { %1432 = vmatpush1.bf16.msra.mxu1 %v6172_v23  ;;  %1392 = vmatprep.subr.bf16.mxu0 %v6174_v24 }
 0x10b   : > { %1433 = vmatprep.subr.bf16.mxu1 %v6176_v25 }
 0x10d   : > { %1393 = vmatpush1.bf16.msra.mxu0 %v6182_v26 }
 0x10e   : > { %1434 = vmatpush1.bf16.msra.mxu1 %v6184_v27  ;;  %1394 = vmatprep.subr.bf16.mxu0 %v6186_v28 }
 0x10f   : > { %1435 = vmatprep.subr.bf16.mxu1 %v6188_v29 }
 0x111   : > { %1395 = vmatpush1.bf16.msra.mxu0 %v6194_v30 }
 0x112   : > { %1436 = vmatpush1.bf16.msra.mxu1 %v6196_v31  ;;  %1396 = vmatprep.subr.bf16.mxu0 %v6198_v32 }
 0x113   : > { %1437 = vmatprep.subr.bf16.mxu1 %v6200_v33 }
 0x115   : > { %1397 = vmatpush1.bf16.msra.mxu0 %v6208_v34 }
 0x116   : > { %1438 = vmatpush1.bf16.msra.mxu1 %v6210_v35  ;;  %1523 = vmatprep.subr.bf16.mxu0 %v6117_v3 }
 0x117   : > { %1564 = vmatprep.subr.bf16.mxu1 %v6119_v4 }
 0x118   : > { %1415 = vmatmul.mubr.bf16.vlgmr.msra.gmra.mxu0 %v5780_v0 }
 0x119   : > { %1456 = vmatmul.mubr.bf16.vlgmr.msra.gmra.mxu1 %v5780_v0  ;;  %1524 = vmatpush1.bf16.msra.mxu0 %v6122_v6 }
 0x11a   : > { %1565 = vmatpush1.bf16.msra.mxu1 %v6124_v7  ;;  %1525 = vmatprep.subr.bf16.mxu0 %v6126_v8 }
 0x11b   : > { %1566 = vmatprep.subr.bf16.mxu1 %v6128_v9  ;;  %1555 = vmatprep.mubr.bf16.mxu0 %v5780_v0 }
 0x11c   : > { %1596 = vmatprep.mubr.bf16.mxu1 %v5780_v0 }
 0x11d   : > { %1526 = vmatpush1.bf16.msra.mxu0 %v6132_v10 }
 0x11e   : > { %1567 = vmatpush1.bf16.msra.mxu1 %v6134_v11  ;;  %1527 = vmatprep.subr.bf16.mxu0 %v6136_v12 }
 0x11f   : > { %1568 = vmatprep.subr.bf16.mxu1 %v6138_v13 }
 0x121   : > { %1528 = vmatpush1.bf16.msra.mxu0 %v6144_v14 }
 0x122   : > { %1569 = vmatpush1.bf16.msra.mxu1 %v6146_v15  ;;  %1529 = vmatprep.subr.bf16.mxu0 %v6150_v16 }
 0x123   : > { %1570 = vmatprep.subr.bf16.mxu1 %v6152_v17 }
 0x125   : > { %1530 = vmatpush1.bf16.msra.mxu0 %v6158_v18 }
 0x126   : > { %1571 = vmatpush1.bf16.msra.mxu1 %v6160_v19  ;;  %1531 = vmatprep.subr.bf16.mxu0 %v6162_v20 }
 0x127   : > { %1572 = vmatprep.subr.bf16.mxu1 %v6164_v21 }
 0x129   : > { %1532 = vmatpush1.bf16.msra.mxu0 %v6170_v22 }
 0x12a   : > { %1573 = vmatpush1.bf16.msra.mxu1 %v6172_v23  ;;  %1533 = vmatprep.subr.bf16.mxu0 %v6174_v24 }
 0x12b   : > { %1574 = vmatprep.subr.bf16.mxu1 %v6176_v25 }
 0x12d   : > { %1534 = vmatpush1.bf16.msra.mxu0 %v6182_v26 }
 0x12e   : > { %1575 = vmatpush1.bf16.msra.mxu1 %v6184_v27  ;;  %1535 = vmatprep.subr.bf16.mxu0 %v6186_v28 }
 0x12f   : > { %1576 = vmatprep.subr.bf16.mxu1 %v6188_v29 }
 0x131   : > { %1536 = vmatpush1.bf16.msra.mxu0 %v6194_v30 }
 0x132   : > { %1577 = vmatpush1.bf16.msra.mxu1 %v6196_v31  ;;  %1537 = vmatprep.subr.bf16.mxu0 %v6198_v32 }
 0x133   : > { %1578 = vmatprep.subr.bf16.mxu1 %v6200_v33 }
 0x135   : > { %1538 = vmatpush1.bf16.msra.mxu0 %v6208_v34 }
 0x136   : > { %1579 = vmatpush1.bf16.msra.mxu1 %v6210_v35  ;;  %1664 = vmatprep.subr.bf16.mxu0 %v6117_v3 }
 0x137   : > { %1705 = vmatprep.subr.bf16.mxu1 %v6119_v4 }
 0x198   : > { %v869_v37 = vpop.f32.mrf.mxu0 }
 0x199   : > { %v910_v38 = vpop.f32.mrf.mxu1 }
 0x19a   : > { %v871_v39 = vpop.f32.mrf.mxu0 }
 0x19b   : > { %v912_v40 = vpop.f32.mrf.mxu1 }
 0x19c   : > { %v873_v41 = vpop.f32.mrf.mxu0 }
 0x19d   : > { %v914_v42 = vpop.f32.mrf.mxu1 }
 0x19e   : > { %v874_v43 = vpop.f32.mrf.mxu0 }
 0x19f   : > { %v915_v44 = vpop.f32.mrf.mxu1 }
 0x1b8   : > { %v1111_v54 = vpop.f32.mrf.mxu0 }
 0x1b9   : > { %v1152_v55 = vpop.f32.mrf.mxu1  ;;  %v1112_v56 = vadd.f32 %v1111_v54, %v869_v37 }
 0x1ba   : > { %v1153_v57 = vadd.f32 %v1152_v55, %v910_v38  ;;  %v1113_v60 = vpop.f32.mrf.mxu0  ;;  %v5782_v38 = vmov 1966171168  }
 0x1bb   : > { %v1154_v61 = vpop.f32.mrf.mxu1  ;;  %v1181_v62 = vadd.f32 %v1164_v52, %v1112_v56  ;;  %v1114_v1 = vadd.f32 %v1113_v60, %v871_v39  ;;  %v1471_v44 = vunpack.c.l.s4 %v5782_v38 }
 0x1bc   : > { %v1183_v63 = vadd.f32 %v1172_v53, %v1153_v57  ;;  %v1155_v2 = vadd.f32 %v1154_v61, %v912_v40  ;;  %v1115_v5 = vpop.f32.mrf.mxu0 }
 0x1bd   : > { %v1156_v36 = vpop.f32.mrf.mxu1  ;;  %1185 = vst [vmem:[#allocation2] sm:$0xff] %v1181_v62  ;;  %v1182_v41 = vadd.f32 %v1168_v58, %v1114_v1  ;;  %v1472_v45 = vunpack.c.0.s8 %v1471_v44 }
 0x1be   : > { %1187 = vst [vmem:[#allocation2 + $0x10] sm:$0xff] %v1183_v63  ;;  %v1184_v42 = vadd.f32 %v1176_v59, %v1155_v2  ;;  %v1116_v43 = vpop.f32.mrf.mxu0 }
 0x1bf   : > { %v1157_v37 = vpop.f32.mrf.mxu1  ;;  %1186 = vst [vmem:[#allocation2 + $0x8] sm:$0xff] %v1182_v41  ;;  %v6274_v52 = vsub.s32 %v1472_v45, %v6254_v46 }
 0x1c0   : > { %1188 = vst [vmem:[#allocation2 + $0x18] sm:$0xff] %v1184_v42 }
 0x1c7   : > { %v1221_v1 = vld [vmem:[#allocation2] ss:$8 sm:$0xf] }
 0x1d8   : > { %v1416_v49 = vpop.f32.mrf.mxu0 }
 0x1d9   : > { %v1457_v54 = vpop.f32.mrf.mxu1 }
 0x1da   : > { %v1418_v39 = vpop.f32.mrf.mxu0 }
 0x1db   : > { %v1459_v40 = vpop.f32.mrf.mxu1  ;;  %v1468_v53 = vcombine.low %v1416_v49, %v1418_v39 }
 0x1dc   : > { %v1469_v55 = vcombine.low %v1457_v54, %v1459_v40  ;;  %v1420_v56 = vpop.f32.mrf.mxu0 }
 0x1dd   : > { %v1461_v57 = vpop.f32.mrf.mxu1  ;;  %v1476_v58 = vrot.slane %v1468_v53, %v6274_v52 }
 0x1de   : > { %v1483_v59 = vrot.slane %v1469_v55, %v6274_v52  ;;  %v1421_v60 = vpop.f32.mrf.mxu0 }
 0x1df   : > { %v1462_v61 = vpop.f32.mrf.mxu1 }
 0x1e0   : > { %v1484_v62 = vcombine.low %v1476_v58, %v1483_v59 }
 0x1e2   : > { %v1491_v63 = vrot.slane %v1484_v62, %v6274_v52 }
 0x1e4   : > { %v1493_v2 = vadd.f32 %v1491_v63, %v1221_v1 }
 0x1e6   : > { %v1494_v5 = vmul.f32 0.5, %v1493_v2  ;;  %v1499_v36 = vrot.slane %v1493_v2, 1  ;;  %v1505_v42 = vrot.slane %v1493_v2, 2  ;;  %v1508_v43 = vrot.slane %v1493_v2, 3 }
 0x1e8   : > { %5207 = vtanh.f32 %v1494_v5  ;;  %v1501_v41 = vmul.f32 0.5, %v1499_v36  ;;  %v1510_v37 = vmul.f32 0.5, %v1508_v43 }
 0x1ea   : > { %5209 = vtanh.f32 %v1501_v41 }
 0x1eb   : > { %5211 = vtanh.f32 %v1505_v42 }
 0x1ec   : > { %5213 = vtanh.f32 %v1510_v37 }
 0x1f5   : > { %v5208_v38 = vpop.eup %5207 }
 0x1f6   : > { %v1496_v44 = vmul.f32 0.5, %v5208_v38 }
 0x1f7   : > { %v5210_v45 = vpop.eup %5209 }
 0x1f8   : > { %v1497_v49 = vadd.f32 0.5, %v1496_v44  ;;  %v1503_v54 = vmul.f32 0.5, %v5210_v45  ;;  %v5212_v40 = vpop.eup %5211 }
 0x1f9   : > { %v5214_v57 = vpop.eup %5213 }
 0x1fa   : > { %v1504_v39 = vadd.f32 0.5, %v1503_v54  ;;  %v1515_v55 = vmul.f32 %v5212_v40, %v1497_v49  ;;  %v1512_v58 = vmul.f32 0.5, %v5214_v57 }
 0x1fc   : > { %v1514_v53 = vmul.f32 0.0, %v1504_v39  ;;  %v1513_v59 = vadd.f32 0.5, %v1512_v58  ;;  %v1521_v39 = vld [vmem:[#allocation2 + $0x1] ss:$8 sm:$0xf] }
 0x1fe   : > { %v6279_v56 = vadd.f32 %v1515_v55, %v1514_v53 }
 0x200   : > { %5215 = vtanh.f32 %v6279_v56 }
 0x20d   : > { %v5216_v60 = vpop.eup %5215 }
 0x20e   : > { %v1518_v61 = vmul.f32 %v5216_v60, %v1513_v59 }
 0x210   : > { %1519 = vst [vmem:[#allocation3] sm:$0x1] %v1518_v61  ;;  %v1522_v62 = vpack.c.bf16 %v1518_v61, %v1518_v61 }
 0x212   : > { %1556 = vmatmul.mubr.bf16.vlgmr.msra.gmra.mxu0 %v1522_v62  ;;  %1597 = vmatmul.mubr.bf16.vlgmr.msra.gmra.mxu1 %v1522_v62 }
 0x213   : > { %1665 = vmatpush1.bf16.msra.mxu0 %v6122_v6  ;;  %1706 = vmatpush1.bf16.msra.mxu1 %v6124_v7 }
 0x214   : > { %1666 = vmatprep.subr.bf16.mxu0 %v6126_v8  ;;  %1707 = vmatprep.subr.bf16.mxu1 %v6128_v9 }
 0x215   : > { %1696 = vmatprep.mubr.bf16.mxu0 %v5780_v0  ;;  %1737 = vmatprep.mubr.bf16.mxu1 %v5780_v0 }
 0x217   : > { %1667 = vmatpush1.bf16.msra.mxu0 %v6132_v10  ;;  %1708 = vmatpush1.bf16.msra.mxu1 %v6134_v11 }
 0x218   : > { %1668 = vmatprep.subr.bf16.mxu0 %v6136_v12  ;;  %1709 = vmatprep.subr.bf16.mxu1 %v6138_v13 }
 0x21b   : > { %1669 = vmatpush1.bf16.msra.mxu0 %v6144_v14  ;;  %1710 = vmatpush1.bf16.msra.mxu1 %v6146_v15 }
 0x21c   : > { %1670 = vmatprep.subr.bf16.mxu0 %v6150_v16  ;;  %1711 = vmatprep.subr.bf16.mxu1 %v6152_v17 }
 0x21f   : > { %1671 = vmatpush1.bf16.msra.mxu0 %v6158_v18  ;;  %1712 = vmatpush1.bf16.msra.mxu1 %v6160_v19 }
 0x220   : > { %1672 = vmatprep.subr.bf16.mxu0 %v6162_v20  ;;  %1713 = vmatprep.subr.bf16.mxu1 %v6164_v21 }
 0x223   : > { %1673 = vmatpush1.bf16.msra.mxu0 %v6170_v22  ;;  %1714 = vmatpush1.bf16.msra.mxu1 %v6172_v23 }
 0x224   : > { %1674 = vmatprep.subr.bf16.mxu0 %v6174_v24  ;;  %1715 = vmatprep.subr.bf16.mxu1 %v6176_v25 }
 0x227   : > { %1675 = vmatpush1.bf16.msra.mxu0 %v6182_v26  ;;  %1716 = vmatpush1.bf16.msra.mxu1 %v6184_v27 }
 0x228   : > { %1676 = vmatprep.subr.bf16.mxu0 %v6186_v28  ;;  %1717 = vmatprep.subr.bf16.mxu1 %v6188_v29 }
 0x22b   : > { %1677 = vmatpush1.bf16.msra.mxu0 %v6194_v30  ;;  %1718 = vmatpush1.bf16.msra.mxu1 %v6196_v31 }
 0x22c   : > { %1678 = vmatprep.subr.bf16.mxu0 %v6198_v32  ;;  %1719 = vmatprep.subr.bf16.mxu1 %v6200_v33 }
 0x22f   : > { %1679 = vmatpush1.bf16.msra.mxu0 %v6208_v34  ;;  %1720 = vmatpush1.bf16.msra.mxu1 %v6210_v35 }
 0x230   : > { %1805 = vmatprep.subr.bf16.mxu0 %v6117_v3  ;;  %1846 = vmatprep.subr.bf16.mxu1 %v6119_v4 }
 0x2d2   : > { %v1557_v63 = vpop.f32.mrf.mxu0  ;;  %v1598_v1 = vpop.f32.mrf.mxu1 }
 0x2d4   : > { %v1559_v2 = vpop.f32.mrf.mxu0  ;;  %v1600_v5 = vpop.f32.mrf.mxu1 }
 0x2d5   : > { %v1609_v36 = vcombine.low %v1557_v63, %v1559_v2  ;;  %v1610_v41 = vcombine.low %v1598_v1, %v1600_v5 }
 0x2d6   : > { %v1561_v42 = vpop.f32.mrf.mxu0  ;;  %v1602_v43 = vpop.f32.mrf.mxu1 }
 0x2d7   : > { %v1617_v37 = vrot.slane %v1609_v36, %v6274_v52  ;;  %v1624_v38 = vrot.slane %v1610_v41, %v6274_v52 }
 0x2d8   : > { %v1562_v44 = vpop.f32.mrf.mxu0  ;;  %v1603_v45 = vpop.f32.mrf.mxu1 }
 0x2d9   : > { %v1625_v49 = vcombine.low %v1617_v37, %v1624_v38 }
 0x2db   : > { %v1632_v54 = vrot.slane %v1625_v49, %v6274_v52 }
 0x2dd   : > { %v1634_v40 = vadd.f32 %v1632_v54, %v1521_v39 }
 0x2df   : > { %v1635_v53 = vmul.f32 0.5, %v1634_v40  ;;  %v1640_v55 = vrot.slane %v1634_v40, 1  ;;  %v1646_v58 = vrot.slane %v1634_v40, 2  ;;  %v1649_v59 = vrot.slane %v1634_v40, 3 }
 0x2e1   : > { %5217 = vtanh.f32 %v1635_v53  ;;  %v1642_v57 = vmul.f32 0.5, %v1640_v55  ;;  %v1651_v60 = vmul.f32 0.5, %v1649_v59 }
 0x2e3   : > { %5219 = vtanh.f32 %v1642_v57 }
 0x2e4   : > { %5221 = vtanh.f32 %v1646_v58 }
 0x2e5   : > { %5223 = vtanh.f32 %v1651_v60 }
 0x2ee   : > { %v5218_v61 = vpop.eup %5217 }
 0x2ef   : > { %v1637_v62 = vmul.f32 0.5, %v5218_v61 }
 0x2f0   : > { %v5220_v63 = vpop.eup %5219 }
 0x2f1   : > { %v1638_v1 = vadd.f32 0.5, %v1637_v62  ;;  %v1644_v2 = vmul.f32 0.5, %v5220_v63  ;;  %v5222_v36 = vpop.eup %5221 }
 0x2f2   : > { %v5224_v37 = vpop.eup %5223 }
 0x2f3   : > { %v1645_v5 = vadd.f32 0.5, %v1644_v2  ;;  %v1656_v42 = vmul.f32 %v5222_v36, %v1638_v1  ;;  %v1653_v38 = vmul.f32 0.5, %v5224_v37 }
 0x2f5   : > { %v1655_v41 = vmul.f32 %v1645_v5, %v6279_v56  ;;  %v1654_v44 = vadd.f32 0.5, %v1653_v38  ;;  %v1662_v5 = vld [vmem:[#allocation2 + $0x2] ss:$8 sm:$0xf] }
 0x2f7   : > { %v6320_v43 = vadd.f32 %v1656_v42, %v1655_v41 }
 0x2f9   : > { %5225 = vtanh.f32 %v6320_v43 }
 0x306   : > { %v5226_v45 = vpop.eup %5225 }
 0x307   : > { %v1659_v49 = vmul.f32 %v5226_v45, %v1654_v44 }
 0x309   : > { %1660 = vst [vmem:[#allocation3 + $0x1] sm:$0x1] %v1659_v49  ;;  %v1663_v54 = vpack.c.bf16 %v1659_v49, %v1659_v49 }
 0x30b   : > { %1697 = vmatmul.mubr.bf16.vlgmr.msra.gmra.mxu0 %v1663_v54  ;;  %1738 = vmatmul.mubr.bf16.vlgmr.msra.gmra.mxu1 %v1663_v54 }
 0x30c   : > { %1806 = vmatpush1.bf16.msra.mxu0 %v6122_v6  ;;  %1847 = vmatpush1.bf16.msra.mxu1 %v6124_v7 }
 0x30d   : > { %1807 = vmatprep.subr.bf16.mxu0 %v6126_v8  ;;  %1848 = vmatprep.subr.bf16.mxu1 %v6128_v9 }
 0x30e   : > { %1837 = vmatprep.mubr.bf16.mxu0 %v5780_v0  ;;  %1878 = vmatprep.mubr.bf16.mxu1 %v5780_v0 }
 0x310   : > { %1808 = vmatpush1.bf16.msra.mxu0 %v6132_v10  ;;  %1849 = vmatpush1.bf16.msra.mxu1 %v6134_v11 }
 0x311   : > { %1809 = vmatprep.subr.bf16.mxu0 %v6136_v12  ;;  %1850 = vmatprep.subr.bf16.mxu1 %v6138_v13 }
 0x314   : > { %1810 = vmatpush1.bf16.msra.mxu0 %v6144_v14  ;;  %1851 = vmatpush1.bf16.msra.mxu1 %v6146_v15 }
 0x315   : > { %1811 = vmatprep.subr.bf16.mxu0 %v6150_v16  ;;  %1852 = vmatprep.subr.bf16.mxu1 %v6152_v17 }
 0x318   : > { %1812 = vmatpush1.bf16.msra.mxu0 %v6158_v18  ;;  %1853 = vmatpush1.bf16.msra.mxu1 %v6160_v19 }
 0x319   : > { %1813 = vmatprep.subr.bf16.mxu0 %v6162_v20  ;;  %1854 = vmatprep.subr.bf16.mxu1 %v6164_v21 }
 0x31c   : > { %1814 = vmatpush1.bf16.msra.mxu0 %v6170_v22  ;;  %1855 = vmatpush1.bf16.msra.mxu1 %v6172_v23 }
 0x31d   : > { %1815 = vmatprep.subr.bf16.mxu0 %v6174_v24  ;;  %1856 = vmatprep.subr.bf16.mxu1 %v6176_v25 }
 0x320   : > { %1816 = vmatpush1.bf16.msra.mxu0 %v6182_v26  ;;  %1857 = vmatpush1.bf16.msra.mxu1 %v6184_v27 }
 0x321   : > { %1817 = vmatprep.subr.bf16.mxu0 %v6186_v28  ;;  %1858 = vmatprep.subr.bf16.mxu1 %v6188_v29 }
 0x324   : > { %1818 = vmatpush1.bf16.msra.mxu0 %v6194_v30  ;;  %1859 = vmatpush1.bf16.msra.mxu1 %v6196_v31 }
 0x325   : > { %1819 = vmatprep.subr.bf16.mxu0 %v6198_v32  ;;  %1860 = vmatprep.subr.bf16.mxu1 %v6200_v33 }
 0x328   : > { %1820 = vmatpush1.bf16.msra.mxu0 %v6208_v34  ;;  %1861 = vmatpush1.bf16.msra.mxu1 %v6210_v35 }
 0x329   : > { %1946 = vmatprep.subr.bf16.mxu0 %v6117_v3  ;;  %1987 = vmatprep.subr.bf16.mxu1 %v6119_v4 }
 0x3cb   : > { %v1698_v56 = vpop.f32.mrf.mxu0  ;;  %v1739_v39 = vpop.f32.mrf.mxu1 }
 0x3cd   : > { %v1700_v40 = vpop.f32.mrf.mxu0  ;;  %v1741_v53 = vpop.f32.mrf.mxu1 }
 0x3ce   : > { %v1750_v55 = vcombine.low %v1698_v56, %v1700_v40  ;;  %v1751_v57 = vcombine.low %v1739_v39, %v1741_v53 }
 0x3cf   : > { %v1702_v58 = vpop.f32.mrf.mxu0  ;;  %v1743_v59 = vpop.f32.mrf.mxu1 }
 0x3d0   : > { %v1758_v60 = vrot.slane %v1750_v55, %v6274_v52  ;;  %v1765_v61 = vrot.slane %v1751_v57, %v6274_v52 }
 0x3d1   : > { %v1703_v62 = vpop.f32.mrf.mxu0  ;;  %v1744_v63 = vpop.f32.mrf.mxu1 }
 0x3d2   : > { %v1766_v1 = vcombine.low %v1758_v60, %v1765_v61 }
 0x3d4   : > { %v1773_v2 = vrot.slane %v1766_v1, %v6274_v52 }
 0x3d6   : > { %v1775_v36 = vadd.f32 %v1773_v2, %v1662_v5 }
 0x3d8   : > { %v1776_v41 = vmul.f32 0.5, %v1775_v36  ;;  %v1781_v42 = vrot.slane %v1775_v36, 1  ;;  %v1787_v38 = vrot.slane %v1775_v36, 2  ;;  %v1790_v44 = vrot.slane %v1775_v36, 3 }
 0x3da   : > { %5227 = vtanh.f32 %v1776_v41  ;;  %v1783_v37 = vmul.f32 0.5, %v1781_v42  ;;  %v1792_v45 = vmul.f32 0.5, %v1790_v44 }
 0x3dc   : > { %5229 = vtanh.f32 %v1783_v37 }
 0x3dd   : > { %5231 = vtanh.f32 %v1787_v38 }
 0x3de   : > { %5233 = vtanh.f32 %v1792_v45 }
 0x3e7   : > { %v5228_v49 = vpop.eup %5227 }
 0x3e8   : > { %v1778_v54 = vmul.f32 0.5, %v5228_v49 }
 0x3e9   : > { %v5230_v56 = vpop.eup %5229 }
 0x3ea   : > { %v1779_v39 = vadd.f32 0.5, %v1778_v54  ;;  %v1785_v40 = vmul.f32 0.5, %v5230_v56  ;;  %v5232_v55 = vpop.eup %5231 }
 0x3eb   : > { %v5234_v60 = vpop.eup %5233 }
 0x3ec   : > { %v1786_v53 = vadd.f32 0.5, %v1785_v40  ;;  %v1797_v58 = vmul.f32 %v5232_v55, %v1779_v39  ;;  %v1794_v61 = vmul.f32 0.5, %v5234_v60 }
 0x3ee   : > { %v1796_v57 = vmul.f32 %v1786_v53, %v6320_v43  ;;  %v1795_v62 = vadd.f32 0.5, %v1794_v61 }
 0x3f0   : > { %v6361_v59 = vadd.f32 %v1797_v58, %v1796_v57 }
 0x3f2   : > { %5235 = vtanh.f32 %v6361_v59 }
 0x3ff   : > { %v5236_v63 = vpop.eup %5235 }
 0x400   : > { %v1800_v1 = vmul.f32 %v5236_v63, %v1795_v62 }
 0x402   : > { %1801 = vst [vmem:[#allocation3 + $0x2] sm:$0x1] %v1800_v1  ;;  %v1804_v2 = vpack.c.bf16 %v1800_v1, %v1800_v1 }
 0x404   : > { %1838 = vmatmul.mubr.bf16.vlgmr.msra.gmra.mxu0 %v1804_v2  ;;  %1879 = vmatmul.mubr.bf16.vlgmr.msra.gmra.mxu1 %v1804_v2 }
 0x405   : > { %1947 = vmatpush1.bf16.msra.mxu0 %v6122_v6  ;;  %1988 = vmatpush1.bf16.msra.mxu1 %v6124_v7 }
 0x406   : > { %1948 = vmatprep.subr.bf16.mxu0 %v6126_v8  ;;  %1989 = vmatprep.subr.bf16.mxu1 %v6128_v9 }
 0x407   : > { %1978 = vmatprep.mubr.bf16.mxu0 %v5780_v0  ;;  %2019 = vmatprep.mubr.bf16.mxu1 %v5780_v0 }
 0x409   : > { %1949 = vmatpush1.bf16.msra.mxu0 %v6132_v10  ;;  %1990 = vmatpush1.bf16.msra.mxu1 %v6134_v11 }
 0x40a   : > { %1950 = vmatprep.subr.bf16.mxu0 %v6136_v12  ;;  %1991 = vmatprep.subr.bf16.mxu1 %v6138_v13 }
 0x40d   : > { %1951 = vmatpush1.bf16.msra.mxu0 %v6144_v14  ;;  %1992 = vmatpush1.bf16.msra.mxu1 %v6146_v15 }
 0x40e   : > { %1952 = vmatprep.subr.bf16.mxu0 %v6150_v16  ;;  %1993 = vmatprep.subr.bf16.mxu1 %v6152_v17 }
 0x411   : > { %1953 = vmatpush1.bf16.msra.mxu0 %v6158_v18  ;;  %1994 = vmatpush1.bf16.msra.mxu1 %v6160_v19 }
 0x412   : > { %1954 = vmatprep.subr.bf16.mxu0 %v6162_v20  ;;  %1995 = vmatprep.subr.bf16.mxu1 %v6164_v21 }
 0x415   : > { %1955 = vmatpush1.bf16.msra.mxu0 %v6170_v22  ;;  %1996 = vmatpush1.bf16.msra.mxu1 %v6172_v23 }
 0x416   : > { %1956 = vmatprep.subr.bf16.mxu0 %v6174_v24  ;;  %1997 = vmatprep.subr.bf16.mxu1 %v6176_v25 }
 0x419   : > { %1957 = vmatpush1.bf16.msra.mxu0 %v6182_v26  ;;  %1998 = vmatpush1.bf16.msra.mxu1 %v6184_v27 }
 0x41a   : > { %1958 = vmatprep.subr.bf16.mxu0 %v6186_v28  ;;  %1999 = vmatprep.subr.bf16.mxu1 %v6188_v29 }
 0x41d   : > { %1959 = vmatpush1.bf16.msra.mxu0 %v6194_v30  ;;  %2000 = vmatpush1.bf16.msra.mxu1 %v6196_v31 }
 0x41e   : > { %1960 = vmatprep.subr.bf16.mxu0 %v6198_v32  ;;  %2001 = vmatprep.subr.bf16.mxu1 %v6200_v33 }
 0x421   : > { %1961 = vmatpush1.bf16.msra.mxu0 %v6208_v34  ;;  %2002 = vmatpush1.bf16.msra.mxu1 %v6210_v35 }
 0x422   : > { %2087 = vmatprep.subr.bf16.mxu0 %v6117_v3  ;;  %2128 = vmatprep.subr.bf16.mxu1 %v6119_v4  ;;  %v1803_v3 = vld [vmem:[#allocation2 + $0x3] ss:$8 sm:$0xf] }
 0x4c4   : > { %v1839_v6 = vpop.f32.mrf.mxu0  ;;  %v1880_v7 = vpop.f32.mrf.mxu1 }
 0x4c6   : > { %v1841_v8 = vpop.f32.mrf.mxu0  ;;  %v1882_v9 = vpop.f32.mrf.mxu1 }
 0x4c7   : > { %v1891_v10 = vcombine.low %v1839_v6, %v1841_v8  ;;  %v1892_v11 = vcombine.low %v1880_v7, %v1882_v9 }
 0x4c8   : > { %v1843_v12 = vpop.f32.mrf.mxu0  ;;  %v1884_v13 = vpop.f32.mrf.mxu1 }
 0x4c9   : > { %v1899_v43 = vrot.slane %v1891_v10, %v6274_v52  ;;  %v1906_v5 = vrot.slane %v1892_v11, %v6274_v52  ;;  %v6405_v10 = vld [vmem:[#allocation13 + $0xe0] ss:$16 sps:$4 sm:$0xff]   ;;  %v6408_v11 = vld [vmem:[#allocation13 + $0xe8] ss:$16 sps:$4 sm:$0xff]   ;;  %v6414_v12 = vld [vmem:[#allocation13 + $0xcc] ss:$16 sps:$4 sm:$0xff]  }
 0x4ca   : > { %v1844_v36 = vpop.f32.mrf.mxu0  ;;  %v1885_v41 = vpop.f32.mrf.mxu1  ;;  %v6419_v13 = vld [vmem:[#allocation13 + $0xc0] ss:$16 sps:$4 sm:$0xff]  }
 0x4cb   : > { %v1907_v42 = vcombine.low %v1899_v43, %v1906_v5  ;;  %v6422_v43 = vld [vmem:[#allocation13 + $0xc8] ss:$16 sps:$4 sm:$0xff]   ;;  %v6425_v5 = vld [vmem:[#allocation13 + $0xa4] ss:$16 sps:$4 sm:$0xff]   ;;  %v6428_v36 = vld [vmem:[#allocation13 + $0xac] ss:$16 sps:$4 sm:$0xff]  }
 0x4cd   : > { %v1914_v37 = vrot.slane %v1907_v42, %v6274_v52 }
 0x4cf   : > { %v1916_v38 = vadd.f32 %v1914_v37, %v1803_v3 }
 0x4d1   : > { %v1917_v4 = vmul.f32 0.5, %v1916_v38  ;;  %v1922_v44 = vrot.slane %v1916_v38, 1  ;;  %v1928_v49 = vrot.slane %v1916_v38, 2  ;;  %v1931_v54 = vrot.slane %v1916_v38, 3 }
 0x4d3   : > { %5237 = vtanh.f32 %v1917_v4  ;;  %v1924_v45 = vmul.f32 0.5, %v1922_v44  ;;  %v1933_v56 = vmul.f32 0.5, %v1931_v54 }
 0x4d5   : > { %5239 = vtanh.f32 %v1924_v45 }
 0x4d6   : > { %5241 = vtanh.f32 %v1928_v49 }
 0x4d7   : > { %5243 = vtanh.f32 %v1933_v56 }
 0x4e0   : > { %v5238_v39 = vpop.eup %5237 }
 0x4e1   : > { %v1919_v40 = vmul.f32 0.5, %v5238_v39 }
 0x4e2   : > { %v5240_v53 = vpop.eup %5239 }
 0x4e3   : > { %v1920_v55 = vadd.f32 0.5, %v1919_v40  ;;  %v1926_v57 = vmul.f32 0.5, %v5240_v53  ;;  %v5242_v60 = vpop.eup %5241 }
 0x4e4   : > { %v5244_v1 = vpop.eup %5243 }
 0x4e5   : > { %v1927_v58 = vadd.f32 0.5, %v1926_v57  ;;  %v1938_v62 = vmul.f32 %v5242_v60, %v1920_v55  ;;  %v1935_v2 = vmul.f32 0.5, %v5244_v1  ;;  %v6479_v1 = vld [vmem:[#allocation13 + $0xa8] ss:$16 sps:$4 sm:$0xff]  }
 0x4e7   : > { %v1937_v61 = vmul.f32 %v1927_v58, %v6361_v59  ;;  %v1936_v6 = vadd.f32 0.5, %v1935_v2  ;;  %v6411_v59 = vld [vmem:[#allocation13 + $0xc4] ss:$16 sps:$4 sm:$0xff]  }
 0x4e8   : > { %v6482_v2 = vld [vmem:[#allocation13 + $0x84] ss:$16 sps:$4 sm:$0xff]  }
 0x4e9   : > { %v6402_v63 = vadd.f32 %v1938_v62, %v1937_v61 }
 0x4eb   : > { %5245 = vtanh.f32 %v6402_v63 }
 0x4f8   : > { %v5246_v7 = vpop.eup %5245 }
 0x4f9   : > { %v1941_v8 = vmul.f32 %v5246_v7, %v1936_v6  ;;  %v6485_v6 = vld [vmem:[#allocation13 + $0x8c] ss:$16 sps:$4 sm:$0xff]   ;;  %v6488_v7 = vld [vmem:[#allocation13 + $0x80] ss:$16 sps:$4 sm:$0xff]  }
 0x4fb   : > { %1942 = vst [vmem:[#allocation3 + $0x3] sm:$0x1] %v1941_v8  ;;  %v1945_v9 = vpack.c.bf16 %v1941_v8, %v1941_v8  ;;  %v6491_v8 = vld [vmem:[#allocation13 + $0x88] ss:$16 sps:$4 sm:$0xff]  }
 0x4fd   : > { %1979 = vmatmul.mubr.bf16.vlgmr.msra.gmra.mxu0 %v1945_v9  ;;  %2020 = vmatmul.mubr.bf16.vlgmr.msra.gmra.mxu1 %v1945_v9  ;;  %v6494_v9 = vld [vmem:[#allocation13 + $0x64] ss:$16 sps:$4 sm:$0xff]  }
 0x4fe   : > { %2088 = vmatpush1.bf16.msra.mxu0 %v6405_v10  ;;  %2129 = vmatpush1.bf16.msra.mxu1 %v6408_v11 }
 0x4ff   : > { %2089 = vmatprep.subr.bf16.mxu0 %v6411_v59  ;;  %2130 = vmatprep.subr.bf16.mxu1 %v6414_v12 }
 0x500   : > { %2119 = vmatprep.mubr.bf16.mxu0 %v5780_v0  ;;  %2160 = vmatprep.mubr.bf16.mxu1 %v5780_v0 }
 0x502   : > { %2090 = vmatpush1.bf16.msra.mxu0 %v6419_v13  ;;  %2131 = vmatpush1.bf16.msra.mxu1 %v6422_v43 }
 0x503   : > { %2091 = vmatprep.subr.bf16.mxu0 %v6425_v5  ;;  %2132 = vmatprep.subr.bf16.mxu1 %v6428_v36 }
 0x506   : > { %2092 = vmatpush1.bf16.msra.mxu0 %v6144_v14  ;;  %2133 = vmatpush1.bf16.msra.mxu1 %v6146_v15  ;;  %v6453_v14 = vld [vmem:[#allocation13 + $0xe4] ss:$16 sps:$4 sm:$0xff]   ;;  %v6456_v15 = vld [vmem:[#allocation13 + $0xec] ss:$16 sps:$4 sm:$0xff]  }
 0x507   : > { %2093 = vmatprep.subr.bf16.mxu0 %v6150_v16  ;;  %2134 = vmatprep.subr.bf16.mxu1 %v6152_v17 }
 0x50a   : > { %2094 = vmatpush1.bf16.msra.mxu0 %v6158_v18  ;;  %2135 = vmatpush1.bf16.msra.mxu1 %v6160_v19 }
 0x50b   : > { %2095 = vmatprep.subr.bf16.mxu0 %v6162_v20  ;;  %2136 = vmatprep.subr.bf16.mxu1 %v6164_v21 }
 0x50e   : > { %2096 = vmatpush1.bf16.msra.mxu0 %v6170_v22  ;;  %2137 = vmatpush1.bf16.msra.mxu1 %v6172_v23 }
 0x50f   : > { %2097 = vmatprep.subr.bf16.mxu0 %v6174_v24  ;;  %2138 = vmatprep.subr.bf16.mxu1 %v6176_v25 }
 0x512   : > { %2098 = vmatpush1.bf16.msra.mxu0 %v6182_v26  ;;  %2139 = vmatpush1.bf16.msra.mxu1 %v6184_v27 }
 0x513   : > { %2099 = vmatprep.subr.bf16.mxu0 %v6186_v28  ;;  %2140 = vmatprep.subr.bf16.mxu1 %v6188_v29 }
 0x516   : > { %2100 = vmatpush1.bf16.msra.mxu0 %v6194_v30  ;;  %2141 = vmatpush1.bf16.msra.mxu1 %v6196_v31  ;;  %v1944_v30 = vld [vmem:[#allocation2 + $0x4] ss:$8 sm:$0xf] }
 0x517   : > { %2101 = vmatprep.subr.bf16.mxu0 %v6198_v32  ;;  %2142 = vmatprep.subr.bf16.mxu1 %v6200_v33 }
 0x51a   : > { %2102 = vmatpush1.bf16.msra.mxu0 %v6208_v34  ;;  %2143 = vmatpush1.bf16.msra.mxu1 %v6210_v35 }
 0x51b   : > { %2228 = vmatprep.subr.bf16.mxu0 %v6453_v14  ;;  %2269 = vmatprep.subr.bf16.mxu1 %v6456_v15 }
 0x5bd   : > { %v1980_v16 = vpop.f32.mrf.mxu0  ;;  %v2021_v17 = vpop.f32.mrf.mxu1 }
 0x5bf   : > { %v1982_v18 = vpop.f32.mrf.mxu0  ;;  %v2023_v19 = vpop.f32.mrf.mxu1 }
 0x5c0   : > { %v2032_v20 = vcombine.low %v1980_v16, %v1982_v18  ;;  %v2033_v21 = vcombine.low %v2021_v17, %v2023_v19  ;;  %v6497_v16 = vld [vmem:[#allocation13 + $0x6c] ss:$16 sps:$4 sm:$0xff]   ;;  %v6500_v17 = vld [vmem:[#allocation13 + $0x60] ss:$16 sps:$4 sm:$0xff]   ;;  %v6503_v18 = vld [vmem:[#allocation13 + $0x68] ss:$16 sps:$4 sm:$0xff]  }
 0x5c1   : > { %v1984_v22 = vpop.f32.mrf.mxu0  ;;  %v2025_v23 = vpop.f32.mrf.mxu1  ;;  %v6506_v19 = vld [vmem:[#allocation13 + $0x44] ss:$16 sps:$4 sm:$0xff]  }
 0x5c2   : > { %v2040_v24 = vrot.slane %v2032_v20, %v6274_v52  ;;  %v2047_v25 = vrot.slane %v2033_v21, %v6274_v52  ;;  %v6509_v20 = vld [vmem:[#allocation13 + $0x4c] ss:$16 sps:$4 sm:$0xff]   ;;  %v6512_v21 = vld [vmem:[#allocation13 + $0x40] ss:$16 sps:$4 sm:$0xff]   ;;  %v6515_v22 = vld [vmem:[#allocation13 + $0x48] ss:$16 sps:$4 sm:$0xff]  }
 0x5c3   : > { %v1985_v26 = vpop.f32.mrf.mxu0  ;;  %v2026_v27 = vpop.f32.mrf.mxu1  ;;  %v6518_v23 = vld [vmem:[#allocation13 + $0x24] ss:$16 sps:$4 sm:$0xff]  }
 0x5c4   : > { %v2048_v28 = vcombine.low %v2040_v24, %v2047_v25  ;;  %v6521_v24 = vld [vmem:[#allocation13 + $0x2c] ss:$16 sps:$4 sm:$0xff]   ;;  %v6524_v25 = vld [vmem:[#allocation13 + $0x20] ss:$16 sps:$4 sm:$0xff]   ;;  %v6527_v26 = vld [vmem:[#allocation13 + $0x28] ss:$16 sps:$4 sm:$0xff]  }
 0x5c5   : > { %v6530_v27 = vld [vmem:[#allocation13 + $0x4] ss:$16 sps:$4 sm:$0xff]  }
 0x5c6   : > { %v2055_v29 = vrot.slane %v2048_v28, %v6274_v52  ;;  %v6533_v28 = vld [vmem:[#allocation13 + $0xc] ss:$16 sps:$4 sm:$0xff]  }
 0x5c8   : > { %v2057_v31 = vadd.f32 %v2055_v29, %v1944_v30 }
 0x5ca   : > { %v2058_v32 = vmul.f32 0.5, %v2057_v31  ;;  %v2063_v33 = vrot.slane %v2057_v31, 1  ;;  %v2069_v42 = vrot.slane %v2057_v31, 2  ;;  %v2072_v37 = vrot.slane %v2057_v31, 3 }
 0x5cc   : > { %5247 = vtanh.f32 %v2058_v32  ;;  %v2065_v41 = vmul.f32 0.5, %v2063_v33  ;;  %v2074_v3 = vmul.f32 0.5, %v2072_v37 }
 0x5ce   : > { %5249 = vtanh.f32 %v2065_v41 }
 0x5cf   : > { %5251 = vtanh.f32 %v2069_v42 }
 0x5d0   : > { %5253 = vtanh.f32 %v2074_v3 }
 0x5d9   : > { %v5248_v38 = vpop.eup %5247 }
 0x5da   : > { %v2060_v4 = vmul.f32 0.5, %v5248_v38 }
 0x5db   : > { %v5250_v44 = vpop.eup %5249 }
 0x5dc   : > { %v2061_v45 = vadd.f32 0.5, %v2060_v4  ;;  %v2067_v49 = vmul.f32 0.5, %v5250_v44  ;;  %v5252_v56 = vpop.eup %5251 }
 0x5dd   : > { %v5254_v55 = vpop.eup %5253 }
 0x5de   : > { %v2068_v54 = vadd.f32 0.5, %v2067_v49  ;;  %v2079_v40 = vmul.f32 %v5252_v56, %v2061_v45  ;;  %v2076_v57 = vmul.f32 0.5, %v5254_v55 }
 0x5e0   : > { %v2078_v39 = vmul.f32 %v2068_v54, %v6402_v63  ;;  %v2077_v58 = vadd.f32 0.5, %v2076_v57  ;;  %v6476_v63 = vld [vmem:[#allocation13 + $0xa0] ss:$16 sps:$4 sm:$0xff]  }
 0x5e2   : > { %v6463_v53 = vadd.f32 %v2079_v40, %v2078_v39 }
 0x5e4   : > { %5255 = vtanh.f32 %v6463_v53 }
 0x5f1   : > { %v5256_v60 = vpop.eup %5255 }
 0x5f2   : > { %v2082_v61 = vmul.f32 %v5256_v60, %v2077_v58 }
 0x5f4   : > { %2083 = vst [vmem:[#allocation3 + $0x4] sm:$0x1] %v2082_v61  ;;  %v2086_v62 = vpack.c.bf16 %v2082_v61, %v2082_v61 }
 0x5f6   : > { %2120 = vmatmul.mubr.bf16.vlgmr.msra.gmra.mxu0 %v2086_v62  ;;  %2161 = vmatmul.mubr.bf16.vlgmr.msra.gmra.mxu1 %v2086_v62 }
 0x5f7   : > { %2229 = vmatpush1.bf16.msra.mxu0 %v6405_v10  ;;  %2270 = vmatpush1.bf16.msra.mxu1 %v6408_v11 }
 0x5f8   : > { %2230 = vmatprep.subr.bf16.mxu0 %v6411_v59  ;;  %2271 = vmatprep.subr.bf16.mxu1 %v6414_v12 }
 0x5f9   : > { %2260 = vmatprep.mubr.bf16.mxu0 %v5780_v0  ;;  %2301 = vmatprep.mubr.bf16.mxu1 %v5780_v0 }
 0x5fb   : > { %2231 = vmatpush1.bf16.msra.mxu0 %v6419_v13  ;;  %2272 = vmatpush1.bf16.msra.mxu1 %v6422_v43 }
 0x5fc   : > { %2232 = vmatprep.subr.bf16.mxu0 %v6425_v5  ;;  %2273 = vmatprep.subr.bf16.mxu1 %v6428_v36 }
 0x5ff   : > { %2233 = vmatpush1.bf16.msra.mxu0 %v6476_v63  ;;  %2274 = vmatpush1.bf16.msra.mxu1 %v6479_v1 }
 0x600   : > { %2234 = vmatprep.subr.bf16.mxu0 %v6482_v2  ;;  %2275 = vmatprep.subr.bf16.mxu1 %v6485_v6 }
 0x603   : > { %2235 = vmatpush1.bf16.msra.mxu0 %v6488_v7  ;;  %2276 = vmatpush1.bf16.msra.mxu1 %v6491_v8 }
 0x604   : > { %2236 = vmatprep.subr.bf16.mxu0 %v6494_v9  ;;  %2277 = vmatprep.subr.bf16.mxu1 %v6497_v16 }
 0x607   : > { %2237 = vmatpush1.bf16.msra.mxu0 %v6500_v17  ;;  %2278 = vmatpush1.bf16.msra.mxu1 %v6503_v18 }
 0x608   : > { %2238 = vmatprep.subr.bf16.mxu0 %v6506_v19  ;;  %2279 = vmatprep.subr.bf16.mxu1 %v6509_v20 }
 0x60b   : > { %2239 = vmatpush1.bf16.msra.mxu0 %v6512_v21  ;;  %2280 = vmatpush1.bf16.msra.mxu1 %v6515_v22 }
 0x60c   : > { %2240 = vmatprep.subr.bf16.mxu0 %v6518_v23  ;;  %2281 = vmatprep.subr.bf16.mxu1 %v6521_v24 }
 0x60f   : > { %2241 = vmatpush1.bf16.msra.mxu0 %v6524_v25  ;;  %2282 = vmatpush1.bf16.msra.mxu1 %v6527_v26 }
 0x610   : > { %2242 = vmatprep.subr.bf16.mxu0 %v6530_v27  ;;  %2283 = vmatprep.subr.bf16.mxu1 %v6533_v28 }
 0x613   : > { %2243 = vmatpush1.bf16.msra.mxu0 %v6208_v34  ;;  %2284 = vmatpush1.bf16.msra.mxu1 %v6210_v35 }
 0x614   : > { %2369 = vmatprep.subr.bf16.mxu0 %v6453_v14  ;;  %2410 = vmatprep.subr.bf16.mxu1 %v6456_v15  ;;  %v2085_v14 = vld [vmem:[#allocation2 + $0x5] ss:$8 sm:$0xf] }
 0x6b6   : > { %v2121_v29 = vpop.f32.mrf.mxu0  ;;  %v2162_v30 = vpop.f32.mrf.mxu1 }
 0x6b8   : > { %v2123_v31 = vpop.f32.mrf.mxu0  ;;  %v2164_v32 = vpop.f32.mrf.mxu1 }
 0x6b9   : > { %v2173_v33 = vcombine.low %v2121_v29, %v2123_v31  ;;  %v2174_v41 = vcombine.low %v2162_v30, %v2164_v32 }
 0x6ba   : > { %v2125_v42 = vpop.f32.mrf.mxu0  ;;  %v2166_v37 = vpop.f32.mrf.mxu1 }
 0x6bb   : > { %v2181_v3 = vrot.slane %v2173_v33, %v6274_v52  ;;  %v2188_v38 = vrot.slane %v2174_v41, %v6274_v52 }
 0x6bc   : > { %v2126_v4 = vpop.f32.mrf.mxu0  ;;  %v2167_v34 = vpop.f32.mrf.mxu1 }
 0x6bd   : > { %v2189_v44 = vcombine.low %v2181_v3, %v2188_v38 }
 0x6bf   : > { %v2196_v35 = vrot.slane %v2189_v44, %v6274_v52 }
 0x6c1   : > { %v2198_v45 = vadd.f32 %v2196_v35, %v2085_v14 }
 0x6c3   : > { %v2199_v15 = vmul.f32 0.5, %v2198_v45  ;;  %v2204_v49 = vrot.slane %v2198_v45, 1  ;;  %v2210_v56 = vrot.slane %v2198_v45, 2  ;;  %v2213_v39 = vrot.slane %v2198_v45, 3 }
 0x6c5   : > { %5257 = vtanh.f32 %v2199_v15  ;;  %v2206_v54 = vmul.f32 0.5, %v2204_v49  ;;  %v2215_v40 = vmul.f32 0.5, %v2213_v39 }
 0x6c7   : > { %5259 = vtanh.f32 %v2206_v54 }
 0x6c8   : > { %5261 = vtanh.f32 %v2210_v56 }
 0x6c9   : > { %5263 = vtanh.f32 %v2215_v40  ;;  %v5089_v40 = vld [vmem:[#allocation14 + $0xe4] ss:$16 sps:$4 sm:$0xff]  }
 0x6d2   : > { %v5258_v55 = vpop.eup %5257 }
 0x6d3   : > { %v2201_v57 = vmul.f32 0.5, %v5258_v55  ;;  %v5092_v55 = vld [vmem:[#allocation14 + $0xec] ss:$16 sps:$4 sm:$0xff]  }
 0x6d4   : > { %v5260_v58 = vpop.eup %5259 }
 0x6d5   : > { %v2202_v60 = vadd.f32 0.5, %v2201_v57  ;;  %v2208_v61 = vmul.f32 0.5, %v5260_v58  ;;  %v5262_v29 = vpop.eup %5261  ;;  %v5087_v57 = vld [vmem:[#allocation14 + $0xe0] ss:$16 sps:$4 sm:$0xff]   ;;  %v5090_v58 = vld [vmem:[#allocation14 + $0xe8] ss:$16 sps:$4 sm:$0xff]  }
 0x6d6   : > { %v5264_v33 = vpop.eup %5263 }
 0x6d7   : > { %v2209_v62 = vadd.f32 0.5, %v2208_v61  ;;  %v2220_v31 = vmul.f32 %v5262_v29, %v2202_v60  ;;  %v2217_v41 = vmul.f32 0.5, %v5264_v33  ;;  %v5095_v60 = vld [vmem:[#allocation14 + $0xc4] ss:$16 sps:$4 sm:$0xff]   ;;  %v5098_v61 = vld [vmem:[#allocation14 + $0xcc] ss:$16 sps:$4 sm:$0xff]  }
 0x6d8   : > { %v5096_v29 = vld [vmem:[#allocation14 + $0xc8] ss:$16 sps:$4 sm:$0xff]  }
 0x6d9   : > { %v2219_v30 = vmul.f32 %v2209_v62, %v6463_v53  ;;  %v2218_v42 = vadd.f32 0.5, %v2217_v41  ;;  %v5093_v62 = vld [vmem:[#allocation14 + $0xc0] ss:$16 sps:$4 sm:$0xff]   ;;  %v5102_v33 = vld [vmem:[#allocation14 + $0xa8] ss:$16 sps:$4 sm:$0xff]  }
 0x6da   : > { %v5107_v41 = vld [vmem:[#allocation14 + $0x84] ss:$16 sps:$4 sm:$0xff]  }
 0x6db   : > { %v6544_v32 = vadd.f32 %v2220_v31, %v2219_v30  ;;  %v5101_v30 = vld [vmem:[#allocation14 + $0xa4] ss:$16 sps:$4 sm:$0xff]   ;;  %v5104_v31 = vld [vmem:[#allocation14 + $0xac] ss:$16 sps:$4 sm:$0xff]  }
 0x6dd   : > { %5265 = vtanh.f32 %v6544_v32 }
 0x6ea   : > { %v5266_v37 = vpop.eup %5265 }
 0x6eb   : > { %v2223_v3 = vmul.f32 %v5266_v37, %v2218_v42  ;;  %v5110_v42 = vld [vmem:[#allocation14 + $0x8c] ss:$16 sps:$4 sm:$0xff]   ;;  %v5105_v37 = vld [vmem:[#allocation14 + $0x80] ss:$16 sps:$4 sm:$0xff]  }
 0x6ed   : > { %2224 = vst [vmem:[#allocation3 + $0x5] sm:$0x1] %v2223_v3  ;;  %v2227_v38 = vpack.c.bf16 %v2223_v3, %v2223_v3  ;;  %v5108_v3 = vld [vmem:[#allocation14 + $0x88] ss:$16 sps:$4 sm:$0xff]  }
 0x6ef   : > { %2261 = vmatmul.mubr.bf16.vlgmr.msra.gmra.mxu0 %v2227_v38  ;;  %2302 = vmatmul.mubr.bf16.vlgmr.msra.gmra.mxu1 %v2227_v38  ;;  %v5113_v38 = vld [vmem:[#allocation14 + $0x64] ss:$16 sps:$4 sm:$0xff]  }
 0x6f0   : > { %2370 = vmatpush1.bf16.msra.mxu0 %v6405_v10  ;;  %2411 = vmatpush1.bf16.msra.mxu1 %v6408_v11  ;;  %v5405_v10 = vld [vmem:[#allocation13] ss:$16 sps:$4 sm:$0xff]   ;;  %v5406_v11 = vld [vmem:[#allocation13 + $0x8] ss:$16 sps:$4 sm:$0xff]  }
 0x6f1   : > { %2371 = vmatprep.subr.bf16.mxu0 %v6411_v59  ;;  %2412 = vmatprep.subr.bf16.mxu1 %v6414_v12 }
 0x6f2   : > { %2401 = vmatprep.mubr.bf16.mxu0 %v5780_v0  ;;  %2442 = vmatprep.mubr.bf16.mxu1 %v5780_v0 }
 0x6f4   : > { %2372 = vmatpush1.bf16.msra.mxu0 %v6419_v13  ;;  %2413 = vmatpush1.bf16.msra.mxu1 %v6422_v43 }
 0x6f5   : > { %2373 = vmatprep.subr.bf16.mxu0 %v6425_v5  ;;  %2414 = vmatprep.subr.bf16.mxu1 %v6428_v36 }
 0x6f8   : > { %2374 = vmatpush1.bf16.msra.mxu0 %v6476_v63  ;;  %2415 = vmatpush1.bf16.msra.mxu1 %v6479_v1 }
 0x6f9   : > { %2375 = vmatprep.subr.bf16.mxu0 %v6482_v2  ;;  %2416 = vmatprep.subr.bf16.mxu1 %v6485_v6 }
 0x6fc   : > { %2376 = vmatpush1.bf16.msra.mxu0 %v6488_v7  ;;  %2417 = vmatpush1.bf16.msra.mxu1 %v6491_v8 }
 0x6fd   : > { %2377 = vmatprep.subr.bf16.mxu0 %v6494_v9  ;;  %2418 = vmatprep.subr.bf16.mxu1 %v6497_v16  ;;  %v2226_v16 = vld [vmem:[#allocation2 + $0x6] ss:$8 sm:$0xf] }
 0x700   : > { %2378 = vmatpush1.bf16.msra.mxu0 %v6500_v17  ;;  %2419 = vmatpush1.bf16.msra.mxu1 %v6503_v18 }
 0x701   : > { %2379 = vmatprep.subr.bf16.mxu0 %v6506_v19  ;;  %2420 = vmatprep.subr.bf16.mxu1 %v6509_v20 }
 0x704   : > { %2380 = vmatpush1.bf16.msra.mxu0 %v6512_v21  ;;  %2421 = vmatpush1.bf16.msra.mxu1 %v6515_v22 }
 0x705   : > { %2381 = vmatprep.subr.bf16.mxu0 %v6518_v23  ;;  %2422 = vmatprep.subr.bf16.mxu1 %v6521_v24 }
 0x708   : > { %2382 = vmatpush1.bf16.msra.mxu0 %v6524_v25  ;;  %2423 = vmatpush1.bf16.msra.mxu1 %v6527_v26 }
 0x709   : > { %2383 = vmatprep.subr.bf16.mxu0 %v6530_v27  ;;  %2424 = vmatprep.subr.bf16.mxu1 %v6533_v28 }
 0x70c   : > { %2384 = vmatpush1.bf16.msra.mxu0 %v5405_v10  ;;  %2425 = vmatpush1.bf16.msra.mxu1 %v5406_v11  ;;  %v5116_v10 = vld [vmem:[#allocation14 + $0x6c] ss:$16 sps:$4 sm:$0xff]   ;;  %v5111_v11 = vld [vmem:[#allocation14 + $0x60] ss:$16 sps:$4 sm:$0xff]  }
 0x70d   : > { %2723 = vmatprep.subr.bf16.mxu0 %v5089_v40  ;;  %2764 = vmatprep.subr.bf16.mxu1 %v5092_v55 }
 0x7af   : > { %v2262_v59 = vpop.f32.mrf.mxu0  ;;  %v2303_v12 = vpop.f32.mrf.mxu1 }
 0x7b1   : > { %v2264_v13 = vpop.f32.mrf.mxu0  ;;  %v2305_v43 = vpop.f32.mrf.mxu1 }
 0x7b2   : > { %v2314_v5 = vcombine.low %v2262_v59, %v2264_v13  ;;  %v2315_v36 = vcombine.low %v2303_v12, %v2305_v43  ;;  %v5114_v59 = vld [vmem:[#allocation14 + $0x68] ss:$16 sps:$4 sm:$0xff]   ;;  %v5119_v12 = vld [vmem:[#allocation14 + $0x44] ss:$16 sps:$4 sm:$0xff]   ;;  %v5122_v13 = vld [vmem:[#allocation14 + $0x4c] ss:$16 sps:$4 sm:$0xff]  }
 0x7b3   : > { %v2266_v53 = vpop.f32.mrf.mxu0  ;;  %v2307_v63 = vpop.f32.mrf.mxu1  ;;  %v5117_v43 = vld [vmem:[#allocation14 + $0x40] ss:$16 sps:$4 sm:$0xff]  }
 0x7b4   : > { %v2322_v1 = vrot.slane %v2314_v5, %v6274_v52  ;;  %v2329_v2 = vrot.slane %v2315_v36, %v6274_v52  ;;  %v5120_v5 = vld [vmem:[#allocation14 + $0x48] ss:$16 sps:$4 sm:$0xff]   ;;  %v5125_v36 = vld [vmem:[#allocation14 + $0x24] ss:$16 sps:$4 sm:$0xff]   ;;  %v5123_v53 = vld [vmem:[#allocation14 + $0x20] ss:$16 sps:$4 sm:$0xff]  }
 0x7b5   : > { %v2267_v6 = vpop.f32.mrf.mxu0  ;;  %v2308_v7 = vpop.f32.mrf.mxu1  ;;  %v5126_v63 = vld [vmem:[#allocation14 + $0x28] ss:$16 sps:$4 sm:$0xff]  }
 0x7b6   : > { %v2330_v8 = vcombine.low %v2322_v1, %v2329_v2  ;;  %v5128_v1 = vld [vmem:[#allocation14 + $0x2c] ss:$16 sps:$4 sm:$0xff]   ;;  %v5131_v2 = vld [vmem:[#allocation14 + $0x4] ss:$16 sps:$4 sm:$0xff]   ;;  %v5129_v7 = vld [vmem:[#allocation14] ss:$16 sps:$4 sm:$0xff]  }
 0x7b7   : > { %v5134_v6 = vld [vmem:[#allocation14 + $0xc] ss:$16 sps:$4 sm:$0xff]  }
 0x7b8   : > { %v2337_v9 = vrot.slane %v2330_v8, %v6274_v52  ;;  %v5132_v8 = vld [vmem:[#allocation14 + $0x8] ss:$16 sps:$4 sm:$0xff]  }
 0x7ba   : > { %v2339_v17 = vadd.f32 %v2337_v9, %v2226_v16  ;;  %v6586_v9 = vld [vmem:[#allocation16 + $0xe4] ss:$16 sps:$4 sm:$0xff]   ;;  %v6588_v16 = vld [vmem:[#allocation16 + $0xec] ss:$16 sps:$4 sm:$0xff]  }
 0x7bc   : > { %v2340_v18 = vmul.f32 0.5, %v2339_v17  ;;  %v2345_v19 = vrot.slane %v2339_v17, 1  ;;  %v2351_v21 = vrot.slane %v2339_v17, 2  ;;  %v2354_v22 = vrot.slane %v2339_v17, 3 }
 0x7be   : > { %5267 = vtanh.f32 %v2340_v18  ;;  %v2347_v20 = vmul.f32 0.5, %v2345_v19  ;;  %v2356_v23 = vmul.f32 0.5, %v2354_v22 }
 0x7c0   : > { %5269 = vtanh.f32 %v2347_v20 }
 0x7c1   : > { %5271 = vtanh.f32 %v2351_v21 }
 0x7c2   : > { %5273 = vtanh.f32 %v2356_v23 }
 0x7cb   : > { %v5268_v24 = vpop.eup %5267 }
 0x7cc   : > { %v2342_v25 = vmul.f32 0.5, %v5268_v24 }
 0x7cd   : > { %v5270_v26 = vpop.eup %5269 }
 0x7ce   : > { %v2343_v27 = vadd.f32 0.5, %v2342_v25  ;;  %v2349_v28 = vmul.f32 0.5, %v5270_v26  ;;  %v5272_v34 = vpop.eup %5271 }
 0x7cf   : > { %v5274_v45 = vpop.eup %5273 }
 0x7d0   : > { %v2350_v4 = vadd.f32 0.5, %v2349_v28  ;;  %v2361_v35 = vmul.f32 %v5272_v34, %v2343_v27  ;;  %v2358_v15 = vmul.f32 0.5, %v5274_v45 }
 0x7d2   : > { %v2360_v44 = vmul.f32 %v2350_v4, %v6544_v32  ;;  %v2359_v49 = vadd.f32 0.5, %v2358_v15  ;;  %v5099_v32 = vld [vmem:[#allocation14 + $0xa0] ss:$16 sps:$4 sm:$0xff]  }
 0x7d4   : > { %v6581_v14 = vadd.f32 %v2361_v35, %v2360_v44  ;;  %v2367_v44 = vld [vmem:[#allocation2 + $0x7] ss:$8 sm:$0xf] }
 0x7d6   : > { %5275 = vtanh.f32 %v6581_v14 }
 0x7e3   : > { %v5276_v54 = vpop.eup %5275 }
 0x7e4   : > { %v2364_v56 = vmul.f32 %v5276_v54, %v2359_v49 }
 0x7e6   : > { %2365 = vst [vmem:[#allocation3 + $0x6] sm:$0x1] %v2364_v56  ;;  %v2368_v39 = vpack.c.bf16 %v2364_v56, %v2364_v56 }
 0x7e8   : > { %2402 = vmatmul.mubr.bf16.vlgmr.msra.gmra.mxu0 %v2368_v39  ;;  %2443 = vmatmul.mubr.bf16.vlgmr.msra.gmra.mxu1 %v2368_v39 }
 0x7e9   : > { %2755 = vmatprep.mubr.bf16.mxu0 %v5780_v0  ;;  %2796 = vmatprep.mubr.bf16.mxu1 %v5780_v0 }
 0x7ea   : > { %2724 = vmatpush1.bf16.msra.mxu0 %v5087_v57  ;;  %2765 = vmatpush1.bf16.msra.mxu1 %v5090_v58 }
 0x7eb   : > { %2725 = vmatprep.subr.bf16.mxu0 %v5095_v60  ;;  %2766 = vmatprep.subr.bf16.mxu1 %v5098_v61 }
 0x7ee   : > { %2726 = vmatpush1.bf16.msra.mxu0 %v5093_v62  ;;  %2767 = vmatpush1.bf16.msra.mxu1 %v5096_v29 }
 0x7ef   : > { %2727 = vmatprep.subr.bf16.mxu0 %v5101_v30  ;;  %2768 = vmatprep.subr.bf16.mxu1 %v5104_v31 }
 0x7f2   : > { %2728 = vmatpush1.bf16.msra.mxu0 %v5099_v32  ;;  %2769 = vmatpush1.bf16.msra.mxu1 %v5102_v33 }
 0x7f3   : > { %2729 = vmatprep.subr.bf16.mxu0 %v5107_v41  ;;  %2770 = vmatprep.subr.bf16.mxu1 %v5110_v42 }
 0x7f6   : > { %2730 = vmatpush1.bf16.msra.mxu0 %v5105_v37  ;;  %2771 = vmatpush1.bf16.msra.mxu1 %v5108_v3 }
 0x7f7   : > { %2731 = vmatprep.subr.bf16.mxu0 %v5113_v38  ;;  %2772 = vmatprep.subr.bf16.mxu1 %v5116_v10  ;;  %v6596_v38 = vld [vmem:[#allocation16 + $0xe0] ss:$16 sps:$4 sm:$0xff]   ;;  %v6598_v10 = vld [vmem:[#allocation16 + $0xe8] ss:$16 sps:$4 sm:$0xff]  }
 0x7fa   : > { %2732 = vmatpush1.bf16.msra.mxu0 %v5111_v11  ;;  %2773 = vmatpush1.bf16.msra.mxu1 %v5114_v59  ;;  %v6600_v59 = vld [vmem:[#allocation16 + $0xc4] ss:$16 sps:$4 sm:$0xff]  }
 0x7fb   : > { %2733 = vmatprep.subr.bf16.mxu0 %v5119_v12  ;;  %2774 = vmatprep.subr.bf16.mxu1 %v5122_v13  ;;  %v6602_v12 = vld [vmem:[#allocation16 + $0xcc] ss:$16 sps:$4 sm:$0xff]   ;;  %v6608_v13 = vld [vmem:[#allocation16 + $0xc8] ss:$16 sps:$4 sm:$0xff]  }
 0x7fe   : > { %2734 = vmatpush1.bf16.msra.mxu0 %v5117_v43  ;;  %2775 = vmatpush1.bf16.msra.mxu1 %v5120_v5  ;;  %v6612_v43 = vld [vmem:[#allocation16 + $0xa4] ss:$16 sps:$4 sm:$0xff]   ;;  %v6614_v5 = vld [vmem:[#allocation16 + $0xac] ss:$16 sps:$4 sm:$0xff]  }
 0x7ff   : > { %2735 = vmatprep.subr.bf16.mxu0 %v5125_v36  ;;  %2776 = vmatprep.subr.bf16.mxu1 %v5128_v1  ;;  %v6620_v36 = vld [vmem:[#allocation16 + $0xa0] ss:$16 sps:$4 sm:$0xff]   ;;  %v6628_v1 = vld [vmem:[#allocation16 + $0x8c] ss:$16 sps:$4 sm:$0xff]  }
 0x802   : > { %2736 = vmatpush1.bf16.msra.mxu0 %v5123_v53  ;;  %2777 = vmatpush1.bf16.msra.mxu1 %v5126_v63  ;;  %v6622_v53 = vld [vmem:[#allocation16 + $0xa8] ss:$16 sps:$4 sm:$0xff]   ;;  %v6626_v63 = vld [vmem:[#allocation16 + $0x84] ss:$16 sps:$4 sm:$0xff]  }
 0x803   : > { %2737 = vmatprep.subr.bf16.mxu0 %v5131_v2  ;;  %2778 = vmatprep.subr.bf16.mxu1 %v5134_v6  ;;  %v6632_v2 = vld [vmem:[#allocation16 + $0x80] ss:$16 sps:$4 sm:$0xff]   ;;  %v6634_v6 = vld [vmem:[#allocation16 + $0x88] ss:$16 sps:$4 sm:$0xff]  }
 0x806   : > { %2738 = vmatpush1.bf16.msra.mxu0 %v5129_v7  ;;  %2779 = vmatpush1.bf16.msra.mxu1 %v5132_v8  ;;  %v6638_v7 = vld [vmem:[#allocation16 + $0x64] ss:$16 sps:$4 sm:$0xff]   ;;  %v6640_v8 = vld [vmem:[#allocation16 + $0x6c] ss:$16 sps:$4 sm:$0xff]  }
 0x807   : > { %3002 = vmatprep.subr.bf16.mxu0 %v6586_v9  ;;  %3043 = vmatprep.subr.bf16.mxu1 %v6588_v16 }
 0x8a8   : > { %v2403_v17 = vpop.f32.mrf.mxu0  ;;  %v2444_v18 = vpop.f32.mrf.mxu1 }
 0x8aa   : > { %v2405_v19 = vpop.f32.mrf.mxu0  ;;  %v2446_v20 = vpop.f32.mrf.mxu1 }
 0x8ab   : > { %v2455_v21 = vcombine.low %v2403_v17, %v2405_v19  ;;  %v2456_v22 = vcombine.low %v2444_v18, %v2446_v20  ;;  %v6644_v17 = vld [vmem:[#allocation16 + $0x60] ss:$16 sps:$4 sm:$0xff]   ;;  %v6646_v18 = vld [vmem:[#allocation16 + $0x68] ss:$16 sps:$4 sm:$0xff]   ;;  %v6650_v19 = vld [vmem:[#allocation16 + $0x44] ss:$16 sps:$4 sm:$0xff]  }
 0x8ac   : > { %v2407_v23 = vpop.f32.mrf.mxu0  ;;  %v2448_v24 = vpop.f32.mrf.mxu1  ;;  %v6652_v20 = vld [vmem:[#allocation16 + $0x4c] ss:$16 sps:$4 sm:$0xff]  }
 0x8ad   : > { %v2463_v25 = vrot.slane %v2455_v21, %v6274_v52  ;;  %v2470_v26 = vrot.slane %v2456_v22, %v6274_v52  ;;  %v6656_v21 = vld [vmem:[#allocation16 + $0x40] ss:$16 sps:$4 sm:$0xff]   ;;  %v6658_v22 = vld [vmem:[#allocation16 + $0x48] ss:$16 sps:$4 sm:$0xff]   ;;  %v6662_v23 = vld [vmem:[#allocation16 + $0x24] ss:$16 sps:$4 sm:$0xff]  }
 0x8ae   : > { %v2408_v27 = vpop.f32.mrf.mxu0  ;;  %v2449_v28 = vpop.f32.mrf.mxu1  ;;  %v6664_v24 = vld [vmem:[#allocation16 + $0x2c] ss:$16 sps:$4 sm:$0xff]  }
 0x8af   : > { %v2471_v4 = vcombine.low %v2463_v25, %v2470_v26  ;;  %v6668_v25 = vld [vmem:[#allocation16 + $0x20] ss:$16 sps:$4 sm:$0xff]   ;;  %v6670_v26 = vld [vmem:[#allocation16 + $0x28] ss:$16 sps:$4 sm:$0xff]   ;;  %v6674_v27 = vld [vmem:[#allocation16 + $0x4] ss:$16 sps:$4 sm:$0xff]  }
 0x8b0   : > { %v6676_v28 = vld [vmem:[#allocation16 + $0xc] ss:$16 sps:$4 sm:$0xff]  }
 0x8b1   : > { %v2478_v34 = vrot.slane %v2471_v4, %v6274_v52  ;;  %v6680_v4 = vld [vmem:[#allocation16] ss:$16 sps:$4 sm:$0xff]  }
 0x8b3   : > { %v2480_v35 = vadd.f32 %v2478_v34, %v2367_v44  ;;  %v6682_v34 = vld [vmem:[#allocation16 + $0x8] ss:$16 sps:$4 sm:$0xff]  }
 0x8b4   : > { %v2541_v44 = vld [vmem:[%s7054_s8] sm:$0xf] }
 0x8b5   : > { %v2481_v45 = vmul.f32 0.5, %v2480_v35  ;;  %v2486_v15 = vrot.slane %v2480_v35, 1  ;;  %v2492_v54 = vrot.slane %v2480_v35, 2  ;;  %v2495_v56 = vrot.slane %v2480_v35, 3 }
 0x8b6   : > { %v2546_v35 = vrot.slane %v2541_v44, %v6257_v47 }
 0x8b7   : > { %5277 = vtanh.f32 %v2481_v45  ;;  %v2488_v49 = vmul.f32 0.5, %v2486_v15  ;;  %v2497_v39 = vmul.f32 0.5, %v2495_v56  ;;  %v2554_v45 = vrot.slane %v2541_v44, %v1171_v48 }
 0x8b8   : > { %v2550_v15 = vrot.slane %v2541_v44, %v6264_v50 }
 0x8b9   : > { %5279 = vtanh.f32 %v2488_v49  ;;  %v2558_v49 = vrot.slane %v2541_v44, %v1175_v51 }
 0x8ba   : > { %5281 = vtanh.f32 %v2492_v54 }
 0x8bb   : > { %5283 = vtanh.f32 %v2497_v39 }
 0x8c4   : > { %v5278_v40 = vpop.eup %5277 }
 0x8c5   : > { %v2483_v55 = vmul.f32 0.5, %v5278_v40 }
 0x8c6   : > { %v5280_v57 = vpop.eup %5279 }
 0x8c7   : > { %v2484_v58 = vadd.f32 0.5, %v2483_v55  ;;  %v2490_v60 = vmul.f32 0.5, %v5280_v57  ;;  %v5282_v62 = vpop.eup %5281 }
 0x8c8   : > { %v5284_v32 = vpop.eup %5283 }
 0x8c9   : > { %v2491_v61 = vadd.f32 0.5, %v2490_v60  ;;  %v2502_v30 = vmul.f32 %v5282_v62, %v2484_v58  ;;  %v2499_v33 = vmul.f32 0.5, %v5284_v32 }
 0x8cb   : > { %v2501_v29 = vmul.f32 %v2491_v61, %v6581_v14  ;;  %v2500_v41 = vadd.f32 0.5, %v2499_v33  ;;  %v6606_v14 = vld [vmem:[#allocation16 + $0xc0] ss:$16 sps:$4 sm:$0xff]  }
 0x8cd   : > { %v2503_v31 = vadd.f32 %v2502_v30, %v2501_v29 }
 0x8cf   : > { %5285 = vtanh.f32 %v2503_v31 }
 0x8dc   : > { %v5286_v42 = vpop.eup %5285 }
 0x8dd   : > { %v2505_v37 = vmul.f32 %v5286_v42, %v2500_v41 }
 0x8df   : > { %2506 = vst [vmem:[#allocation3 + $0x7] sm:$0x1] %v2505_v37 }
 0x8e6   : > { %v2507_v3 = vld [vmem:[#allocation3] sm:$0xff] }
 0x8e7   : > { %v2508_v11 = vpack.c.bf16 %v2507_v3, %v2507_v3 }
 0x8e9   : > { %2756 = vmatmul.mubr.bf16.vlgmr.msra.gmra.mxu0 %v2508_v11  ;;  %2797 = vmatmul.mubr.bf16.vlgmr.msra.gmra.mxu1 %v2508_v11 }
 0x8ea   : > { %3003 = vmatpush1.bf16.msra.mxu0 %v6596_v38  ;;  %3044 = vmatpush1.bf16.msra.mxu1 %v6598_v10 }
 0x8eb   : > { %3004 = vmatprep.subr.bf16.mxu0 %v6600_v59  ;;  %3045 = vmatprep.subr.bf16.mxu1 %v6602_v12 }
 0x8ec   : > { %3034 = vmatprep.mubr.bf16.mxu0 %v5780_v0  ;;  %3075 = vmatprep.mubr.bf16.mxu1 %v5780_v0 }
 0x8ee   : > { %3005 = vmatpush1.bf16.msra.mxu0 %v6606_v14  ;;  %3046 = vmatpush1.bf16.msra.mxu1 %v6608_v13 }
 0x8ef   : > { %3006 = vmatprep.subr.bf16.mxu0 %v6612_v43  ;;  %3047 = vmatprep.subr.bf16.mxu1 %v6614_v5 }
 0x8f2   : > { %3007 = vmatpush1.bf16.msra.mxu0 %v6620_v36  ;;  %3048 = vmatpush1.bf16.msra.mxu1 %v6622_v53 }
 0x8f3   : > { %3008 = vmatprep.subr.bf16.mxu0 %v6626_v63  ;;  %3049 = vmatprep.subr.bf16.mxu1 %v6628_v1 }
 0x8f6   : > { %3009 = vmatpush1.bf16.msra.mxu0 %v6632_v2  ;;  %3050 = vmatpush1.bf16.msra.mxu1 %v6634_v6 }
 0x8f7   : > { %3010 = vmatprep.subr.bf16.mxu0 %v6638_v7  ;;  %3051 = vmatprep.subr.bf16.mxu1 %v6640_v8 }
 0x8fa   : > { %3011 = vmatpush1.bf16.msra.mxu0 %v6644_v17  ;;  %3052 = vmatpush1.bf16.msra.mxu1 %v6646_v18 }
 0x8fb   : > { %3012 = vmatprep.subr.bf16.mxu0 %v6650_v19  ;;  %3053 = vmatprep.subr.bf16.mxu1 %v6652_v20 }
 0x8fe   : > { %3013 = vmatpush1.bf16.msra.mxu0 %v6656_v21  ;;  %3054 = vmatpush1.bf16.msra.mxu1 %v6658_v22 }
 0x8ff   : > { %3014 = vmatprep.subr.bf16.mxu0 %v6662_v23  ;;  %3055 = vmatprep.subr.bf16.mxu1 %v6664_v24 }
 0x902   : > { %3015 = vmatpush1.bf16.msra.mxu0 %v6668_v25  ;;  %3056 = vmatpush1.bf16.msra.mxu1 %v6670_v26 }
 0x903   : > { %3016 = vmatprep.subr.bf16.mxu0 %v6674_v27  ;;  %3057 = vmatprep.subr.bf16.mxu1 %v6676_v28 }
 0x906   : > { %3017 = vmatpush1.bf16.msra.mxu0 %v6680_v4  ;;  %3058 = vmatpush1.bf16.msra.mxu1 %v6682_v34 }
 0x907   : > { %3142 = vmatprep.subr.bf16.mxu0 %v6586_v9  ;;  %3183 = vmatprep.subr.bf16.mxu1 %v6588_v16 }
 0x909   : > { %3035 = vmatmul.mubr.bf16.vlgmr.msra.gmra.mxu0 %v5780_v0  ;;  %3076 = vmatmul.mubr.bf16.vlgmr.msra.gmra.mxu1 %v5780_v0 }
 0x90a   : > { %3143 = vmatpush1.bf16.msra.mxu0 %v6596_v38  ;;  %3184 = vmatpush1.bf16.msra.mxu1 %v6598_v10 }
 0x90b   : > { %3144 = vmatprep.subr.bf16.mxu0 %v6600_v59  ;;  %3185 = vmatprep.subr.bf16.mxu1 %v6602_v12 }
 0x90c   : > { %3174 = vmatprep.mubr.bf16.mxu0 %v5780_v0  ;;  %3215 = vmatprep.mubr.bf16.mxu1 %v5780_v0 }
 0x90e   : > { %3145 = vmatpush1.bf16.msra.mxu0 %v6606_v14  ;;  %3186 = vmatpush1.bf16.msra.mxu1 %v6608_v13 }
 0x90f   : > { %3146 = vmatprep.subr.bf16.mxu0 %v6612_v43  ;;  %3187 = vmatprep.subr.bf16.mxu1 %v6614_v5 }
 0x912   : > { %3147 = vmatpush1.bf16.msra.mxu0 %v6620_v36  ;;  %3188 = vmatpush1.bf16.msra.mxu1 %v6622_v53 }
 0x913   : > { %3148 = vmatprep.subr.bf16.mxu0 %v6626_v63  ;;  %3189 = vmatprep.subr.bf16.mxu1 %v6628_v1 }
 0x916   : > { %3149 = vmatpush1.bf16.msra.mxu0 %v6632_v2  ;;  %3190 = vmatpush1.bf16.msra.mxu1 %v6634_v6 }
 0x917   : > { %3150 = vmatprep.subr.bf16.mxu0 %v6638_v7  ;;  %3191 = vmatprep.subr.bf16.mxu1 %v6640_v8 }
 0x91a   : > { %3151 = vmatpush1.bf16.msra.mxu0 %v6644_v17  ;;  %3192 = vmatpush1.bf16.msra.mxu1 %v6646_v18 }
 0x91b   : > { %3152 = vmatprep.subr.bf16.mxu0 %v6650_v19  ;;  %3193 = vmatprep.subr.bf16.mxu1 %v6652_v20 }
 0x91e   : > { %3153 = vmatpush1.bf16.msra.mxu0 %v6656_v21  ;;  %3194 = vmatpush1.bf16.msra.mxu1 %v6658_v22 }
 0x91f   : > { %3154 = vmatprep.subr.bf16.mxu0 %v6662_v23  ;;  %3195 = vmatprep.subr.bf16.mxu1 %v6664_v24 }
 0x922   : > { %3155 = vmatpush1.bf16.msra.mxu0 %v6668_v25  ;;  %3196 = vmatpush1.bf16.msra.mxu1 %v6670_v26 }
 0x923   : > { %3156 = vmatprep.subr.bf16.mxu0 %v6674_v27  ;;  %3197 = vmatprep.subr.bf16.mxu1 %v6676_v28 }
 0x926   : > { %3157 = vmatpush1.bf16.msra.mxu0 %v6680_v4  ;;  %3198 = vmatpush1.bf16.msra.mxu1 %v6682_v34 }
 0x927   : > { %3282 = vmatprep.subr.bf16.mxu0 %v6586_v9  ;;  %3323 = vmatprep.subr.bf16.mxu1 %v6588_v16 }
 0x9a9   : > { %v2757_v54 = vpop.f32.mrf.mxu0  ;;  %v2798_v56 = vpop.f32.mrf.mxu1 }
 0x9aa   : > { %v2758_v39 = vadd.f32 %v2757_v54, %v2546_v35  ;;  %v2799_v40 = vadd.f32 %v2798_v56, %v2554_v45 }
 0x9ab   : > { %v2759_v55 = vpop.f32.mrf.mxu0  ;;  %v2800_v57 = vpop.f32.mrf.mxu1 }
 0x9ac   : > { %2805 = vst [vmem:[#allocation2] sm:$0xff] %v2758_v39  ;;  %2807 = vst [vmem:[#allocation2 + $0x10] sm:$0xff] %v2799_v40  ;;  %v2760_v58 = vadd.f32 %v2759_v55, %v2550_v15  ;;  %v2801_v60 = vadd.f32 %v2800_v57, %v2558_v49 }
 0x9ad   : > { %v2761_v61 = vpop.f32.mrf.mxu0  ;;  %v2802_v62 = vpop.f32.mrf.mxu1 }
 0x9ae   : > { %2806 = vst [vmem:[#allocation2 + $0x8] sm:$0xff] %v2760_v58  ;;  %2808 = vst [vmem:[#allocation2 + $0x18] sm:$0xff] %v2801_v60 }
 0x9af   : > { %v2762_v48 = vpop.f32.mrf.mxu0  ;;  %v2803_v29 = vpop.f32.mrf.mxu1 }
 0x9b5   : > { %v2841_v15 = vld [vmem:[#allocation2] ss:$8 sm:$0xf] }
 0x9c9   : > { %v3036_v30 = vpop.f32.mrf.mxu0  ;;  %v3077_v31 = vpop.f32.mrf.mxu1 }
 0x9cb   : > { %v3038_v46 = vpop.f32.mrf.mxu0  ;;  %v3079_v51 = vpop.f32.mrf.mxu1 }
 0x9cc   : > { %v3088_v32 = vcombine.low %v3036_v30, %v3038_v46  ;;  %v3089_v33 = vcombine.low %v3077_v31, %v3079_v51 }
 0x9cd   : > { %v3040_v41 = vpop.f32.mrf.mxu0  ;;  %v3081_v42 = vpop.f32.mrf.mxu1 }
 0x9ce   : > { %v3096_v37 = vrot.slane %v3088_v32, %v6274_v52  ;;  %v3103_v3 = vrot.slane %v3089_v33, %v6274_v52 }
 0x9cf   : > { %v3041_v11 = vpop.f32.mrf.mxu0  ;;  %v3082_v44 = vpop.f32.mrf.mxu1 }
 0x9d0   : > { %v3104_v35 = vcombine.low %v3096_v37, %v3103_v3 }
 0x9d2   : > { %v3111_v45 = vrot.slane %v3104_v35, %v6274_v52 }
 0x9d4   : > { %v3113_v49 = vadd.f32 %v3111_v45, %v2841_v15 }
 0x9d6   : > { %v3114_v54 = vmul.f32 0.5, %v3113_v49  ;;  %v3119_v56 = vrot.slane %v3113_v49, 1  ;;  %v3125_v40 = vrot.slane %v3113_v49, 2  ;;  %v3128_v55 = vrot.slane %v3113_v49, 3 }
 0x9d8   : > { %5287 = vtanh.f32 %v3114_v54  ;;  %v3121_v39 = vmul.f32 0.5, %v3119_v56  ;;  %v3130_v57 = vmul.f32 0.5, %v3128_v55 }
 0x9da   : > { %5289 = vtanh.f32 %v3121_v39 }
 0x9db   : > { %5291 = vtanh.f32 %v3125_v40 }
 0x9dc   : > { %5293 = vtanh.f32 %v3130_v57 }
 0x9e5   : > { %v5288_v58 = vpop.eup %5287 }
 0x9e6   : > { %v3116_v60 = vmul.f32 0.5, %v5288_v58 }
 0x9e7   : > { %v5290_v61 = vpop.eup %5289 }
 0x9e8   : > { %v3117_v62 = vadd.f32 0.5, %v3116_v60  ;;  %v3123_v48 = vmul.f32 0.5, %v5290_v61  ;;  %v5292_v30 = vpop.eup %5291  ;;  %v3140_v61 = vld [vmem:[#allocation2 + $0x1] ss:$8 sm:$0xf] }
 0x9e9   : > { %v5294_v32 = vpop.eup %5293 }
 0x9ea   : > { %v3124_v29 = vadd.f32 0.5, %v3123_v48  ;;  %v3135_v46 = vmul.f32 %v5292_v30, %v3117_v62  ;;  %v3132_v33 = vmul.f32 0.5, %v5294_v32 }
 0x9ec   : > { %v3134_v31 = vmul.f32 0.0, %v3124_v29  ;;  %v3133_v41 = vadd.f32 0.5, %v3132_v33 }
 0x9ee   : > { %v6738_v51 = vadd.f32 %v3135_v46, %v3134_v31 }
 0x9f0   : > { %5295 = vtanh.f32 %v6738_v51 }
 0x9fd   : > { %v5296_v42 = vpop.eup %5295 }
 0x9fe   : > { %v3138_v37 = vmul.f32 %v5296_v42, %v3133_v41 }
 0xa00   : > { %3139 = vst [vmem:[#allocation4] sm:$0x1] %v3138_v37  ;;  %v3141_v3 = vpack.c.bf16 %v3138_v37, %v3138_v37 }
 0xa02   : > { %3175 = vmatmul.mubr.bf16.vlgmr.msra.gmra.mxu0 %v3141_v3  ;;  %3216 = vmatmul.mubr.bf16.vlgmr.msra.gmra.mxu1 %v3141_v3 }
 0xa03   : > { %3283 = vmatpush1.bf16.msra.mxu0 %v6596_v38  ;;  %3324 = vmatpush1.bf16.msra.mxu1 %v6598_v10 }
 0xa04   : > { %3284 = vmatprep.subr.bf16.mxu0 %v6600_v59  ;;  %3325 = vmatprep.subr.bf16.mxu1 %v6602_v12 }
 0xa05   : > { %3314 = vmatprep.mubr.bf16.mxu0 %v5780_v0  ;;  %3355 = vmatprep.mubr.bf16.mxu1 %v5780_v0 }
 0xa07   : > { %3285 = vmatpush1.bf16.msra.mxu0 %v6606_v14  ;;  %3326 = vmatpush1.bf16.msra.mxu1 %v6608_v13 }
 0xa08   : > { %3286 = vmatprep.subr.bf16.mxu0 %v6612_v43  ;;  %3327 = vmatprep.subr.bf16.mxu1 %v6614_v5 }
 0xa0b   : > { %3287 = vmatpush1.bf16.msra.mxu0 %v6620_v36  ;;  %3328 = vmatpush1.bf16.msra.mxu1 %v6622_v53 }
 0xa0c   : > { %3288 = vmatprep.subr.bf16.mxu0 %v6626_v63  ;;  %3329 = vmatprep.subr.bf16.mxu1 %v6628_v1 }
 0xa0f   : > { %3289 = vmatpush1.bf16.msra.mxu0 %v6632_v2  ;;  %3330 = vmatpush1.bf16.msra.mxu1 %v6634_v6 }
 0xa10   : > { %3290 = vmatprep.subr.bf16.mxu0 %v6638_v7  ;;  %3331 = vmatprep.subr.bf16.mxu1 %v6640_v8 }
 0xa13   : > { %3291 = vmatpush1.bf16.msra.mxu0 %v6644_v17  ;;  %3332 = vmatpush1.bf16.msra.mxu1 %v6646_v18 }
 0xa14   : > { %3292 = vmatprep.subr.bf16.mxu0 %v6650_v19  ;;  %3333 = vmatprep.subr.bf16.mxu1 %v6652_v20 }
 0xa17   : > { %3293 = vmatpush1.bf16.msra.mxu0 %v6656_v21  ;;  %3334 = vmatpush1.bf16.msra.mxu1 %v6658_v22 }
 0xa18   : > { %3294 = vmatprep.subr.bf16.mxu0 %v6662_v23  ;;  %3335 = vmatprep.subr.bf16.mxu1 %v6664_v24 }
 0xa1b   : > { %3295 = vmatpush1.bf16.msra.mxu0 %v6668_v25  ;;  %3336 = vmatpush1.bf16.msra.mxu1 %v6670_v26 }
 0xa1c   : > { %3296 = vmatprep.subr.bf16.mxu0 %v6674_v27  ;;  %3337 = vmatprep.subr.bf16.mxu1 %v6676_v28 }
 0xa1f   : > { %3297 = vmatpush1.bf16.msra.mxu0 %v6680_v4  ;;  %3338 = vmatpush1.bf16.msra.mxu1 %v6682_v34 }
 0xa20   : > { %3422 = vmatprep.subr.bf16.mxu0 %v6586_v9  ;;  %3463 = vmatprep.subr.bf16.mxu1 %v6588_v16 }
 0xac2   : > { %v3176_v11 = vpop.f32.mrf.mxu0  ;;  %v3217_v44 = vpop.f32.mrf.mxu1 }
 0xac4   : > { %v3178_v35 = vpop.f32.mrf.mxu0  ;;  %v3219_v45 = vpop.f32.mrf.mxu1 }
 0xac5   : > { %v3228_v15 = vcombine.low %v3176_v11, %v3178_v35  ;;  %v3229_v49 = vcombine.low %v3217_v44, %v3219_v45 }
 0xac6   : > { %v3180_v54 = vpop.f32.mrf.mxu0  ;;  %v3221_v56 = vpop.f32.mrf.mxu1 }
 0xac7   : > { %v3236_v39 = vrot.slane %v3228_v15, %v6274_v52  ;;  %v3243_v40 = vrot.slane %v3229_v49, %v6274_v52 }
 0xac8   : > { %v3181_v55 = vpop.f32.mrf.mxu0  ;;  %v3222_v57 = vpop.f32.mrf.mxu1 }
 0xac9   : > { %v3244_v58 = vcombine.low %v3236_v39, %v3243_v40 }
 0xacb   : > { %v3251_v60 = vrot.slane %v3244_v58, %v6274_v52 }
 0xacd   : > { %v3253_v62 = vadd.f32 %v3251_v60, %v3140_v61 }
 0xacf   : > { %v3254_v48 = vmul.f32 0.5, %v3253_v62  ;;  %v3259_v29 = vrot.slane %v3253_v62, 1  ;;  %v3265_v31 = vrot.slane %v3253_v62, 2  ;;  %v3268_v46 = vrot.slane %v3253_v62, 3 }
 0xad1   : > { %5297 = vtanh.f32 %v3254_v48  ;;  %v3261_v30 = vmul.f32 0.5, %v3259_v29  ;;  %v3270_v32 = vmul.f32 0.5, %v3268_v46 }
 0xad3   : > { %5299 = vtanh.f32 %v3261_v30 }
 0xad4   : > { %5301 = vtanh.f32 %v3265_v31 }
 0xad5   : > { %5303 = vtanh.f32 %v3270_v32 }
 0xade   : > { %v5298_v33 = vpop.eup %5297 }
 0xadf   : > { %v3256_v41 = vmul.f32 0.5, %v5298_v33 }
 0xae0   : > { %v5300_v42 = vpop.eup %5299 }
 0xae1   : > { %v3257_v37 = vadd.f32 0.5, %v3256_v41  ;;  %v3263_v3 = vmul.f32 0.5, %v5300_v42  ;;  %v5302_v44 = vpop.eup %5301  ;;  %v3280_v42 = vld [vmem:[#allocation2 + $0x2] ss:$8 sm:$0xf] }
 0xae2   : > { %v5304_v49 = vpop.eup %5303 }
 0xae3   : > { %v3264_v11 = vadd.f32 0.5, %v3263_v3  ;;  %v3275_v45 = vmul.f32 %v5302_v44, %v3257_v37  ;;  %v3272_v54 = vmul.f32 0.5, %v5304_v49 }
 0xae5   : > { %v3274_v35 = vmul.f32 %v3264_v11, %v6738_v51  ;;  %v3273_v56 = vadd.f32 0.5, %v3272_v54 }
 0xae7   : > { %v6779_v15 = vadd.f32 %v3275_v45, %v3274_v35 }
 0xae9   : > { %5305 = vtanh.f32 %v6779_v15 }
 0xaf6   : > { %v5306_v39 = vpop.eup %5305 }
 0xaf7   : > { %v3278_v40 = vmul.f32 %v5306_v39, %v3273_v56 }
 0xaf9   : > { %3279 = vst [vmem:[#allocation4 + $0x1] sm:$0x1] %v3278_v40  ;;  %v3281_v55 = vpack.c.bf16 %v3278_v40, %v3278_v40 }
 0xafb   : > { %3315 = vmatmul.mubr.bf16.vlgmr.msra.gmra.mxu0 %v3281_v55  ;;  %3356 = vmatmul.mubr.bf16.vlgmr.msra.gmra.mxu1 %v3281_v55 }
 0xafc   : > { %3423 = vmatpush1.bf16.msra.mxu0 %v6596_v38  ;;  %3464 = vmatpush1.bf16.msra.mxu1 %v6598_v10 }
 0xafd   : > { %3424 = vmatprep.subr.bf16.mxu0 %v6600_v59  ;;  %3465 = vmatprep.subr.bf16.mxu1 %v6602_v12 }
 0xafe   : > { %3454 = vmatprep.mubr.bf16.mxu0 %v5780_v0  ;;  %3495 = vmatprep.mubr.bf16.mxu1 %v5780_v0 }
 0xb00   : > { %3425 = vmatpush1.bf16.msra.mxu0 %v6606_v14  ;;  %3466 = vmatpush1.bf16.msra.mxu1 %v6608_v13 }
 0xb01   : > { %3426 = vmatprep.subr.bf16.mxu0 %v6612_v43  ;;  %3467 = vmatprep.subr.bf16.mxu1 %v6614_v5 }
 0xb04   : > { %3427 = vmatpush1.bf16.msra.mxu0 %v6620_v36  ;;  %3468 = vmatpush1.bf16.msra.mxu1 %v6622_v53 }
 0xb05   : > { %3428 = vmatprep.subr.bf16.mxu0 %v6626_v63  ;;  %3469 = vmatprep.subr.bf16.mxu1 %v6628_v1 }
 0xb08   : > { %3429 = vmatpush1.bf16.msra.mxu0 %v6632_v2  ;;  %3470 = vmatpush1.bf16.msra.mxu1 %v6634_v6 }
 0xb09   : > { %3430 = vmatprep.subr.bf16.mxu0 %v6638_v7  ;;  %3471 = vmatprep.subr.bf16.mxu1 %v6640_v8 }
 0xb0c   : > { %3431 = vmatpush1.bf16.msra.mxu0 %v6644_v17  ;;  %3472 = vmatpush1.bf16.msra.mxu1 %v6646_v18 }
 0xb0d   : > { %3432 = vmatprep.subr.bf16.mxu0 %v6650_v19  ;;  %3473 = vmatprep.subr.bf16.mxu1 %v6652_v20 }
 0xb10   : > { %3433 = vmatpush1.bf16.msra.mxu0 %v6656_v21  ;;  %3474 = vmatpush1.bf16.msra.mxu1 %v6658_v22 }
 0xb11   : > { %3434 = vmatprep.subr.bf16.mxu0 %v6662_v23  ;;  %3475 = vmatprep.subr.bf16.mxu1 %v6664_v24 }
 0xb14   : > { %3435 = vmatpush1.bf16.msra.mxu0 %v6668_v25  ;;  %3476 = vmatpush1.bf16.msra.mxu1 %v6670_v26 }
 0xb15   : > { %3436 = vmatprep.subr.bf16.mxu0 %v6674_v27  ;;  %3477 = vmatprep.subr.bf16.mxu1 %v6676_v28 }
 0xb18   : > { %3437 = vmatpush1.bf16.msra.mxu0 %v6680_v4  ;;  %3478 = vmatpush1.bf16.msra.mxu1 %v6682_v34 }
 0xb19   : > { %3562 = vmatprep.subr.bf16.mxu0 %v6586_v9  ;;  %3603 = vmatprep.subr.bf16.mxu1 %v6588_v16 }
 0xbbb   : > { %v3316_v51 = vpop.f32.mrf.mxu0  ;;  %v3357_v57 = vpop.f32.mrf.mxu1 }
 0xbbd   : > { %v3318_v58 = vpop.f32.mrf.mxu0  ;;  %v3359_v60 = vpop.f32.mrf.mxu1 }
 0xbbe   : > { %v3368_v61 = vcombine.low %v3316_v51, %v3318_v58  ;;  %v3369_v62 = vcombine.low %v3357_v57, %v3359_v60 }
 0xbbf   : > { %v3320_v48 = vpop.f32.mrf.mxu0  ;;  %v3361_v29 = vpop.f32.mrf.mxu1 }
 0xbc0   : > { %v3376_v30 = vrot.slane %v3368_v61, %v6274_v52  ;;  %v3383_v31 = vrot.slane %v3369_v62, %v6274_v52 }
 0xbc1   : > { %v3321_v46 = vpop.f32.mrf.mxu0  ;;  %v3362_v32 = vpop.f32.mrf.mxu1 }
 0xbc2   : > { %v3384_v33 = vcombine.low %v3376_v30, %v3383_v31 }
 0xbc4   : > { %v3391_v41 = vrot.slane %v3384_v33, %v6274_v52 }
 0xbc6   : > { %v3393_v37 = vadd.f32 %v3391_v41, %v3280_v42 }
 0xbc8   : > { %v3394_v3 = vmul.f32 0.5, %v3393_v37  ;;  %v3399_v11 = vrot.slane %v3393_v37, 1  ;;  %v3405_v35 = vrot.slane %v3393_v37, 2  ;;  %v3408_v45 = vrot.slane %v3393_v37, 3 }
 0xbca   : > { %5307 = vtanh.f32 %v3394_v3  ;;  %v3401_v44 = vmul.f32 0.5, %v3399_v11  ;;  %v3410_v49 = vmul.f32 0.5, %v3408_v45 }
 0xbcc   : > { %5309 = vtanh.f32 %v3401_v44 }
 0xbcd   : > { %5311 = vtanh.f32 %v3405_v35 }
 0xbce   : > { %5313 = vtanh.f32 %v3410_v49 }
 0xbd7   : > { %v5308_v54 = vpop.eup %5307 }
 0xbd8   : > { %v3396_v56 = vmul.f32 0.5, %v5308_v54 }
 0xbd9   : > { %v5310_v39 = vpop.eup %5309 }
 0xbda   : > { %v3397_v40 = vadd.f32 0.5, %v3396_v56  ;;  %v3403_v55 = vmul.f32 0.5, %v5310_v39  ;;  %v5312_v57 = vpop.eup %5311  ;;  %v3420_v39 = vld [vmem:[#allocation2 + $0x3] ss:$8 sm:$0xf] }
 0xbdb   : > { %v5314_v62 = vpop.eup %5313 }
 0xbdc   : > { %v3404_v51 = vadd.f32 0.5, %v3403_v55  ;;  %v3415_v60 = vmul.f32 %v5312_v57, %v3397_v40  ;;  %v3412_v48 = vmul.f32 0.5, %v5314_v62 }
 0xbde   : > { %v3414_v58 = vmul.f32 %v3404_v51, %v6779_v15  ;;  %v3413_v29 = vadd.f32 0.5, %v3412_v48 }
 0xbe0   : > { %v6820_v61 = vadd.f32 %v3415_v60, %v3414_v58 }
 0xbe2   : > { %5315 = vtanh.f32 %v6820_v61 }
 0xbef   : > { %v5316_v30 = vpop.eup %5315 }
 0xbf0   : > { %v3418_v31 = vmul.f32 %v5316_v30, %v3413_v29 }
 0xbf2   : > { %3419 = vst [vmem:[#allocation4 + $0x2] sm:$0x1] %v3418_v31  ;;  %v3421_v46 = vpack.c.bf16 %v3418_v31, %v3418_v31 }
 0xbf4   : > { %3455 = vmatmul.mubr.bf16.vlgmr.msra.gmra.mxu0 %v3421_v46  ;;  %3496 = vmatmul.mubr.bf16.vlgmr.msra.gmra.mxu1 %v3421_v46 }
 0xbf5   : > { %3563 = vmatpush1.bf16.msra.mxu0 %v6596_v38  ;;  %3604 = vmatpush1.bf16.msra.mxu1 %v6598_v10 }
 0xbf6   : > { %3564 = vmatprep.subr.bf16.mxu0 %v6600_v59  ;;  %3605 = vmatprep.subr.bf16.mxu1 %v6602_v12 }
 0xbf7   : > { %3594 = vmatprep.mubr.bf16.mxu0 %v5780_v0  ;;  %3635 = vmatprep.mubr.bf16.mxu1 %v5780_v0 }
 0xbf9   : > { %3565 = vmatpush1.bf16.msra.mxu0 %v6606_v14  ;;  %3606 = vmatpush1.bf16.msra.mxu1 %v6608_v13 }
 0xbfa   : > { %3566 = vmatprep.subr.bf16.mxu0 %v6612_v43  ;;  %3607 = vmatprep.subr.bf16.mxu1 %v6614_v5 }
 0xbfd   : > { %3567 = vmatpush1.bf16.msra.mxu0 %v6620_v36  ;;  %3608 = vmatpush1.bf16.msra.mxu1 %v6622_v53 }
 0xbfe   : > { %3568 = vmatprep.subr.bf16.mxu0 %v6626_v63  ;;  %3609 = vmatprep.subr.bf16.mxu1 %v6628_v1 }
 0xc01   : > { %3569 = vmatpush1.bf16.msra.mxu0 %v6632_v2  ;;  %3610 = vmatpush1.bf16.msra.mxu1 %v6634_v6 }
 0xc02   : > { %3570 = vmatprep.subr.bf16.mxu0 %v6638_v7  ;;  %3611 = vmatprep.subr.bf16.mxu1 %v6640_v8 }
 0xc05   : > { %3571 = vmatpush1.bf16.msra.mxu0 %v6644_v17  ;;  %3612 = vmatpush1.bf16.msra.mxu1 %v6646_v18 }
 0xc06   : > { %3572 = vmatprep.subr.bf16.mxu0 %v6650_v19  ;;  %3613 = vmatprep.subr.bf16.mxu1 %v6652_v20 }
 0xc09   : > { %3573 = vmatpush1.bf16.msra.mxu0 %v6656_v21  ;;  %3614 = vmatpush1.bf16.msra.mxu1 %v6658_v22 }
 0xc0a   : > { %3574 = vmatprep.subr.bf16.mxu0 %v6662_v23  ;;  %3615 = vmatprep.subr.bf16.mxu1 %v6664_v24 }
 0xc0d   : > { %3575 = vmatpush1.bf16.msra.mxu0 %v6668_v25  ;;  %3616 = vmatpush1.bf16.msra.mxu1 %v6670_v26 }
 0xc0e   : > { %3576 = vmatprep.subr.bf16.mxu0 %v6674_v27  ;;  %3617 = vmatprep.subr.bf16.mxu1 %v6676_v28 }
 0xc11   : > { %3577 = vmatpush1.bf16.msra.mxu0 %v6680_v4  ;;  %3618 = vmatpush1.bf16.msra.mxu1 %v6682_v34 }
 0xc12   : > { %3702 = vmatprep.subr.bf16.mxu0 %v6586_v9  ;;  %3743 = vmatprep.subr.bf16.mxu1 %v6588_v16 }
 0xcb4   : > { %v3456_v15 = vpop.f32.mrf.mxu0  ;;  %v3497_v32 = vpop.f32.mrf.mxu1 }
 0xcb6   : > { %v3458_v33 = vpop.f32.mrf.mxu0  ;;  %v3499_v41 = vpop.f32.mrf.mxu1 }
 0xcb7   : > { %v3508_v42 = vcombine.low %v3456_v15, %v3458_v33  ;;  %v3509_v37 = vcombine.low %v3497_v32, %v3499_v41 }
 0xcb8   : > { %v3460_v3 = vpop.f32.mrf.mxu0  ;;  %v3501_v11 = vpop.f32.mrf.mxu1 }
 0xcb9   : > { %v3516_v44 = vrot.slane %v3508_v42, %v6274_v52  ;;  %v3523_v35 = vrot.slane %v3509_v37, %v6274_v52 }
 0xcba   : > { %v3461_v45 = vpop.f32.mrf.mxu0  ;;  %v3502_v49 = vpop.f32.mrf.mxu1 }
 0xcbb   : > { %v3524_v54 = vcombine.low %v3516_v44, %v3523_v35 }
 0xcbd   : > { %v3531_v56 = vrot.slane %v3524_v54, %v6274_v52 }
 0xcbf   : > { %v3533_v40 = vadd.f32 %v3531_v56, %v3420_v39 }
 0xcc1   : > { %v3534_v55 = vmul.f32 0.5, %v3533_v40  ;;  %v3539_v51 = vrot.slane %v3533_v40, 1  ;;  %v3545_v58 = vrot.slane %v3533_v40, 2  ;;  %v3548_v60 = vrot.slane %v3533_v40, 3 }
 0xcc3   : > { %5317 = vtanh.f32 %v3534_v55  ;;  %v3541_v57 = vmul.f32 0.5, %v3539_v51  ;;  %v3550_v62 = vmul.f32 0.5, %v3548_v60 }
 0xcc5   : > { %5319 = vtanh.f32 %v3541_v57 }
 0xcc6   : > { %5321 = vtanh.f32 %v3545_v58 }
 0xcc7   : > { %5323 = vtanh.f32 %v3550_v62 }
 0xcd0   : > { %v5318_v48 = vpop.eup %5317 }
 0xcd1   : > { %v3536_v29 = vmul.f32 0.5, %v5318_v48 }
 0xcd2   : > { %v5320_v30 = vpop.eup %5319 }
 0xcd3   : > { %v3537_v31 = vadd.f32 0.5, %v3536_v29  ;;  %v3543_v46 = vmul.f32 0.5, %v5320_v30  ;;  %v5322_v32 = vpop.eup %5321 }
 0xcd4   : > { %v5324_v37 = vpop.eup %5323 }
 0xcd5   : > { %v3544_v15 = vadd.f32 0.5, %v3543_v46  ;;  %v3555_v41 = vmul.f32 %v5322_v32, %v3537_v31  ;;  %v3552_v3 = vmul.f32 0.5, %v5324_v37 }
 0xcd7   : > { %v3554_v33 = vmul.f32 %v3544_v15, %v6820_v61  ;;  %v3553_v11 = vadd.f32 0.5, %v3552_v3 }
 0xcd9   : > { %v6861_v42 = vadd.f32 %v3555_v41, %v3554_v33 }
 0xcdb   : > { %5325 = vtanh.f32 %v6861_v42 }
 0xce8   : > { %v5326_v44 = vpop.eup %5325 }
 0xce9   : > { %v3558_v35 = vmul.f32 %v5326_v44, %v3553_v11 }
 0xceb   : > { %3559 = vst [vmem:[#allocation4 + $0x3] sm:$0x1] %v3558_v35  ;;  %v3561_v45 = vpack.c.bf16 %v3558_v35, %v3558_v35 }
 0xced   : > { %3595 = vmatmul.mubr.bf16.vlgmr.msra.gmra.mxu0 %v3561_v45  ;;  %3636 = vmatmul.mubr.bf16.vlgmr.msra.gmra.mxu1 %v3561_v45 }
 0xcee   : > { %3703 = vmatpush1.bf16.msra.mxu0 %v6596_v38  ;;  %3744 = vmatpush1.bf16.msra.mxu1 %v6598_v10 }
 0xcef   : > { %3704 = vmatprep.subr.bf16.mxu0 %v6600_v59  ;;  %3745 = vmatprep.subr.bf16.mxu1 %v6602_v12 }
 0xcf0   : > { %3734 = vmatprep.mubr.bf16.mxu0 %v5780_v0  ;;  %3775 = vmatprep.mubr.bf16.mxu1 %v5780_v0 }
 0xcf2   : > { %3705 = vmatpush1.bf16.msra.mxu0 %v6606_v14  ;;  %3746 = vmatpush1.bf16.msra.mxu1 %v6608_v13 }
 0xcf3   : > { %3706 = vmatprep.subr.bf16.mxu0 %v6612_v43  ;;  %3747 = vmatprep.subr.bf16.mxu1 %v6614_v5 }
 0xcf6   : > { %3707 = vmatpush1.bf16.msra.mxu0 %v6620_v36  ;;  %3748 = vmatpush1.bf16.msra.mxu1 %v6622_v53 }
 0xcf7   : > { %3708 = vmatprep.subr.bf16.mxu0 %v6626_v63  ;;  %3749 = vmatprep.subr.bf16.mxu1 %v6628_v1 }
 0xcfa   : > { %3709 = vmatpush1.bf16.msra.mxu0 %v6632_v2  ;;  %3750 = vmatpush1.bf16.msra.mxu1 %v6634_v6 }
 0xcfb   : > { %3710 = vmatprep.subr.bf16.mxu0 %v6638_v7  ;;  %3751 = vmatprep.subr.bf16.mxu1 %v6640_v8 }
 0xcfe   : > { %3711 = vmatpush1.bf16.msra.mxu0 %v6644_v17  ;;  %3752 = vmatpush1.bf16.msra.mxu1 %v6646_v18 }
 0xcff   : > { %3712 = vmatprep.subr.bf16.mxu0 %v6650_v19  ;;  %3753 = vmatprep.subr.bf16.mxu1 %v6652_v20 }
 0xd02   : > { %3713 = vmatpush1.bf16.msra.mxu0 %v6656_v21  ;;  %3754 = vmatpush1.bf16.msra.mxu1 %v6658_v22 }
 0xd03   : > { %3714 = vmatprep.subr.bf16.mxu0 %v6662_v23  ;;  %3755 = vmatprep.subr.bf16.mxu1 %v6664_v24 }
 0xd06   : > { %3715 = vmatpush1.bf16.msra.mxu0 %v6668_v25  ;;  %3756 = vmatpush1.bf16.msra.mxu1 %v6670_v26 }
 0xd07   : > { %3716 = vmatprep.subr.bf16.mxu0 %v6674_v27  ;;  %3757 = vmatprep.subr.bf16.mxu1 %v6676_v28 }
 0xd0a   : > { %3717 = vmatpush1.bf16.msra.mxu0 %v6680_v4  ;;  %3758 = vmatpush1.bf16.msra.mxu1 %v6682_v34 }
 0xd0b   : > { %3842 = vmatprep.subr.bf16.mxu0 %v6586_v9  ;;  %3883 = vmatprep.subr.bf16.mxu1 %v6588_v16  ;;  %v3560_v9 = vld [vmem:[#allocation2 + $0x4] ss:$8 sm:$0xf] }
 0xdad   : > { %v3596_v61 = vpop.f32.mrf.mxu0  ;;  %v3637_v49 = vpop.f32.mrf.mxu1 }
 0xdaf   : > { %v3598_v54 = vpop.f32.mrf.mxu0  ;;  %v3639_v56 = vpop.f32.mrf.mxu1 }
 0xdb0   : > { %v3648_v39 = vcombine.low %v3596_v61, %v3598_v54  ;;  %v3649_v40 = vcombine.low %v3637_v49, %v3639_v56 }
 0xdb1   : > { %v3600_v55 = vpop.f32.mrf.mxu0  ;;  %v3641_v51 = vpop.f32.mrf.mxu1 }
 0xdb2   : > { %v3656_v57 = vrot.slane %v3648_v39, %v6274_v52  ;;  %v3663_v58 = vrot.slane %v3649_v40, %v6274_v52 }
 0xdb3   : > { %v3601_v60 = vpop.f32.mrf.mxu0  ;;  %v3642_v62 = vpop.f32.mrf.mxu1 }
 0xdb4   : > { %v3664_v48 = vcombine.low %v3656_v57, %v3663_v58 }
 0xdb6   : > { %v3671_v29 = vrot.slane %v3664_v48, %v6274_v52 }
 0xdb8   : > { %v3673_v30 = vadd.f32 %v3671_v29, %v3560_v9 }
 0xdba   : > { %v3674_v16 = vmul.f32 0.5, %v3673_v30  ;;  %v3679_v31 = vrot.slane %v3673_v30, 1  ;;  %v3685_v15 = vrot.slane %v3673_v30, 2  ;;  %v3688_v32 = vrot.slane %v3673_v30, 3 }
 0xdbc   : > { %5327 = vtanh.f32 %v3674_v16  ;;  %v3681_v46 = vmul.f32 0.5, %v3679_v31  ;;  %v3690_v33 = vmul.f32 0.5, %v3688_v32  ;;  %v5411_v32 = vld [vmem:[#allocation16 + $0xc4] ss:$16 sps:$4 sm:$0xff]  }
 0xdbe   : > { %5329 = vtanh.f32 %v3681_v46  ;;  %v5409_v46 = vld [vmem:[#allocation16 + $0xe0] ss:$16 sps:$4 sm:$0xff]  }
 0xdbf   : > { %5331 = vtanh.f32 %v3685_v15  ;;  %v5410_v15 = vld [vmem:[#allocation16 + $0xe8] ss:$16 sps:$4 sm:$0xff]  }
 0xdc0   : > { %5333 = vtanh.f32 %v3690_v33  ;;  %v5412_v33 = vld [vmem:[#allocation16 + $0xcc] ss:$16 sps:$4 sm:$0xff]  }
 0xdc9   : > { %v5328_v41 = vpop.eup %5327 }
 0xdca   : > { %v3676_v37 = vmul.f32 0.5, %v5328_v41  ;;  %v5413_v41 = vld [vmem:[#allocation16 + $0xc0] ss:$16 sps:$4 sm:$0xff]  }
 0xdcb   : > { %v5330_v3 = vpop.eup %5329 }
 0xdcc   : > { %v3677_v11 = vadd.f32 0.5, %v3676_v37  ;;  %v3683_v44 = vmul.f32 0.5, %v5330_v3  ;;  %v5332_v45 = vpop.eup %5331  ;;  %v5414_v37 = vld [vmem:[#allocation16 + $0xc8] ss:$16 sps:$4 sm:$0xff]   ;;  %v5415_v3 = vld [vmem:[#allocation16 + $0xa4] ss:$16 sps:$4 sm:$0xff]  }
 0xdcd   : > { %v5334_v56 = vpop.eup %5333 }
 0xdce   : > { %v3684_v35 = vadd.f32 0.5, %v3683_v44  ;;  %v3695_v49 = vmul.f32 %v5332_v45, %v3677_v11  ;;  %v3692_v39 = vmul.f32 0.5, %v5334_v56  ;;  %v5416_v11 = vld [vmem:[#allocation16 + $0xac] ss:$16 sps:$4 sm:$0xff]   ;;  %v5417_v44 = vld [vmem:[#allocation16 + $0xa0] ss:$16 sps:$4 sm:$0xff]  }
 0xdcf   : > { %v5419_v45 = vld [vmem:[#allocation16 + $0x84] ss:$16 sps:$4 sm:$0xff]  }
 0xdd0   : > { %v3694_v61 = vmul.f32 %v3684_v35, %v6861_v42  ;;  %v3693_v40 = vadd.f32 0.5, %v3692_v39  ;;  %v5418_v35 = vld [vmem:[#allocation16 + $0xa8] ss:$16 sps:$4 sm:$0xff]   ;;  %v5423_v56 = vld [vmem:[#allocation16 + $0x64] ss:$16 sps:$4 sm:$0xff]  }
 0xdd1   : > { %v5424_v39 = vld [vmem:[#allocation16 + $0x6c] ss:$16 sps:$4 sm:$0xff]  }
 0xdd2   : > { %v6902_v54 = vadd.f32 %v3695_v49, %v3694_v61  ;;  %v5420_v61 = vld [vmem:[#allocation16 + $0x8c] ss:$16 sps:$4 sm:$0xff]   ;;  %v5421_v49 = vld [vmem:[#allocation16 + $0x80] ss:$16 sps:$4 sm:$0xff]  }
 0xdd4   : > { %5335 = vtanh.f32 %v6902_v54 }
 0xde1   : > { %v5336_v55 = vpop.eup %5335 }
 0xde2   : > { %v3698_v51 = vmul.f32 %v5336_v55, %v3693_v40  ;;  %v5425_v40 = vld [vmem:[#allocation16 + $0x60] ss:$16 sps:$4 sm:$0xff]   ;;  %v5426_v55 = vld [vmem:[#allocation16 + $0x68] ss:$16 sps:$4 sm:$0xff]  }
 0xde4   : > { %3699 = vst [vmem:[#allocation4 + $0x4] sm:$0x1] %v3698_v51  ;;  %v3701_v57 = vpack.c.bf16 %v3698_v51, %v3698_v51  ;;  %v5427_v51 = vld [vmem:[#allocation16 + $0x44] ss:$16 sps:$4 sm:$0xff]  }
 0xde6   : > { %3735 = vmatmul.mubr.bf16.vlgmr.msra.gmra.mxu0 %v3701_v57  ;;  %3776 = vmatmul.mubr.bf16.vlgmr.msra.gmra.mxu1 %v3701_v57  ;;  %v5428_v57 = vld [vmem:[#allocation16 + $0x4c] ss:$16 sps:$4 sm:$0xff]  }
 0xde7   : > { %3843 = vmatpush1.bf16.msra.mxu0 %v6596_v38  ;;  %3884 = vmatpush1.bf16.msra.mxu1 %v6598_v10  ;;  %v5407_v38 = vld [vmem:[#allocation16 + $0xe4] ss:$16 sps:$4 sm:$0xff]   ;;  %v5408_v10 = vld [vmem:[#allocation16 + $0xec] ss:$16 sps:$4 sm:$0xff]  }
 0xde8   : > { %3844 = vmatprep.subr.bf16.mxu0 %v6600_v59  ;;  %3885 = vmatprep.subr.bf16.mxu1 %v6602_v12 }
 0xde9   : > { %3874 = vmatprep.mubr.bf16.mxu0 %v5780_v0  ;;  %3915 = vmatprep.mubr.bf16.mxu1 %v5780_v0 }
 0xdeb   : > { %3845 = vmatpush1.bf16.msra.mxu0 %v6606_v14  ;;  %3886 = vmatpush1.bf16.msra.mxu1 %v6608_v13 }
 0xdec   : > { %3846 = vmatprep.subr.bf16.mxu0 %v6612_v43  ;;  %3887 = vmatprep.subr.bf16.mxu1 %v6614_v5 }
 0xdef   : > { %3847 = vmatpush1.bf16.msra.mxu0 %v6620_v36  ;;  %3888 = vmatpush1.bf16.msra.mxu1 %v6622_v53 }
 0xdf0   : > { %3848 = vmatprep.subr.bf16.mxu0 %v6626_v63  ;;  %3889 = vmatprep.subr.bf16.mxu1 %v6628_v1 }
 0xdf3   : > { %3849 = vmatpush1.bf16.msra.mxu0 %v6632_v2  ;;  %3890 = vmatpush1.bf16.msra.mxu1 %v6634_v6 }
 0xdf4   : > { %3850 = vmatprep.subr.bf16.mxu0 %v6638_v7  ;;  %3891 = vmatprep.subr.bf16.mxu1 %v6640_v8 }
 0xdf7   : > { %3851 = vmatpush1.bf16.msra.mxu0 %v6644_v17  ;;  %3892 = vmatpush1.bf16.msra.mxu1 %v6646_v18  ;;  %v3700_v17 = vld [vmem:[#allocation2 + $0x5] ss:$8 sm:$0xf] }
 0xdf8   : > { %3852 = vmatprep.subr.bf16.mxu0 %v6650_v19  ;;  %3893 = vmatprep.subr.bf16.mxu1 %v6652_v20 }
 0xdfb   : > { %3853 = vmatpush1.bf16.msra.mxu0 %v6656_v21  ;;  %3894 = vmatpush1.bf16.msra.mxu1 %v6658_v22 }
 0xdfc   : > { %3854 = vmatprep.subr.bf16.mxu0 %v6662_v23  ;;  %3895 = vmatprep.subr.bf16.mxu1 %v6664_v24 }
 0xdff   : > { %3855 = vmatpush1.bf16.msra.mxu0 %v6668_v25  ;;  %3896 = vmatpush1.bf16.msra.mxu1 %v6670_v26 }
 0xe00   : > { %3856 = vmatprep.subr.bf16.mxu0 %v6674_v27  ;;  %3897 = vmatprep.subr.bf16.mxu1 %v6676_v28 }
 0xe03   : > { %3857 = vmatpush1.bf16.msra.mxu0 %v6680_v4  ;;  %3898 = vmatpush1.bf16.msra.mxu1 %v6682_v34 }
 0xe04   : > { %3982 = vmatprep.subr.bf16.mxu0 %v5407_v38  ;;  %4023 = vmatprep.subr.bf16.mxu1 %v5408_v10  ;;  %v5429_v38 = vld [vmem:[#allocation16 + $0x40] ss:$16 sps:$4 sm:$0xff]   ;;  %v5430_v10 = vld [vmem:[#allocation16 + $0x48] ss:$16 sps:$4 sm:$0xff]  }
 0xea6   : > { %v3736_v59 = vpop.f32.mrf.mxu0  ;;  %v3777_v12 = vpop.f32.mrf.mxu1 }
 0xea8   : > { %v3738_v14 = vpop.f32.mrf.mxu0  ;;  %v3779_v13 = vpop.f32.mrf.mxu1 }
 0xea9   : > { %v3788_v43 = vcombine.low %v3736_v59, %v3738_v14  ;;  %v3789_v5 = vcombine.low %v3777_v12, %v3779_v13  ;;  %v5431_v59 = vld [vmem:[#allocation16 + $0x24] ss:$16 sps:$4 sm:$0xff]   ;;  %v5432_v12 = vld [vmem:[#allocation16 + $0x2c] ss:$16 sps:$4 sm:$0xff]   ;;  %v5433_v14 = vld [vmem:[#allocation16 + $0x20] ss:$16 sps:$4 sm:$0xff]  }
 0xeaa   : > { %v3740_v36 = vpop.f32.mrf.mxu0  ;;  %v3781_v53 = vpop.f32.mrf.mxu1  ;;  %v5434_v13 = vld [vmem:[#allocation16 + $0x28] ss:$16 sps:$4 sm:$0xff]  }
 0xeab   : > { %v3796_v63 = vrot.slane %v3788_v43, %v6274_v52  ;;  %v3803_v1 = vrot.slane %v3789_v5, %v6274_v52  ;;  %v5435_v43 = vld [vmem:[#allocation16 + $0x4] ss:$16 sps:$4 sm:$0xff]   ;;  %v5436_v5 = vld [vmem:[#allocation16 + $0xc] ss:$16 sps:$4 sm:$0xff]   ;;  %v5437_v36 = vld [vmem:[#allocation16] ss:$16 sps:$4 sm:$0xff]  }
 0xeac   : > { %v3741_v2 = vpop.f32.mrf.mxu0  ;;  %v3782_v6 = vpop.f32.mrf.mxu1  ;;  %v5438_v53 = vld [vmem:[#allocation16 + $0x8] ss:$16 sps:$4 sm:$0xff]  }
 0xead   : > { %v3804_v7 = vcombine.low %v3796_v63, %v3803_v1  ;;  %v6946_v63 = vld [vmem:[#allocation4 + $0x8] sm:$0xff] }
 0xeaf   : > { %v3811_v8 = vrot.slane %v3804_v7, %v6274_v52 }
 0xeb1   : > { %v3813_v18 = vadd.f32 %v3811_v8, %v3700_v17 }
 0xeb3   : > { %v3814_v19 = vmul.f32 0.5, %v3813_v18  ;;  %v3819_v20 = vrot.slane %v3813_v18, 1  ;;  %v3825_v22 = vrot.slane %v3813_v18, 2  ;;  %v3828_v23 = vrot.slane %v3813_v18, 3 }
 0xeb5   : > { %5337 = vtanh.f32 %v3814_v19  ;;  %v3821_v21 = vmul.f32 0.5, %v3819_v20  ;;  %v3830_v24 = vmul.f32 0.5, %v3828_v23 }
 0xeb7   : > { %5339 = vtanh.f32 %v3821_v21 }
 0xeb8   : > { %5341 = vtanh.f32 %v3825_v22 }
 0xeb9   : > { %5343 = vtanh.f32 %v3830_v24 }
 0xec2   : > { %v5338_v25 = vpop.eup %5337 }
 0xec3   : > { %v3816_v26 = vmul.f32 0.5, %v5338_v25 }
 0xec4   : > { %v5340_v27 = vpop.eup %5339 }
 0xec5   : > { %v3817_v28 = vadd.f32 0.5, %v3816_v26  ;;  %v3823_v4 = vmul.f32 0.5, %v5340_v27  ;;  %v5342_v42 = vpop.eup %5341  ;;  %v3840_v26 = vld [vmem:[#allocation2 + $0x6] ss:$8 sm:$0xf] }
 0xec6   : > { %v5344_v48 = vpop.eup %5343 }
 0xec7   : > { %v3824_v34 = vadd.f32 0.5, %v3823_v4  ;;  %v3835_v60 = vmul.f32 %v5342_v42, %v3817_v28  ;;  %v3832_v29 = vmul.f32 0.5, %v5344_v48 }
 0xec9   : > { %v3834_v58 = vmul.f32 %v3824_v34, %v6902_v54  ;;  %v3833_v9 = vadd.f32 0.5, %v3832_v29  ;;  %v5422_v54 = vld [vmem:[#allocation16 + $0x88] ss:$16 sps:$4 sm:$0xff]  }
 0xecb   : > { %v6941_v62 = vadd.f32 %v3835_v60, %v3834_v58 }
 0xecd   : > { %5345 = vtanh.f32 %v6941_v62 }
 0xeda   : > { %v5346_v30 = vpop.eup %5345 }
 0xedb   : > { %v3838_v16 = vmul.f32 %v5346_v30, %v3833_v9 }
 0xedd   : > { %3839 = vst [vmem:[#allocation4 + $0x5] sm:$0x1] %v3838_v16  ;;  %v3841_v31 = vpack.c.bf16 %v3838_v16, %v3838_v16 }
 0xedf   : > { %3875 = vmatmul.mubr.bf16.vlgmr.msra.gmra.mxu0 %v3841_v31  ;;  %3916 = vmatmul.mubr.bf16.vlgmr.msra.gmra.mxu1 %v3841_v31 }
 0xee0   : > { %3983 = vmatpush1.bf16.msra.mxu0 %v5409_v46  ;;  %4024 = vmatpush1.bf16.msra.mxu1 %v5410_v15 }
 0xee1   : > { %3984 = vmatprep.subr.bf16.mxu0 %v5411_v32  ;;  %4025 = vmatprep.subr.bf16.mxu1 %v5412_v33 }
 0xee2   : > { %4014 = vmatprep.mubr.bf16.mxu0 %v5780_v0  ;;  %4055 = vmatprep.mubr.bf16.mxu1 %v5780_v0 }
 0xee4   : > { %3985 = vmatpush1.bf16.msra.mxu0 %v5413_v41  ;;  %4026 = vmatpush1.bf16.msra.mxu1 %v5414_v37 }
 0xee5   : > { %3986 = vmatprep.subr.bf16.mxu0 %v5415_v3  ;;  %4027 = vmatprep.subr.bf16.mxu1 %v5416_v11 }
 0xee8   : > { %3987 = vmatpush1.bf16.msra.mxu0 %v5417_v44  ;;  %4028 = vmatpush1.bf16.msra.mxu1 %v5418_v35 }
 0xee9   : > { %3988 = vmatprep.subr.bf16.mxu0 %v5419_v45  ;;  %4029 = vmatprep.subr.bf16.mxu1 %v5420_v61  ;;  %v4143_v45 = vpack.c.bf16 %v6946_v63, %v6946_v63  ;;  %v5183_v61 = vld [vmem:[#allocation17 + $0x70] ss:$8 sps:$4 sm:$0xff]  }
 0xeec   : > { %3989 = vmatpush1.bf16.msra.mxu0 %v5421_v49  ;;  %4030 = vmatpush1.bf16.msra.mxu1 %v5422_v54  ;;  %v5186_v49 = vld [vmem:[#allocation17 + $0x60] ss:$8 sps:$4 sm:$0xff]   ;;  %v5191_v54 = vld [vmem:[#allocation17 + $0x54] ss:$8 sps:$4 sm:$0xff]  }
 0xeed   : > { %3990 = vmatprep.subr.bf16.mxu0 %v5423_v56  ;;  %4031 = vmatprep.subr.bf16.mxu1 %v5424_v39  ;;  %v5189_v56 = vld [vmem:[#allocation17 + $0x50] ss:$8 sps:$4 sm:$0xff]   ;;  %v5194_v39 = vld [vmem:[#allocation17 + $0x44] ss:$8 sps:$4 sm:$0xff]  }
 0xef0   : > { %3991 = vmatpush1.bf16.msra.mxu0 %v5425_v40  ;;  %4032 = vmatpush1.bf16.msra.mxu1 %v5426_v55  ;;  %v5192_v40 = vld [vmem:[#allocation17 + $0x40] ss:$8 sps:$4 sm:$0xff]   ;;  %v5197_v55 = vld [vmem:[#allocation17 + $0x34] ss:$8 sps:$4 sm:$0xff]  }
 0xef1   : > { %3992 = vmatprep.subr.bf16.mxu0 %v5427_v51  ;;  %4033 = vmatprep.subr.bf16.mxu1 %v5428_v57  ;;  %v5195_v51 = vld [vmem:[#allocation17 + $0x30] ss:$8 sps:$4 sm:$0xff]   ;;  %v5200_v57 = vld [vmem:[#allocation17 + $0x24] ss:$8 sps:$4 sm:$0xff]  }
 0xef4   : > { %3993 = vmatpush1.bf16.msra.mxu0 %v5429_v38  ;;  %4034 = vmatpush1.bf16.msra.mxu1 %v5430_v10  ;;  %v5198_v38 = vld [vmem:[#allocation17 + $0x20] ss:$8 sps:$4 sm:$0xff]   ;;  %v5203_v10 = vld [vmem:[#allocation17 + $0x14] ss:$8 sps:$4 sm:$0xff]  }
 0xef5   : > { %3994 = vmatprep.subr.bf16.mxu0 %v5431_v59  ;;  %4035 = vmatprep.subr.bf16.mxu1 %v5432_v12  ;;  %v5201_v59 = vld [vmem:[#allocation17 + $0x10] ss:$8 sps:$4 sm:$0xff]   ;;  %v5206_v12 = vld [vmem:[#allocation17 + $0x4] ss:$8 sps:$4 sm:$0xff]  }
 0xef8   : > { %3995 = vmatpush1.bf16.msra.mxu0 %v5433_v14  ;;  %4036 = vmatpush1.bf16.msra.mxu1 %v5434_v13  ;;  %v5204_v14 = vld [vmem:[#allocation17] ss:$8 sps:$4 sm:$0xff]  }
 0xef9   : > { %3996 = vmatprep.subr.bf16.mxu0 %v5435_v43  ;;  %4037 = vmatprep.subr.bf16.mxu1 %v5436_v5 }
 0xefc   : > { %3997 = vmatpush1.bf16.msra.mxu0 %v5437_v36  ;;  %4038 = vmatpush1.bf16.msra.mxu1 %v5438_v53 }
 0xefd   : > { %4797 = vmatprep.subr.bf16.mxu1 %v6946_v63 }
 0xf9f   : > { %v3876_v1 = vpop.f32.mrf.mxu0  ;;  %v3917_v2 = vpop.f32.mrf.mxu1 }
 0xfa1   : > { %v3878_v6 = vpop.f32.mrf.mxu0  ;;  %v3919_v7 = vpop.f32.mrf.mxu1 }
 0xfa2   : > { %v3928_v8 = vcombine.low %v3876_v1, %v3878_v6  ;;  %v3929_v17 = vcombine.low %v3917_v2, %v3919_v7 }
 0xfa3   : > { %v3880_v18 = vpop.f32.mrf.mxu0  ;;  %v3921_v19 = vpop.f32.mrf.mxu1 }
 0xfa4   : > { %v3936_v20 = vrot.slane %v3928_v8, %v6274_v52  ;;  %v3943_v21 = vrot.slane %v3929_v17, %v6274_v52 }
 0xfa5   : > { %v3881_v22 = vpop.f32.mrf.mxu0  ;;  %v3922_v23 = vpop.f32.mrf.mxu1 }
 0xfa6   : > { %v3944_v24 = vcombine.low %v3936_v20, %v3943_v21  ;;  %v3980_v21 = vld [vmem:[#allocation2 + $0x7] ss:$8 sm:$0xf] }
 0xfa8   : > { %v3951_v25 = vrot.slane %v3944_v24, %v6274_v52 }
 0xfaa   : > { %v3953_v27 = vadd.f32 %v3951_v25, %v3840_v26 }
 0xfac   : > { %v3954_v28 = vmul.f32 0.5, %v3953_v27  ;;  %v3959_v4 = vrot.slane %v3953_v27, 1  ;;  %v3965_v42 = vrot.slane %v3953_v27, 2  ;;  %v3968_v58 = vrot.slane %v3953_v27, 3 }
 0xfae   : > { %5347 = vtanh.f32 %v3954_v28  ;;  %v3961_v34 = vmul.f32 0.5, %v3959_v4  ;;  %v3970_v60 = vmul.f32 0.5, %v3968_v58 }
 0xfb0   : > { %5349 = vtanh.f32 %v3961_v34 }
 0xfb1   : > { %5351 = vtanh.f32 %v3965_v42 }
 0xfb2   : > { %5353 = vtanh.f32 %v3970_v60 }
 0xfbb   : > { %v5348_v48 = vpop.eup %5347 }
 0xfbc   : > { %v3956_v29 = vmul.f32 0.5, %v5348_v48 }
 0xfbd   : > { %v5350_v9 = vpop.eup %5349 }
 0xfbe   : > { %v3957_v30 = vadd.f32 0.5, %v3956_v29  ;;  %v3963_v16 = vmul.f32 0.5, %v5350_v9  ;;  %v5352_v46 = vpop.eup %5351 }
 0xfbf   : > { %v5354_v41 = vpop.eup %5353 }
 0xfc0   : > { %v3964_v31 = vadd.f32 0.5, %v3963_v16  ;;  %v3975_v32 = vmul.f32 %v5352_v46, %v3957_v30  ;;  %v3972_v37 = vmul.f32 0.5, %v5354_v41 }
 0xfc2   : > { %v3974_v15 = vmul.f32 %v3964_v31, %v6941_v62  ;;  %v3973_v3 = vadd.f32 0.5, %v3972_v37  ;;  %v5185_v62 = vld [vmem:[#allocation17 + $0x74] ss:$8 sps:$4 sm:$0xff]  }
 0xfc3   : > { %4252 = vmatprep.subr.bf16.mxu0 %v5185_v62 }
 0xfc4   : > { %v6953_v33 = vadd.f32 %v3975_v32, %v3974_v15 }
 0xfc6   : > { %5355 = vtanh.f32 %v6953_v33 }
 0xfd3   : > { %v5356_v11 = vpop.eup %5355 }
 0xfd4   : > { %v3978_v44 = vmul.f32 %v5356_v11, %v3973_v3  ;;  %v4293_v3 = vld [vmem:[%s7057_s11] sm:$0x1] }
 0xfd6   : > { %3979 = vst [vmem:[#allocation4 + $0x6] sm:$0x1] %v3978_v44  ;;  %v3981_v35 = vpack.c.bf16 %v3978_v44, %v3978_v44 }
 0xfd8   : > { %4015 = vmatmul.mubr.bf16.vlgmr.msra.gmra.mxu0 %v3981_v35  ;;  %4056 = vmatmul.mubr.bf16.vlgmr.msra.gmra.mxu1 %v3981_v35 }
 0xfd9   : > { %4284 = vmatprep.mubr.bf16.mxu0 %v5780_v0  ;;  %4798 = vmatpush3.bf16.xpose.msra.mxu1 %v4143_v45  ;;  %v5188_v0 = vld [vmem:[#allocation17 + $0x64] ss:$8 sps:$4 sm:$0xff]  }
 0xfda   : > { %4799 = vmatprep.subr.bf16.mxu1 %v6946_v63  ;;  %4253 = vmatpush1.bf16.msra.mxu0 %v5183_v61 }
 0xfdb   : > { %4254 = vmatprep.subr.bf16.mxu0 %v5188_v0  ;;  %4813 = vmatprep.mubr.msk.bf16.mxu1 %vm5783_vm0, %v6946_v63 }
 0xfde   : > { %4255 = vmatpush1.bf16.msra.mxu0 %v5186_v49 }
 0xfdf   : > { %4256 = vmatprep.subr.bf16.mxu0 %v5191_v54 }
 0xfe1   : > { %4800 = vmatpush3.bf16.xpose.msra.mxu1 %v4143_v45 }
 0xfe2   : > { %4801 = vmatprep.subr.bf16.mxu1 %v6946_v63  ;;  %4257 = vmatpush1.bf16.msra.mxu0 %v5189_v56 }
 0xfe3   : > { %4258 = vmatprep.subr.bf16.mxu0 %v5194_v39 }
 0xfe6   : > { %4259 = vmatpush1.bf16.msra.mxu0 %v5192_v40 }
 0xfe7   : > { %4260 = vmatprep.subr.bf16.mxu0 %v5197_v55 }
 0xfe9   : > { %4802 = vmatpush3.bf16.xpose.msra.mxu1 %v4143_v45 }
 0xfea   : > { %4803 = vmatprep.subr.bf16.mxu1 %v6946_v63  ;;  %4261 = vmatpush1.bf16.msra.mxu0 %v5195_v51 }
 0xfeb   : > { %4262 = vmatprep.subr.bf16.mxu0 %v5200_v57 }
 0xfee   : > { %4263 = vmatpush1.bf16.msra.mxu0 %v5198_v38 }
 0xfef   : > { %4264 = vmatprep.subr.bf16.mxu0 %v5203_v10 }
 0xff1   : > { %4804 = vmatpush3.bf16.xpose.msra.mxu1 %v4143_v45 }
 0xff2   : > { %4805 = vmatprep.subr.bf16.mxu1 %v6946_v63  ;;  %4265 = vmatpush1.bf16.msra.mxu0 %v5201_v59 }
 0xff3   : > { %4266 = vmatprep.subr.bf16.mxu0 %v5206_v12 }
 0xff6   : > { %4267 = vmatpush1.bf16.msra.mxu0 %v5204_v14 }
 0xff9   : > { %4806 = vmatpush3.bf16.xpose.msra.mxu1 %v4143_v45 }
 0xffa   : > { %4807 = vmatprep.subr.bf16.mxu1 %v6946_v63 }
0x1001   : > { %4808 = vmatpush3.bf16.xpose.msra.mxu1 %v4143_v45 }
0x1002   : > { %4809 = vmatprep.subr.bf16.mxu1 %v6946_v63 }
0x1009   : > { %4810 = vmatpush3.bf16.xpose.msra.mxu1 %v4143_v45 }
0x100a   : > { %4811 = vmatprep.subr.bf16.mxu1 %v6946_v63 }
0x1098   : > { %v4016_v13 = vpop.f32.mrf.mxu0  ;;  %v4057_v43 = vpop.f32.mrf.mxu1 }
0x109a   : > { %v4018_v5 = vpop.f32.mrf.mxu0  ;;  %v4059_v36 = vpop.f32.mrf.mxu1 }
0x109b   : > { %v4068_v53 = vcombine.low %v4016_v13, %v4018_v5  ;;  %v4069_v1 = vcombine.low %v4057_v43, %v4059_v36 }
0x109c   : > { %v4020_v2 = vpop.f32.mrf.mxu0  ;;  %v4061_v6 = vpop.f32.mrf.mxu1 }
0x109d   : > { %v4076_v7 = vrot.slane %v4068_v53, %v6274_v52  ;;  %v4083_v8 = vrot.slane %v4069_v1, %v6274_v52 }
0x109e   : > { %v4021_v17 = vpop.f32.mrf.mxu0  ;;  %v4062_v18 = vpop.f32.mrf.mxu1 }
0x109f   : > { %v4084_v19 = vcombine.low %v4076_v7, %v4083_v8 }
0x10a1   : > { %v4091_v20 = vrot.slane %v4084_v19, %v6274_v52 }
0x10a3   : > { %v4093_v22 = vadd.f32 %v4091_v20, %v3980_v21 }
0x10a5   : > { %v4094_v23 = vmul.f32 0.5, %v4093_v22  ;;  %v4099_v24 = vrot.slane %v4093_v22, 1  ;;  %v4105_v26 = vrot.slane %v4093_v22, 2  ;;  %v4108_v27 = vrot.slane %v4093_v22, 3 }
0x10a7   : > { %5357 = vtanh.f32 %v4094_v23  ;;  %v4101_v25 = vmul.f32 0.5, %v4099_v24  ;;  %v4110_v28 = vmul.f32 0.5, %v4108_v27 }
0x10a9   : > { %5359 = vtanh.f32 %v4101_v25 }
0x10aa   : > { %5361 = vtanh.f32 %v4105_v26 }
0x10ab   : > { %5363 = vtanh.f32 %v4110_v28 }
0x10b4   : > { %v5358_v4 = vpop.eup %5357 }
0x10b5   : > { %v4096_v34 = vmul.f32 0.5, %v5358_v4 }
0x10b6   : > { %v5360_v42 = vpop.eup %5359 }
0x10b7   : > { %v4097_v58 = vadd.f32 0.5, %v4096_v34  ;;  %v4103_v60 = vmul.f32 0.5, %v5360_v42  ;;  %v5362_v29 = vpop.eup %5361 }
0x10b8   : > { %v5364_v16 = vpop.eup %5363 }
0x10b9   : > { %v4104_v48 = vadd.f32 0.5, %v4103_v60  ;;  %v4115_v9 = vmul.f32 %v5362_v29, %v4097_v58  ;;  %v4112_v31 = vmul.f32 0.5, %v5364_v16 }
0x10bb   : > { %v4114_v52 = vmul.f32 %v4104_v48, %v6953_v33  ;;  %v4113_v46 = vadd.f32 0.5, %v4112_v31  ;;  %v4160_v33 = vld [vmem:[%s7056_s10] sm:$0x3] }
0x10bc   : > { %v4169_v11 = vrot.slane %v4160_v33, %v6264_v50  ;;  %v4165_v49 = vrot.slane %v4160_v33, %v6257_v47 }
0x10bd   : > { %v4116_v30 = vadd.f32 %v4115_v9, %v4114_v52 }
0x10bf   : > { %5365 = vtanh.f32 %v4116_v30 }
0x10cc   : > { %v5366_v15 = vpop.eup %5365 }
0x10cd   : > { %v4118_v32 = vmul.f32 %v5366_v15, %v4113_v46 }
0x10cf   : > { %4119 = vst [vmem:[#allocation4 + $0x7] sm:$0x1] %v4118_v32 }
0x10d6   : > { %v4120_v41 = vld [vmem:[#allocation4] sm:$0xff] }
0x10d7   : > { %v4136_v37 = vpack.c.bf16 %v6946_v63, %v4120_v41 }
0x10d9   : > { %4285 = vmatmul.mubr.bf16.vlgmr.msra.gmra.mxu0 %v4136_v37  ;;  %4812 = vmatpush3.bf16.xpose.msra.mxu1 %v4136_v37 }
0x10e0   : > { %4814 = vmatmul.mubr.bf16.vlgmr.msra.gmra.mxu1 %v4293_v3 }
0x1199   : > { %v4286_v44 = vpop.f32.mrf.mxu0 }
0x119a   : > { %v4287_v39 = vadd.f32 %v4286_v44, %v4165_v49 }
0x119b   : > { %v4288_v35 = vpop.f32.mrf.mxu0 }
0x119c   : > { %v4289_v45 = vadd.f32 %v4288_v35, %v4169_v11  ;;  %v4360_v40 = vmul.f32 1.442695, %v4287_v39 }
0x119d   : > { %v4290_v62 = vpop.f32.mrf.mxu0 }
0x119e   : > { %4336 = vperm.xlu0 %4942, %v4289_v45   ;;  %5367 = vpow2.f32 %v4360_v40 }
0x119f   : > { %v4291_v61 = vpop.f32.mrf.mxu0 }
0x11a0   : > { %v4328_v63 = vpop.f32.mrf.mxu1 }
0x11a1   : > { %v4342_v50 = vrot.slane %v4328_v63, %v6257_v47 }
0x11a2   : > { %v4815_v0 = vpop.f32.mrf.mxu1 }
0x11a4   : > { %v4331_v54 = vpop.f32.mrf.mxu1 }
0x11a6   : > { %v4816_v56 = vpop.f32.mrf.mxu1 }
0x11ab   : > { %v5368_v55 = vpop.eup %5367 }
0x11bd   : > { %4362 = vadd.xlane.f32.xlu0 %v5368_v55 }
0x1219   : > { %v4337_v51 = vpop.permute.xlu0 %4336 }
0x121a   : > { %v4343_v57 = vadd.f32 %v4342_v50, %v4337_v51 }
0x121c   : > { %v4344_v38 = vmul.f32 1.442695, %v4343_v57 }
0x121e   : > { %5369 = vpow2.f32 %v4344_v38 }
0x122b   : > { %v5370_v10 = vpop.eup %5369 }
0x122c   : > { %v4350_v59 = vrot.slane %v5370_v10, 4 }
0x122e   : > { %v4351_v12 = vadd.f32 %v5370_v10, %v4350_v59 }
0x1230   : > { %v4352_v14 = vrot.slane %v4351_v12, 2 }
0x1232   : > { %v4353_v13 = vadd.f32 %v4352_v14, %v4351_v12 }
0x1234   : > { %v4354_v43 = vrot.slane %v4353_v13, 1 }
0x1236   : > { %v4355_v5 = vadd.f32 %v4354_v43, %v4353_v13 }
0x1238   : > { %v4356_v36 = vadd.f32 1e-20, %v4355_v5 }
0x123a   : > { %5371 = vrcp.f32 %v4356_v36 }
0x1246   : > { %v4363_v47 = vpop.xlane.xlu0 %4362 }
0x1247   : > { %v5372_v53 = vpop.eup %5371  ;;  %v4364_v1 = vadd.f32 1e-20, %v4363_v47 }
0x1248   : > { %v4358_v2 = vmul.f32 %v5372_v53, %v5370_v10 }
0x1249   : > { %5373 = vrcp.f32 %v4364_v1 }
0x124a   : > { %4359 = vst [vmem:[%s583_s21] sm:$0xff] %v4358_v2 }
0x124b   : > { %5665 = shalt.err (!%p5662_p8)
}
0x124c   : > { %s5666_s9 = scalar_lea.hbm %s6990_s6, 128  ;;  %s5670_s18 = scalar_lea.hbm %s7058_s12, 512 }
0x124d   : > { %p5667_p7 = scmp.ne.s32.totalorder %s6990_s6, %s5666_s9  ;;  %p5671_p0 = scmp.lt.s32.totalorder %s6990_s6, %s7058_s12 }
0x124e   : > { %p5672_p2 = scmp.lt.s32.totalorder %s5670_s18, %s5666_s9 }
0x124f   : > { %p5668_p11 = pnand %p5667_p7, %p7102_p12 }
0x1250   : > { %p5673_p6 = por %p5672_p2, %p5671_p0 }
0x1251   : > { %p5669_p13 = pneg %p5668_p11 }
0x1253   : > { %p5674_p10 = pnand %p5673_p6, %p5669_p13 }
0x1255   : > { %5677 = shalt.err (!%p5674_p10)
}
0x1256   : > { %4845 = dma.vmem_to_hbm [thread:$0]  (%p7102_p12), %s4388_s27, 128, %s6990_s6, %s4369_s15   ;;  %v5374_v6 = vpop.eup %5373 }
0x1257   : > { %s590_s24 = scalar_lea.vmem [#allocation20], %s4604_s4  ;;  %v4366_v7 = vmul.f32 %v5374_v6, %v5368_v55  ;;  %s4398_s19 = scalar_lea.hbm %s7059_s13, %s4784_s22 }
0x1258   : > { %s4400_s7 = sshll.u32 %s590_s24, 4  ;;  %s4374_s2 = scalar_lea.sflag [#allocation21], %s6078_s29  ;;  %s4401_s7 = int_to_ptr.vmem [resolvable:$true] %s4400_s7 }
0x1259   : > { %4367 = vst [vmem:[%s590_s24] sm:$0xff] %v4366_v7  ;;  %s5678_s9 = scalar_lea.vmem %s4401_s7, 128  ;;  %s5785_s20 = smov [#allocation20]  }
0x125a   : > { %p5679_p1 = scmp.ne.s32.totalorder %s4401_s7, %s5678_s9  ;;  %s5682_s27 = sshll.u32 %s5785_s20, 4  ;;  %s5683_s27 = int_to_ptr.vmem [resolvable:$false] %s5682_s27 }
0x125b   : > { %s5684_s4 = scalar_lea.vmem %s5683_s27, 256  ;;  %p5685_p9 = scmp.lt.s32.totalorder %s4401_s7, %s5683_s27 }
0x125c   : > { %p5680_p5 = pnand %p5679_p1, %p7102_p12  ;;  %p5686_p3 = scmp.lt.s32.totalorder %s5684_s4, %s5678_s9 }
0x125e   : > { %p5681_p4 = pneg %p5680_p5  ;;  %p5687_p8 = por %p5686_p3, %p5685_p9 }
0x1260   : > { %p5688_p7 = pnand %p5687_p8, %p5681_p4 }
0x1262   : > { %5691 = shalt.err (!%p5688_p7)
}
0x1263   : > { %s5692_s14 = scalar_lea.hbm %s4398_s19, 128  ;;  %s5696_s6 = scalar_lea.hbm %s7059_s13, 512 }
0x1264   : > { %p5693_p11 = scmp.ne.s32.totalorder %s4398_s19, %s5692_s14  ;;  %p5697_p2 = scmp.lt.s32.totalorder %s4398_s19, %s7059_s13 }
0x1265   : > { %p5698_p6 = scmp.lt.s32.totalorder %s5696_s6, %s5692_s14 }
0x1266   : > { %p5694_p13 = pnand %p5693_p11, %p7102_p12 }
0x1267   : > { %p5699_p10 = por %p5698_p6, %p5697_p2 }
0x1268   : > { %p5695_p0 = pneg %p5694_p13 }
0x126a   : > { %p5700_p1 = pnand %p5699_p10, %p5695_p0 }
0x126c   : > { %5703 = shalt.err (!%p5700_p1)
}
0x126d   : > { %4846 = dma.vmem_to_hbm [thread:$0]  (%p7102_p12), %s4401_s7, 128, %s4398_s19, %s4374_s2  }
0x126e PF: > { %s7103_s18 = sld [smem:[#allocation33_spill]]  ;;  %p4895_p5 = scmp.ge.s32.totalorder %s5766_s28, 2 }
0x126f   : > { %s4412_s3 = sand.u32 1, %s5754_s25  }
0x1270   : > { %s4413_s21 = scalar_lea.sflag [#allocation7], %s4412_s3 }
0x1274   : > { %p7104_p4 = scmp.ne.s32.totalorder %s7103_s18, 0 }
0x1276   : > { %p4876_p9 = pnand %p4895_p5, %p7104_p4 }
0x1278   : > { %p4877_p3 = pneg %p4876_p9 }
0x127a   : > { %5745 = dma.done.wait (%p4877_p3), %s4413_s21, 128  }
0x127b   : > { %5747 = vsyncadd (%p4877_p3), %s4413_s21, 4294967168  ;;  %s4422_s24 = scalar_lea.sflag [#allocation21], %s4412_s3 }
0x127c   : > { %5749 = dma.done.wait (%p4877_p3), %s4422_s24, 128  }
0x127d   : > { %5751 = vsyncadd (%p4877_p3), %s4422_s24, 4294967168  ;;  %s7105_s28 = sld [smem:[#allocation31_spill]]  ;;  %s7108_s25 = smov %s5758_s26 }
0x127e   : > { %s7106_s17 = sld [smem:[#allocation30_spill]] }
0x127f   : > { %s7107_s27 = sld [smem:[#allocation32_spill]] }
0x1283   : > { %p36_p12 = scmp.ge.s32.totalorder %s7105_s28, 6  }
0x1284   : > { %s7109_s26 = smov %s7106_s17 }
0x1285   :  { %38 = sbr.rel (!%p36_p12) target bundleno = 19 (0x13), region = 174 }
0x128a   :  { %4427 = vsyncpa [#allocation6], 1 }
0x128b   :  { %4429 = vsyncpa [#allocation6 + $0x1], 1 }
0x128c   :  { %4430 = vsyncpa [#allocation9], 1 }
0x128d   :  { %4432 = vsyncpa [#allocation9 + $0x1], 1 }
0x128e   :  { %4433 = vsyncpa [#allocation12], 1 }
0x128f   :  { %4434 = vsyncpa [#allocation15], 1 }
0x1290   :  { %4435 = vsyncpa [#allocation18], 1 }
0x1291   :  { %4436 = vsyncpa [#allocation7], 1 }
0x1292   :  { %4438 = vsyncpa [#allocation7 + $0x1], 1 }
0x1293   :  { %4439 = vsyncpa [#allocation21], 1 }
0x1294   :  { %4441 = vsyncpa [#allocation21 + $0x1], 1 }

</bundles_post_ra>
